<compile_context>
chip_gen: v6e
topology: v6e:2x2x1
jax: 0.10.0
libtpu: 0.0.40
codegen_flags: <defaults>
</compile_context>

<pallas_src>
import functools

import jax
import jax.numpy as jnp
import numpy as np
from jax import lax
from jax.experimental import pallas as pl
from jax.experimental.pallas import tpu as pltpu

NF = 8            # nf
N_LAYERS = 4      # n_layers
H_STEP = 0.5      # h = t_end / n_layers = (0.5 * 4) / 4
C1, C2 = 16, 32   # conv channel counts
S1, S2 = 14, 7    # spatial side after conv1 / conv2 (28 -> 14 -> 7)
RPI = 224         # conv1 rows per image in the kernel (196 valid + 28 zero pad, 8-aligned)
TAP_ROWS = 56     # conv2 rows per 3x3 tap block (49 valid + 7 zero pad, 8-aligned)
N_TAPS = 9
N_CLASSES = 10


# ----------------------------------------------------------------------------
# Fused Pallas kernel: the entire forward pass, VMEM resident.
# ----------------------------------------------------------------------------
def _net_global_kernel(p1_ref, w1_ref,                       # conv1 (bias folded into w1)
                       sel_ref, w2_ref, b2_ref,              # conv2 (stacked 0/1 gather + taps)
                       tile_ref, w3big_ref, gsum_ref, b3_ref,  # fc 1568 -> nf
                       k_ref, bk_ref, w2h_ref,                # Hamiltonian H1/J1
                       wfc_ref, bfc_ref,                      # fc nf -> 10
                       o_ref, *, batch, n_layers, h):
    f32 = jnp.float32

    # --- conv1 (3x3, stride 2, pad 1) as im2col matmul, bias folded in (K = 10) ---
    y1 = jnp.maximum(
        jnp.dot(p1_ref[...], w1_ref[...], preferred_element_type=f32), 0.0)  # (B*224, 16)
    y1_bf = y1.astype(jnp.bfloat16)        # MXU-native operand for the exact 0/1 gather

    sel = sel_ref[...]                     # (9*56, 224) bf16, batch independent
    tile = tile_ref[...]                   # (32, nf*32)
    w3big = w3big_ref[...]                 # (56, nf*32), rows >= 49 are zero

    rows = []
    for b in range(batch):                 # B is tiny; static unroll
        # conv2 im2col gather for one image: ONE stacked (504, 224)@(224, 16) matmul.
        g = jnp.dot(sel, y1_bf[b * RPI:(b + 1) * RPI, :],
                    preferred_element_type=f32)                       # (9*56, 16)
        # per-tap weight contraction, accumulated (slices are 56-row = 8-aligned).
        acc = jnp.zeros((TAP_ROWS, w2_ref.shape[2]), f32)
        for t in range(N_TAPS):
            acc = acc + jnp.dot(g[t * TAP_ROWS:(t + 1) * TAP_ROWS, :], w2_ref[t],
                                preferred_element_type=f32)           # (56, 32)
        y2 = jnp.maximum(acc + b2_ref[...], 0.0)                      # rows >= 49 are junk

        # fc 1568 -> nf, stage 1:  y3[f] = sum_{s,c} y2[s,c] * w3[f, c*49+s]
        #   = sum_s [ (y2 @ Tile) * W3big ][s, f*32+c] summed over c later via Gsum.
        # W3big's zero pad rows kill the junk rows; the s-sum is a free sublane reduce.
        e = jnp.dot(y2, tile, preferred_element_type=f32) * w3big     # (56, nf*32)
        rows.append(jnp.sum(e, axis=0, keepdims=True))                # (1, nf*32)

    s = jnp.concatenate(rows, axis=0)                                  # (B, nf*32)
    y = jnp.dot(s, gsum_ref[...], preferred_element_type=f32) + b3_ref[...]   # (B, nf)

    # --- Hamiltonian H1/J1 layers:  Y <- Y + h * tanh(Y K_l + b_l) @ (J K_l)^T ---
    # Tiny (B,8)@(8,8) matmuls: deliberately left un-padded / un-restructured (off the
    # critical path; padding to 128 lanes would only add VMEM/DMA).
    for l in range(n_layers):              # static unroll (L = 4)
        z = jnp.tanh(jnp.dot(y, k_ref[l], preferred_element_type=f32) + bk_ref[l])
        y = y + h * jnp.dot(z, w2h_ref[l], preferred_element_type=f32)

    # --- fc nf -> 10 + log_softmax over classes ---
    logits = jnp.dot(y, wfc_ref[...], preferred_element_type=f32) + bfc_ref[...]
    m = jnp.max(logits, axis=1, keepdims=True)
    zc = logits - m
    o_ref[...] = zc - jnp.log(jnp.sum(jnp.exp(zc), axis=1, keepdims=True))


# ----------------------------------------------------------------------------
# Glue: conv1 im2col on the raw input, batch-independent 0/1 helpers, weight re-layouts.
# ----------------------------------------------------------------------------
def im2col_s2p1k3(x_nchw):
    """im2col for 3x3 conv, stride 2, padding 1, NCHW input -> (B*Ho*Wo, C*9)."""
    B, C, H, W = x_nchw.shape
    k, stride, pad = 3, 2, 1
    Ho = (H + 2 * pad - k) // stride + 1
    Wo = (W + 2 * pad - k) // stride + 1
    xp = jnp.pad(x_nchw, ((0, 0), (0, 0), (pad, pad), (pad, pad)))
    cols = []
    for dh in range(k):
        for dw in range(k):
            cols.append(xp[:, :, dh:dh + stride * Ho:stride, dw:dw + stride * Wo:stride])
    patches = jnp.stack(cols, axis=0)                 # (9, B, C, Ho, Wo)
    patches = patches.transpose(1, 3, 4, 2, 0)        # (B, Ho, Wo, C, 9)
    return patches.reshape(B * Ho * Wo, C * k * k), Ho, Wo


def build_constants(nf=NF, c2=C2, si=S1, so=S2):
    """Batch-independent 0/1 helper matrices (numpy, built once)."""
    # conv2 gather selector: for 3x3 tap t = dh*3+dw (offsets dh-1, dw-1), rows
    # t*56 + (oh*7+ow) select conv1 row (2*oh+dh-1)*14 + (2*ow+dw-1) of ONE image when
    # inside the 14x14 grid (stride-2 window + zero padding); pad rows/cols stay zero.
    sel = np.zeros((N_TAPS * TAP_ROWS, RPI), np.float32)
    for t in range(N_TAPS):
        dh, dw = t // 3 - 1, t % 3 - 1
        for oh in range(so):
            for ow in range(so):
                ih, iw = 2 * oh + dh, 2 * ow + dw
                if 0 <= ih < si and 0 <= iw < si:
                    sel[t * TAP_ROWS + oh * so + ow, ih * si + iw] = 1.0
    # fc(1568->nf) helpers:  y3 = sum_s[(Y2 @ Tile) * W3big] @ Gsum
    tile = np.tile(np.eye(c2, dtype=np.float32), (1, nf))              # (32, nf*32)
    gsum = np.repeat(np.eye(nf, dtype=np.float32), c2, axis=0)         # (nf*32, nf)
    return {'sel': jnp.asarray(sel, jnp.bfloat16),   # 0/1 exact in bf16, halves DMA bytes
            'tile': jnp.asarray(tile),
            'gsum': jnp.asarray(gsum)}


def net_global_forward(x, params, consts):
    B = x.shape[0]
    assert x.shape[1:] == (1, 28, 28), "constants are built for 1x28x28 MNIST inputs"
    nf = params['w3'].shape[0]
    n_layers = params['K'].shape[0]
    s2 = S2 * S2

    # conv1 im2col on the raw ~14 KB input (only XLA op touching activations):
    # append a ones column (bias fold) and zero-pad each image's 196 rows to 224.
    p1, _, _ = im2col_s2p1k3(x)                                      # (B*196, 9)
    p1 = jnp.concatenate([p1, jnp.ones((p1.shape[0], 1), p1.dtype)], axis=1)
    p1 = jnp.pad(p1.reshape(B, S1 * S1, 10),
                 ((0, 0), (0, RPI - S1 * S1), (0, 0))).reshape(B * RPI, 10)

    # conv1 weight with bias row appended (K: 9 -> 10).
    w1aug = jnp.concatenate([params['w1'].reshape(C1, 9).T,
                             params['b1'].reshape(1, C1)], axis=0)   # (10, 16)
    w2taps = jnp.transpose(params['w2'].reshape(C2, C1, 9), (2, 1, 0))   # (9, 16, 32)
    b2 = params['b2'].reshape(1, C2)
    # fc weight laid out to match the kernel's (spatial-row, channel) activation layout;
    # ONE copy (not tiled by batch), zero-padded to the 56-row tap block.
    w3big = jnp.pad(
        jnp.transpose(params['w3'].reshape(nf, C2, s2), (2, 0, 1)).reshape(s2, nf * C2),
        ((0, TAP_ROWS - s2), (0, 0)))                                # (56, nf*32)
    b3 = params['b3'].reshape(1, nf)
    w2h = jnp.einsum('ij,ljk->lki', params['J'], params['K'])        # stacked (J @ K_l)^T
    wfct = params['wfc'].T                                           # (nf, 10)
    bfc = params['bfc'].reshape(1, N_CLASSES)

    inputs = (p1, w1aug,
              consts['sel'], w2taps, b2,
              consts['tile'], w3big, consts['gsum'], b3,
              params['K'], params['bK'], w2h, wfct, bfc)

    vmem_spec = pl.BlockSpec(memory_space=pltpu.MemorySpace.VMEM)

    # Grid-less call: single invocation, whole arrays resident in VMEM (< 2 MiB total),
    # no useless double-buffering of constants.
    # TODO(synk): if batch is ever scaled up, add a leading "parallel" grid axis over
    # batch row-blocks (per-step BlockSpecs on p1 / the output, weights full-resident)
    # to use v7x's 2 TensorCores and stay under its 64 MiB VMEM.
    return pl.pallas_call(
        functools.partial(_net_global_kernel, batch=B, n_layers=n_layers, h=H_STEP),
        out_shape=jax.ShapeDtypeStruct((B, N_CLASSES), jnp.float32),
        in_specs=[vmem_spec] * len(inputs),
        out_specs=vmem_spec,
    )(*inputs)


# ----------------------------------------------------------------------------
# Pure-JAX reference (full f32 precision) for a correctness check.
# ----------------------------------------------------------------------------
def reference_forward(x, params):
    hp = lax.Precision.HIGHEST

    def conv(z, w, b):
        z = lax.conv_general_dilated(
            z, w, window_strides=(2, 2), padding=((1, 1), (1, 1)),
            dimension_numbers=('NCHW', 'OIHW', 'NCHW'), precision=hp)
        return jax.nn.relu(z + b[None, :, None, None])

    y = conv(x, params['w1'], params['b1'])
    y = conv(y, params['w2'], params['b2'])
    y = y.reshape(y.shape[0], -1)
    y = jnp.dot(y, params['w3'].T, precision=hp) + params['b3']
    Y = y
    for l in range(N_LAYERS):
        Kl = params['K'][l]
        bl = params['bK'][l, 0]
        Z = jnp.tanh(jnp.dot(Y, Kl, precision=hp) + bl)
        JK = jnp.dot(params['J'], Kl, precision=hp)
        Y = Y + H_STEP * jnp.dot(Z, JK.T, precision=hp)
    logits = jnp.dot(Y, params['wfc'].T, precision=hp) + params['bfc']
    return jax.nn.log_softmax(logits, axis=1)


# ----------------------------------------------------------------------------
if __name__ == "__main__":
    key = jax.random.PRNGKey(0)
    ks = jax.random.split(key, 10)
    B, nf, L = 2, NF, N_LAYERS

    # MNIST-shaped input (NCHW): Linear(1568, nf) in the encoder implies 28x28x1.
    x = jax.random.normal(ks[0], (B, 1, 28, 28), jnp.float32)

    params = {
        'w1':  jax.random.normal(ks[1], (16, 1, 3, 3), jnp.float32) * 0.2,
        'b1':  jax.random.normal(ks[2], (16,), jnp.float32) * 0.1,
        'w2':  jax.random.normal(ks[3], (32, 16, 3, 3), jnp.float32) * 0.1,
        'b2':  jax.random.normal(ks[4], (32,), jnp.float32) * 0.1,
        'w3':  jax.random.normal(ks[5], (nf, 1568), jnp.float32) * 0.03,
        'b3':  jax.random.normal(ks[6], (nf,), jnp.float32) * 0.1,
        'K':   jax.random.normal(ks[7], (L, nf, nf), jnp.float32) * 0.3,   # K[l] == K_torch[:,:,l]
        'bK':  jax.random.normal(ks[8], (L, 1, nf), jnp.float32) * 0.1,
        'wfc': jax.random.normal(ks[9], (10, nf), jnp.float32) * 0.3,
        'bfc': jnp.zeros((10,), jnp.float32),
    }
    # J1 interconnection matrix: [[0, -I],[I, 0]]
    eye = jnp.eye(nf // 2, dtype=jnp.float32)
    zer = jnp.zeros((nf // 2, nf // 2), jnp.float32)
    params['J'] = jnp.concatenate(
        [jnp.concatenate([zer, eye], axis=0),
         jnp.concatenate([-eye, zer], axis=0)], axis=1)

    consts = build_constants()          # batch independent

    fwd = jax.jit(net_global_forward)
    out = jax.block_until_ready(fwd(x, params, consts))
    assert out.shape == (B, 10)

    ref = reference_forward(x, params)
    # Kernel uses default (single-pass MXU, bf16-operand / f32-accumulate) matmuls;
    # reference is full f32, hence the relaxed tolerance.
    assert jnp.allclose(out, ref, atol=5e-2, rtol=5e-2), (out, ref)
    assert jnp.allclose(jnp.exp(out).sum(axis=1), 1.0, atol=1e-4)   # valid log-probs

    print("KERNEL_OK")
</pallas_src>

<mosaic_0001>
module attributes {stable_mosaic.version = 11 : i64} {
  func.func @_net_global_kernel(%arg0: memref<448x10xf32, #tpu.memory_space<vmem>>, %arg1: memref<10x16xf32, #tpu.memory_space<vmem>>, %arg2: memref<504x224xbf16, #tpu.memory_space<vmem>>, %arg3: memref<9x16x32xf32, #tpu.memory_space<vmem>>, %arg4: memref<1x32xf32, #tpu.memory_space<vmem>>, %arg5: memref<32x256xf32, #tpu.memory_space<vmem>>, %arg6: memref<56x256xf32, #tpu.memory_space<vmem>>, %arg7: memref<256x8xf32, #tpu.memory_space<vmem>>, %arg8: memref<1x8xf32, #tpu.memory_space<vmem>>, %arg9: memref<4x8x8xf32, #tpu.memory_space<vmem>>, %arg10: memref<4x1x8xf32, #tpu.memory_space<vmem>>, %arg11: memref<4x8x8xf32, #tpu.memory_space<vmem>>, %arg12: memref<8x10xf32, #tpu.memory_space<vmem>>, %arg13: memref<1x10xf32, #tpu.memory_space<vmem>>, %arg14: memref<2x10xf32, #tpu.memory_space<vmem>>) attributes {dimension_semantics = [], scalar_prefetch = 0 : i64, scratch_operands = 0 : i64, tpu.core_type = #tpu.core_type<tc>} {
    %c0 = arith.constant 0 : index
    %c0_0 = arith.constant 0 : index
    %0 = vector.load %arg0[%c0, %c0_0] : memref<448x10xf32, #tpu.memory_space<vmem>>, vector<448x10xf32>
    %c0_1 = arith.constant 0 : index
    %c0_2 = arith.constant 0 : index
    %1 = vector.load %arg1[%c0_1, %c0_2] : memref<10x16xf32, #tpu.memory_space<vmem>>, vector<10x16xf32>
    %cst = arith.constant dense<0.000000e+00> : vector<448x16xf32>
    %2 = tpu.matmul %0, %1, %cst {dimension_numbers = #tpu.dot_dimension_numbers<[1], [0], [0], [1], [0, 0, 1, 1], [], []>} : vector<448x10xf32>, vector<10x16xf32>, vector<448x16xf32> -> vector<448x16xf32>
    %cst_3 = arith.constant 0.000000e+00 : f32
    %3 = vector.broadcast %cst_3 : f32 to vector<448x16xf32>
    %4 = arith.maximumf %2, %3 : vector<448x16xf32>
    %5 = arith.truncf %4 : vector<448x16xf32> to vector<448x16xbf16>
    %c0_4 = arith.constant 0 : index
    %c0_5 = arith.constant 0 : index
    %6 = vector.load %arg2[%c0_4, %c0_5] : memref<504x224xbf16, #tpu.memory_space<vmem>>, vector<504x224xbf16>
    %c0_6 = arith.constant 0 : index
    %c0_7 = arith.constant 0 : index
    %7 = vector.load %arg5[%c0_6, %c0_7] : memref<32x256xf32, #tpu.memory_space<vmem>>, vector<32x256xf32>
    %c0_8 = arith.constant 0 : index
    %c0_9 = arith.constant 0 : index
    %8 = vector.load %arg6[%c0_8, %c0_9] : memref<56x256xf32, #tpu.memory_space<vmem>>, vector<56x256xf32>
    %9 = vector.extract_strided_slice %5 {offsets = [0, 0], sizes = [224, 16], strides = [1, 1]} : vector<448x16xbf16> to vector<224x16xbf16>
    %cst_10 = arith.constant dense<0.000000e+00> : vector<504x16xf32>
    %10 = tpu.matmul %6, %9, %cst_10 {dimension_numbers = #tpu.dot_dimension_numbers<[1], [0], [0], [1], [0, 0, 1, 1], [], []>} : vector<504x224xbf16>, vector<224x16xbf16>, vector<504x16xf32> -> vector<504x16xf32>
    %cst_11 = arith.constant 0.000000e+00 : f32
    %11 = vector.broadcast %cst_11 : f32 to vector<56x32xf32>
    %12 = vector.extract_strided_slice %10 {offsets = [0, 0], sizes = [56, 16], strides = [1, 1]} : vector<504x16xf32> to vector<56x16xf32>
    %c0_12 = arith.constant 0 : index
    %c0_13 = arith.constant 0 : index
    %c0_14 = arith.constant 0 : index
    %13 = vector.load %arg3[%c0_12, %c0_13, %c0_14] : memref<9x16x32xf32, #tpu.memory_space<vmem>>, vector<1x16x32xf32>
    %14 = vector.shape_cast %13 : vector<1x16x32xf32> to vector<16x32xf32>
    %cst_15 = arith.constant dense<0.000000e+00> : vector<56x32xf32>
    %15 = tpu.matmul %12, %14, %cst_15 {dimension_numbers = #tpu.dot_dimension_numbers<[1], [0], [0], [1], [0, 0, 1, 1], [], []>} : vector<56x16xf32>, vector<16x32xf32>, vector<56x32xf32> -> vector<56x32xf32>
    %16 = arith.addf %11, %15 : vector<56x32xf32>
    %17 = vector.extract_strided_slice %10 {offsets = [56, 0], sizes = [56, 16], strides = [1, 1]} : vector<504x16xf32> to vector<56x16xf32>
    %c1 = arith.constant 1 : index
    %c0_16 = arith.constant 0 : index
    %c0_17 = arith.constant 0 : index
    %18 = vector.load %arg3[%c1, %c0_16, %c0_17] : memref<9x16x32xf32, #tpu.memory_space<vmem>>, vector<1x16x32xf32>
    %19 = vector.shape_cast %18 : vector<1x16x32xf32> to vector<16x32xf32>
    %cst_18 = arith.constant dense<0.000000e+00> : vector<56x32xf32>
    %20 = tpu.matmul %17, %19, %cst_18 {dimension_numbers = #tpu.dot_dimension_numbers<[1], [0], [0], [1], [0, 0, 1, 1], [], []>} : vector<56x16xf32>, vector<16x32xf32>, vector<56x32xf32> -> vector<56x32xf32>
    %21 = arith.addf %16, %20 : vector<56x32xf32>
    %22 = vector.extract_strided_slice %10 {offsets = [112, 0], sizes = [56, 16], strides = [1, 1]} : vector<504x16xf32> to vector<56x16xf32>
    %c2 = arith.constant 2 : index
    %c0_19 = arith.constant 0 : index
    %c0_20 = arith.constant 0 : index
    %23 = vector.load %arg3[%c2, %c0_19, %c0_20] : memref<9x16x32xf32, #tpu.memory_space<vmem>>, vector<1x16x32xf32>
    %24 = vector.shape_cast %23 : vector<1x16x32xf32> to vector<16x32xf32>
    %cst_21 = arith.constant dense<0.000000e+00> : vector<56x32xf32>
    %25 = tpu.matmul %22, %24, %cst_21 {dimension_numbers = #tpu.dot_dimension_numbers<[1], [0], [0], [1], [0, 0, 1, 1], [], []>} : vector<56x16xf32>, vector<16x32xf32>, vector<56x32xf32> -> vector<56x32xf32>
    %26 = arith.addf %21, %25 : vector<56x32xf32>
    %27 = vector.extract_strided_slice %10 {offsets = [168, 0], sizes = [56, 16], strides = [1, 1]} : vector<504x16xf32> to vector<56x16xf32>
    %c3 = arith.constant 3 : index
    %c0_22 = arith.constant 0 : index
    %c0_23 = arith.constant 0 : index
    %28 = vector.load %arg3[%c3, %c0_22, %c0_23] : memref<9x16x32xf32, #tpu.memory_space<vmem>>, vector<1x16x32xf32>
    %29 = vector.shape_cast %28 : vector<1x16x32xf32> to vector<16x32xf32>
    %cst_24 = arith.constant dense<0.000000e+00> : vector<56x32xf32>
    %30 = tpu.matmul %27, %29, %cst_24 {dimension_numbers = #tpu.dot_dimension_numbers<[1], [0], [0], [1], [0, 0, 1, 1], [], []>} : vector<56x16xf32>, vector<16x32xf32>, vector<56x32xf32> -> vector<56x32xf32>
    %31 = arith.addf %26, %30 : vector<56x32xf32>
    %32 = vector.extract_strided_slice %10 {offsets = [224, 0], sizes = [56, 16], strides = [1, 1]} : vector<504x16xf32> to vector<56x16xf32>
    %c4 = arith.constant 4 : index
    %c0_25 = arith.constant 0 : index
    %c0_26 = arith.constant 0 : index
    %33 = vector.load %arg3[%c4, %c0_25, %c0_26] : memref<9x16x32xf32, #tpu.memory_space<vmem>>, vector<1x16x32xf32>
    %34 = vector.shape_cast %33 : vector<1x16x32xf32> to vector<16x32xf32>
    %cst_27 = arith.constant dense<0.000000e+00> : vector<56x32xf32>
    %35 = tpu.matmul %32, %34, %cst_27 {dimension_numbers = #tpu.dot_dimension_numbers<[1], [0], [0], [1], [0, 0, 1, 1], [], []>} : vector<56x16xf32>, vector<16x32xf32>, vector<56x32xf32> -> vector<56x32xf32>
    %36 = arith.addf %31, %35 : vector<56x32xf32>
    %37 = vector.extract_strided_slice %10 {offsets = [280, 0], sizes = [56, 16], strides = [1, 1]} : vector<504x16xf32> to vector<56x16xf32>
    %c5 = arith.constant 5 : index
    %c0_28 = arith.constant 0 : index
    %c0_29 = arith.constant 0 : index
    %38 = vector.load %arg3[%c5, %c0_28, %c0_29] : memref<9x16x32xf32, #tpu.memory_space<vmem>>, vector<1x16x32xf32>
    %39 = vector.shape_cast %38 : vector<1x16x32xf32> to vector<16x32xf32>
    %cst_30 = arith.constant dense<0.000000e+00> : vector<56x32xf32>
    %40 = tpu.matmul %37, %39, %cst_30 {dimension_numbers = #tpu.dot_dimension_numbers<[1], [0], [0], [1], [0, 0, 1, 1], [], []>} : vector<56x16xf32>, vector<16x32xf32>, vector<56x32xf32> -> vector<56x32xf32>
    %41 = arith.addf %36, %40 : vector<56x32xf32>
    %42 = vector.extract_strided_slice %10 {offsets = [336, 0], sizes = [56, 16], strides = [1, 1]} : vector<504x16xf32> to vector<56x16xf32>
    %c6 = arith.constant 6 : index
    %c0_31 = arith.constant 0 : index
    %c0_32 = arith.constant 0 : index
    %43 = vector.load %arg3[%c6, %c0_31, %c0_32] : memref<9x16x32xf32, #tpu.memory_space<vmem>>, vector<1x16x32xf32>
    %44 = vector.shape_cast %43 : vector<1x16x32xf32> to vector<16x32xf32>
    %cst_33 = arith.constant dense<0.000000e+00> : vector<56x32xf32>
    %45 = tpu.matmul %42, %44, %cst_33 {dimension_numbers = #tpu.dot_dimension_numbers<[1], [0], [0], [1], [0, 0, 1, 1], [], []>} : vector<56x16xf32>, vector<16x32xf32>, vector<56x32xf32> -> vector<56x32xf32>
    %46 = arith.addf %41, %45 : vector<56x32xf32>
    %47 = vector.extract_strided_slice %10 {offsets = [392, 0], sizes = [56, 16], strides = [1, 1]} : vector<504x16xf32> to vector<56x16xf32>
    %c7 = arith.constant 7 : index
    %c0_34 = arith.constant 0 : index
    %c0_35 = arith.constant 0 : index
    %48 = vector.load %arg3[%c7, %c0_34, %c0_35] : memref<9x16x32xf32, #tpu.memory_space<vmem>>, vector<1x16x32xf32>
    %49 = vector.shape_cast %48 : vector<1x16x32xf32> to vector<16x32xf32>
    %cst_36 = arith.constant dense<0.000000e+00> : vector<56x32xf32>
    %50 = tpu.matmul %47, %49, %cst_36 {dimension_numbers = #tpu.dot_dimension_numbers<[1], [0], [0], [1], [0, 0, 1, 1], [], []>} : vector<56x16xf32>, vector<16x32xf32>, vector<56x32xf32> -> vector<56x32xf32>
    %51 = arith.addf %46, %50 : vector<56x32xf32>
    %52 = vector.extract_strided_slice %10 {offsets = [448, 0], sizes = [56, 16], strides = [1, 1]} : vector<504x16xf32> to vector<56x16xf32>
    %c8 = arith.constant 8 : index
    %c0_37 = arith.constant 0 : index
    %c0_38 = arith.constant 0 : index
    %53 = vector.load %arg3[%c8, %c0_37, %c0_38] : memref<9x16x32xf32, #tpu.memory_space<vmem>>, vector<1x16x32xf32>
    %54 = vector.shape_cast %53 : vector<1x16x32xf32> to vector<16x32xf32>
    %cst_39 = arith.constant dense<0.000000e+00> : vector<56x32xf32>
    %55 = tpu.matmul %52, %54, %cst_39 {dimension_numbers = #tpu.dot_dimension_numbers<[1], [0], [0], [1], [0, 0, 1, 1], [], []>} : vector<56x16xf32>, vector<16x32xf32>, vector<56x32xf32> -> vector<56x32xf32>
    %56 = arith.addf %51, %55 : vector<56x32xf32>
    %c0_40 = arith.constant 0 : index
    %c0_41 = arith.constant 0 : index
    %57 = vector.load %arg4[%c0_40, %c0_41] : memref<1x32xf32, #tpu.memory_space<vmem>>, vector<1x32xf32>
    %58 = vector.broadcast %57 : vector<1x32xf32> to vector<56x32xf32>
    %59 = arith.addf %56, %58 : vector<56x32xf32>
    %cst_42 = arith.constant 0.000000e+00 : f32
    %60 = vector.broadcast %cst_42 : f32 to vector<56x32xf32>
    %61 = arith.maximumf %59, %60 : vector<56x32xf32>
    %cst_43 = arith.constant dense<0.000000e+00> : vector<56x256xf32>
    %62 = tpu.matmul %61, %7, %cst_43 {dimension_numbers = #tpu.dot_dimension_numbers<[1], [0], [0], [1], [0, 0, 1, 1], [], []>} : vector<56x32xf32>, vector<32x256xf32>, vector<56x256xf32> -> vector<56x256xf32>
    %63 = arith.mulf %62, %8 : vector<56x256xf32>
    %cst_44 = arith.constant dense<0.000000e+00> : vector<256xf32>
    %64 = vector.multi_reduction <add>, %63, %cst_44 [0] : vector<56x256xf32> to vector<256xf32>
    %65 = vector.shape_cast %64 : vector<256xf32> to vector<1x256xf32>
    %66 = vector.extract_strided_slice %5 {offsets = [224, 0], sizes = [224, 16], strides = [1, 1]} : vector<448x16xbf16> to vector<224x16xbf16>
    %cst_45 = arith.constant dense<0.000000e+00> : vector<504x16xf32>
    %67 = tpu.matmul %6, %66, %cst_45 {dimension_numbers = #tpu.dot_dimension_numbers<[1], [0], [0], [1], [0, 0, 1, 1], [], []>} : vector<504x224xbf16>, vector<224x16xbf16>, vector<504x16xf32> -> vector<504x16xf32>
    %cst_46 = arith.constant 0.000000e+00 : f32
    %68 = vector.broadcast %cst_46 : f32 to vector<56x32xf32>
    %69 = vector.extract_strided_slice %67 {offsets = [0, 0], sizes = [56, 16], strides = [1, 1]} : vector<504x16xf32> to vector<56x16xf32>
    %c0_47 = arith.constant 0 : index
    %c0_48 = arith.constant 0 : index
    %c0_49 = arith.constant 0 : index
    %70 = vector.load %arg3[%c0_47, %c0_48, %c0_49] : memref<9x16x32xf32, #tpu.memory_space<vmem>>, vector<1x16x32xf32>
    %71 = vector.shape_cast %70 : vector<1x16x32xf32> to vector<16x32xf32>
    %cst_50 = arith.constant dense<0.000000e+00> : vector<56x32xf32>
    %72 = tpu.matmul %69, %71, %cst_50 {dimension_numbers = #tpu.dot_dimension_numbers<[1], [0], [0], [1], [0, 0, 1, 1], [], []>} : vector<56x16xf32>, vector<16x32xf32>, vector<56x32xf32> -> vector<56x32xf32>
    %73 = arith.addf %68, %72 : vector<56x32xf32>
    %74 = vector.extract_strided_slice %67 {offsets = [56, 0], sizes = [56, 16], strides = [1, 1]} : vector<504x16xf32> to vector<56x16xf32>
    %c1_51 = arith.constant 1 : index
    %c0_52 = arith.constant 0 : index
    %c0_53 = arith.constant 0 : index
    %75 = vector.load %arg3[%c1_51, %c0_52, %c0_53] : memref<9x16x32xf32, #tpu.memory_space<vmem>>, vector<1x16x32xf32>
    %76 = vector.shape_cast %75 : vector<1x16x32xf32> to vector<16x32xf32>
    %cst_54 = arith.constant dense<0.000000e+00> : vector<56x32xf32>
    %77 = tpu.matmul %74, %76, %cst_54 {dimension_numbers = #tpu.dot_dimension_numbers<[1], [0], [0], [1], [0, 0, 1, 1], [], []>} : vector<56x16xf32>, vector<16x32xf32>, vector<56x32xf32> -> vector<56x32xf32>
    %78 = arith.addf %73, %77 : vector<56x32xf32>
    %79 = vector.extract_strided_slice %67 {offsets = [112, 0], sizes = [56, 16], strides = [1, 1]} : vector<504x16xf32> to vector<56x16xf32>
    %c2_55 = arith.constant 2 : index
    %c0_56 = arith.constant 0 : index
    %c0_57 = arith.constant 0 : index
    %80 = vector.load %arg3[%c2_55, %c0_56, %c0_57] : memref<9x16x32xf32, #tpu.memory_space<vmem>>, vector<1x16x32xf32>
    %81 = vector.shape_cast %80 : vector<1x16x32xf32> to vector<16x32xf32>
    %cst_58 = arith.constant dense<0.000000e+00> : vector<56x32xf32>
    %82 = tpu.matmul %79, %81, %cst_58 {dimension_numbers = #tpu.dot_dimension_numbers<[1], [0], [0], [1], [0, 0, 1, 1], [], []>} : vector<56x16xf32>, vector<16x32xf32>, vector<56x32xf32> -> vector<56x32xf32>
    %83 = arith.addf %78, %82 : vector<56x32xf32>
    %84 = vector.extract_strided_slice %67 {offsets = [168, 0], sizes = [56, 16], strides = [1, 1]} : vector<504x16xf32> to vector<56x16xf32>
    %c3_59 = arith.constant 3 : index
    %c0_60 = arith.constant 0 : index
    %c0_61 = arith.constant 0 : index
    %85 = vector.load %arg3[%c3_59, %c0_60, %c0_61] : memref<9x16x32xf32, #tpu.memory_space<vmem>>, vector<1x16x32xf32>
    %86 = vector.shape_cast %85 : vector<1x16x32xf32> to vector<16x32xf32>
    %cst_62 = arith.constant dense<0.000000e+00> : vector<56x32xf32>
    %87 = tpu.matmul %84, %86, %cst_62 {dimension_numbers = #tpu.dot_dimension_numbers<[1], [0], [0], [1], [0, 0, 1, 1], [], []>} : vector<56x16xf32>, vector<16x32xf32>, vector<56x32xf32> -> vector<56x32xf32>
    %88 = arith.addf %83, %87 : vector<56x32xf32>
    %89 = vector.extract_strided_slice %67 {offsets = [224, 0], sizes = [56, 16], strides = [1, 1]} : vector<504x16xf32> to vector<56x16xf32>
    %c4_63 = arith.constant 4 : index
    %c0_64 = arith.constant 0 : index
    %c0_65 = arith.constant 0 : index
    %90 = vector.load %arg3[%c4_63, %c0_64, %c0_65] : memref<9x16x32xf32, #tpu.memory_space<vmem>>, vector<1x16x32xf32>
    %91 = vector.shape_cast %90 : vector<1x16x32xf32> to vector<16x32xf32>
    %cst_66 = arith.constant dense<0.000000e+00> : vector<56x32xf32>
    %92 = tpu.matmul %89, %91, %cst_66 {dimension_numbers = #tpu.dot_dimension_numbers<[1], [0], [0], [1], [0, 0, 1, 1], [], []>} : vector<56x16xf32>, vector<16x32xf32>, vector<56x32xf32> -> vector<56x32xf32>
    %93 = arith.addf %88, %92 : vector<56x32xf32>
    %94 = vector.extract_strided_slice %67 {offsets = [280, 0], sizes = [56, 16], strides = [1, 1]} : vector<504x16xf32> to vector<56x16xf32>
    %c5_67 = arith.constant 5 : index
    %c0_68 = arith.constant 0 : index
    %c0_69 = arith.constant 0 : index
    %95 = vector.load %arg3[%c5_67, %c0_68, %c0_69] : memref<9x16x32xf32, #tpu.memory_space<vmem>>, vector<1x16x32xf32>
    %96 = vector.shape_cast %95 : vector<1x16x32xf32> to vector<16x32xf32>
    %cst_70 = arith.constant dense<0.000000e+00> : vector<56x32xf32>
    %97 = tpu.matmul %94, %96, %cst_70 {dimension_numbers = #tpu.dot_dimension_numbers<[1], [0], [0], [1], [0, 0, 1, 1], [], []>} : vector<56x16xf32>, vector<16x32xf32>, vector<56x32xf32> -> vector<56x32xf32>
    %98 = arith.addf %93, %97 : vector<56x32xf32>
    %99 = vector.extract_strided_slice %67 {offsets = [336, 0], sizes = [56, 16], strides = [1, 1]} : vector<504x16xf32> to vector<56x16xf32>
    %c6_71 = arith.constant 6 : index
    %c0_72 = arith.constant 0 : index
    %c0_73 = arith.constant 0 : index
    %100 = vector.load %arg3[%c6_71, %c0_72, %c0_73] : memref<9x16x32xf32, #tpu.memory_space<vmem>>, vector<1x16x32xf32>
    %101 = vector.shape_cast %100 : vector<1x16x32xf32> to vector<16x32xf32>
    %cst_74 = arith.constant dense<0.000000e+00> : vector<56x32xf32>
    %102 = tpu.matmul %99, %101, %cst_74 {dimension_numbers = #tpu.dot_dimension_numbers<[1], [0], [0], [1], [0, 0, 1, 1], [], []>} : vector<56x16xf32>, vector<16x32xf32>, vector<56x32xf32> -> vector<56x32xf32>
    %103 = arith.addf %98, %102 : vector<56x32xf32>
    %104 = vector.extract_strided_slice %67 {offsets = [392, 0], sizes = [56, 16], strides = [1, 1]} : vector<504x16xf32> to vector<56x16xf32>
    %c7_75 = arith.constant 7 : index
    %c0_76 = arith.constant 0 : index
    %c0_77 = arith.constant 0 : index
    %105 = vector.load %arg3[%c7_75, %c0_76, %c0_77] : memref<9x16x32xf32, #tpu.memory_space<vmem>>, vector<1x16x32xf32>
    %106 = vector.shape_cast %105 : vector<1x16x32xf32> to vector<16x32xf32>
    %cst_78 = arith.constant dense<0.000000e+00> : vector<56x32xf32>
    %107 = tpu.matmul %104, %106, %cst_78 {dimension_numbers = #tpu.dot_dimension_numbers<[1], [0], [0], [1], [0, 0, 1, 1], [], []>} : vector<56x16xf32>, vector<16x32xf32>, vector<56x32xf32> -> vector<56x32xf32>
    %108 = arith.addf %103, %107 : vector<56x32xf32>
    %109 = vector.extract_strided_slice %67 {offsets = [448, 0], sizes = [56, 16], strides = [1, 1]} : vector<504x16xf32> to vector<56x16xf32>
    %c8_79 = arith.constant 8 : index
    %c0_80 = arith.constant 0 : index
    %c0_81 = arith.constant 0 : index
    %110 = vector.load %arg3[%c8_79, %c0_80, %c0_81] : memref<9x16x32xf32, #tpu.memory_space<vmem>>, vector<1x16x32xf32>
    %111 = vector.shape_cast %110 : vector<1x16x32xf32> to vector<16x32xf32>
    %cst_82 = arith.constant dense<0.000000e+00> : vector<56x32xf32>
    %112 = tpu.matmul %109, %111, %cst_82 {dimension_numbers = #tpu.dot_dimension_numbers<[1], [0], [0], [1], [0, 0, 1, 1], [], []>} : vector<56x16xf32>, vector<16x32xf32>, vector<56x32xf32> -> vector<56x32xf32>
    %113 = arith.addf %108, %112 : vector<56x32xf32>
    %c0_83 = arith.constant 0 : index
    %c0_84 = arith.constant 0 : index
    %114 = vector.load %arg4[%c0_83, %c0_84] : memref<1x32xf32, #tpu.memory_space<vmem>>, vector<1x32xf32>
    %115 = vector.broadcast %114 : vector<1x32xf32> to vector<56x32xf32>
    %116 = arith.addf %113, %115 : vector<56x32xf32>
    %cst_85 = arith.constant 0.000000e+00 : f32
    %117 = vector.broadcast %cst_85 : f32 to vector<56x32xf32>
    %118 = arith.maximumf %116, %117 : vector<56x32xf32>
    %cst_86 = arith.constant dense<0.000000e+00> : vector<56x256xf32>
    %119 = tpu.matmul %118, %7, %cst_86 {dimension_numbers = #tpu.dot_dimension_numbers<[1], [0], [0], [1], [0, 0, 1, 1], [], []>} : vector<56x32xf32>, vector<32x256xf32>, vector<56x256xf32> -> vector<56x256xf32>
    %120 = arith.mulf %119, %8 : vector<56x256xf32>
    %cst_87 = arith.constant dense<0.000000e+00> : vector<256xf32>
    %121 = vector.multi_reduction <add>, %120, %cst_87 [0] : vector<56x256xf32> to vector<256xf32>
    %122 = vector.shape_cast %121 : vector<256xf32> to vector<1x256xf32>
    %123 = tpu.concatenate %65, %122 in 0 : vector<1x256xf32>, vector<1x256xf32> -> vector<2x256xf32>
    %c0_88 = arith.constant 0 : index
    %c0_89 = arith.constant 0 : index
    %124 = vector.load %arg7[%c0_88, %c0_89] : memref<256x8xf32, #tpu.memory_space<vmem>>, vector<256x8xf32>
    %cst_90 = arith.constant dense<0.000000e+00> : vector<2x8xf32>
    %125 = tpu.matmul %123, %124, %cst_90 {dimension_numbers = #tpu.dot_dimension_numbers<[1], [0], [0], [1], [0, 0, 1, 1], [], []>} : vector<2x256xf32>, vector<256x8xf32>, vector<2x8xf32> -> vector<2x8xf32>
    %c0_91 = arith.constant 0 : index
    %c0_92 = arith.constant 0 : index
    %126 = vector.load %arg8[%c0_91, %c0_92] : memref<1x8xf32, #tpu.memory_space<vmem>>, vector<1x8xf32>
    %127 = vector.broadcast %126 : vector<1x8xf32> to vector<2x8xf32>
    %128 = arith.addf %125, %127 : vector<2x8xf32>
    %c0_93 = arith.constant 0 : index
    %c0_94 = arith.constant 0 : index
    %c0_95 = arith.constant 0 : index
    %129 = vector.load %arg9[%c0_93, %c0_94, %c0_95] : memref<4x8x8xf32, #tpu.memory_space<vmem>>, vector<1x8x8xf32>
    %130 = vector.shape_cast %129 : vector<1x8x8xf32> to vector<8x8xf32>
    %cst_96 = arith.constant dense<0.000000e+00> : vector<2x8xf32>
    %131 = tpu.matmul %128, %130, %cst_96 {dimension_numbers = #tpu.dot_dimension_numbers<[1], [0], [0], [1], [0, 0, 1, 1], [], []>} : vector<2x8xf32>, vector<8x8xf32>, vector<2x8xf32> -> vector<2x8xf32>
    %c0_97 = arith.constant 0 : index
    %c0_98 = arith.constant 0 : index
    %c0_99 = arith.constant 0 : index
    %132 = vector.load %arg10[%c0_97, %c0_98, %c0_99] : memref<4x1x8xf32, #tpu.memory_space<vmem>>, vector<1x1x8xf32>
    %133 = vector.shape_cast %132 : vector<1x1x8xf32> to vector<1x8xf32>
    %134 = vector.broadcast %133 : vector<1x8xf32> to vector<2x8xf32>
    %135 = arith.addf %131, %134 : vector<2x8xf32>
    %136 = math.tanh %135 : vector<2x8xf32>
    %c0_100 = arith.constant 0 : index
    %c0_101 = arith.constant 0 : index
    %c0_102 = arith.constant 0 : index
    %137 = vector.load %arg11[%c0_100, %c0_101, %c0_102] : memref<4x8x8xf32, #tpu.memory_space<vmem>>, vector<1x8x8xf32>
    %138 = vector.shape_cast %137 : vector<1x8x8xf32> to vector<8x8xf32>
    %cst_103 = arith.constant dense<0.000000e+00> : vector<2x8xf32>
    %139 = tpu.matmul %136, %138, %cst_103 {dimension_numbers = #tpu.dot_dimension_numbers<[1], [0], [0], [1], [0, 0, 1, 1], [], []>} : vector<2x8xf32>, vector<8x8xf32>, vector<2x8xf32> -> vector<2x8xf32>
    %cst_104 = arith.constant 5.000000e-01 : f32
    %140 = vector.broadcast %cst_104 : f32 to vector<2x8xf32>
    %141 = arith.mulf %140, %139 : vector<2x8xf32>
    %142 = arith.addf %128, %141 : vector<2x8xf32>
    %c1_105 = arith.constant 1 : index
    %c0_106 = arith.constant 0 : index
    %c0_107 = arith.constant 0 : index
    %143 = vector.load %arg9[%c1_105, %c0_106, %c0_107] : memref<4x8x8xf32, #tpu.memory_space<vmem>>, vector<1x8x8xf32>
    %144 = vector.shape_cast %143 : vector<1x8x8xf32> to vector<8x8xf32>
    %cst_108 = arith.constant dense<0.000000e+00> : vector<2x8xf32>
    %145 = tpu.matmul %142, %144, %cst_108 {dimension_numbers = #tpu.dot_dimension_numbers<[1], [0], [0], [1], [0, 0, 1, 1], [], []>} : vector<2x8xf32>, vector<8x8xf32>, vector<2x8xf32> -> vector<2x8xf32>
    %c1_109 = arith.constant 1 : index
    %c0_110 = arith.constant 0 : index
    %c0_111 = arith.constant 0 : index
    %146 = vector.load %arg10[%c1_109, %c0_110, %c0_111] : memref<4x1x8xf32, #tpu.memory_space<vmem>>, vector<1x1x8xf32>
    %147 = vector.shape_cast %146 : vector<1x1x8xf32> to vector<1x8xf32>
    %148 = vector.broadcast %147 : vector<1x8xf32> to vector<2x8xf32>
    %149 = arith.addf %145, %148 : vector<2x8xf32>
    %150 = math.tanh %149 : vector<2x8xf32>
    %c1_112 = arith.constant 1 : index
    %c0_113 = arith.constant 0 : index
    %c0_114 = arith.constant 0 : index
    %151 = vector.load %arg11[%c1_112, %c0_113, %c0_114] : memref<4x8x8xf32, #tpu.memory_space<vmem>>, vector<1x8x8xf32>
    %152 = vector.shape_cast %151 : vector<1x8x8xf32> to vector<8x8xf32>
    %cst_115 = arith.constant dense<0.000000e+00> : vector<2x8xf32>
    %153 = tpu.matmul %150, %152, %cst_115 {dimension_numbers = #tpu.dot_dimension_numbers<[1], [0], [0], [1], [0, 0, 1, 1], [], []>} : vector<2x8xf32>, vector<8x8xf32>, vector<2x8xf32> -> vector<2x8xf32>
    %cst_116 = arith.constant 5.000000e-01 : f32
    %154 = vector.broadcast %cst_116 : f32 to vector<2x8xf32>
    %155 = arith.mulf %154, %153 : vector<2x8xf32>
    %156 = arith.addf %142, %155 : vector<2x8xf32>
    %c2_117 = arith.constant 2 : index
    %c0_118 = arith.constant 0 : index
    %c0_119 = arith.constant 0 : index
    %157 = vector.load %arg9[%c2_117, %c0_118, %c0_119] : memref<4x8x8xf32, #tpu.memory_space<vmem>>, vector<1x8x8xf32>
    %158 = vector.shape_cast %157 : vector<1x8x8xf32> to vector<8x8xf32>
    %cst_120 = arith.constant dense<0.000000e+00> : vector<2x8xf32>
    %159 = tpu.matmul %156, %158, %cst_120 {dimension_numbers = #tpu.dot_dimension_numbers<[1], [0], [0], [1], [0, 0, 1, 1], [], []>} : vector<2x8xf32>, vector<8x8xf32>, vector<2x8xf32> -> vector<2x8xf32>
    %c2_121 = arith.constant 2 : index
    %c0_122 = arith.constant 0 : index
    %c0_123 = arith.constant 0 : index
    %160 = vector.load %arg10[%c2_121, %c0_122, %c0_123] : memref<4x1x8xf32, #tpu.memory_space<vmem>>, vector<1x1x8xf32>
    %161 = vector.shape_cast %160 : vector<1x1x8xf32> to vector<1x8xf32>
    %162 = vector.broadcast %161 : vector<1x8xf32> to vector<2x8xf32>
    %163 = arith.addf %159, %162 : vector<2x8xf32>
    %164 = math.tanh %163 : vector<2x8xf32>
    %c2_124 = arith.constant 2 : index
    %c0_125 = arith.constant 0 : index
    %c0_126 = arith.constant 0 : index
    %165 = vector.load %arg11[%c2_124, %c0_125, %c0_126] : memref<4x8x8xf32, #tpu.memory_space<vmem>>, vector<1x8x8xf32>
    %166 = vector.shape_cast %165 : vector<1x8x8xf32> to vector<8x8xf32>
    %cst_127 = arith.constant dense<0.000000e+00> : vector<2x8xf32>
    %167 = tpu.matmul %164, %166, %cst_127 {dimension_numbers = #tpu.dot_dimension_numbers<[1], [0], [0], [1], [0, 0, 1, 1], [], []>} : vector<2x8xf32>, vector<8x8xf32>, vector<2x8xf32> -> vector<2x8xf32>
    %cst_128 = arith.constant 5.000000e-01 : f32
    %168 = vector.broadcast %cst_128 : f32 to vector<2x8xf32>
    %169 = arith.mulf %168, %167 : vector<2x8xf32>
    %170 = arith.addf %156, %169 : vector<2x8xf32>
    %c3_129 = arith.constant 3 : index
    %c0_130 = arith.constant 0 : index
    %c0_131 = arith.constant 0 : index
    %171 = vector.load %arg9[%c3_129, %c0_130, %c0_131] : memref<4x8x8xf32, #tpu.memory_space<vmem>>, vector<1x8x8xf32>
    %172 = vector.shape_cast %171 : vector<1x8x8xf32> to vector<8x8xf32>
    %cst_132 = arith.constant dense<0.000000e+00> : vector<2x8xf32>
    %173 = tpu.matmul %170, %172, %cst_132 {dimension_numbers = #tpu.dot_dimension_numbers<[1], [0], [0], [1], [0, 0, 1, 1], [], []>} : vector<2x8xf32>, vector<8x8xf32>, vector<2x8xf32> -> vector<2x8xf32>
    %c3_133 = arith.constant 3 : index
    %c0_134 = arith.constant 0 : index
    %c0_135 = arith.constant 0 : index
    %174 = vector.load %arg10[%c3_133, %c0_134, %c0_135] : memref<4x1x8xf32, #tpu.memory_space<vmem>>, vector<1x1x8xf32>
    %175 = vector.shape_cast %174 : vector<1x1x8xf32> to vector<1x8xf32>
    %176 = vector.broadcast %175 : vector<1x8xf32> to vector<2x8xf32>
    %177 = arith.addf %173, %176 : vector<2x8xf32>
    %178 = math.tanh %177 : vector<2x8xf32>
    %c3_136 = arith.constant 3 : index
    %c0_137 = arith.constant 0 : index
    %c0_138 = arith.constant 0 : index
    %179 = vector.load %arg11[%c3_136, %c0_137, %c0_138] : memref<4x8x8xf32, #tpu.memory_space<vmem>>, vector<1x8x8xf32>
    %180 = vector.shape_cast %179 : vector<1x8x8xf32> to vector<8x8xf32>
    %cst_139 = arith.constant dense<0.000000e+00> : vector<2x8xf32>
    %181 = tpu.matmul %178, %180, %cst_139 {dimension_numbers = #tpu.dot_dimension_numbers<[1], [0], [0], [1], [0, 0, 1, 1], [], []>} : vector<2x8xf32>, vector<8x8xf32>, vector<2x8xf32> -> vector<2x8xf32>
    %cst_140 = arith.constant 5.000000e-01 : f32
    %182 = vector.broadcast %cst_140 : f32 to vector<2x8xf32>
    %183 = arith.mulf %182, %181 : vector<2x8xf32>
    %184 = arith.addf %170, %183 : vector<2x8xf32>
    %c0_141 = arith.constant 0 : index
    %c0_142 = arith.constant 0 : index
    %185 = vector.load %arg12[%c0_141, %c0_142] : memref<8x10xf32, #tpu.memory_space<vmem>>, vector<8x10xf32>
    %cst_143 = arith.constant dense<0.000000e+00> : vector<2x10xf32>
    %186 = tpu.matmul %184, %185, %cst_143 {dimension_numbers = #tpu.dot_dimension_numbers<[1], [0], [0], [1], [0, 0, 1, 1], [], []>} : vector<2x8xf32>, vector<8x10xf32>, vector<2x10xf32> -> vector<2x10xf32>
    %c0_144 = arith.constant 0 : index
    %c0_145 = arith.constant 0 : index
    %187 = vector.load %arg13[%c0_144, %c0_145] : memref<1x10xf32, #tpu.memory_space<vmem>>, vector<1x10xf32>
    %188 = vector.broadcast %187 : vector<1x10xf32> to vector<2x10xf32>
    %189 = arith.addf %186, %188 : vector<2x10xf32>
    %cst_146 = arith.constant dense<0xFF800000> : vector<2xf32>
    %190 = vector.multi_reduction <maximumf>, %189, %cst_146 [1] : vector<2x10xf32> to vector<2xf32>
    %191 = vector.shape_cast %190 : vector<2xf32> to vector<2x1xf32>
    %192 = vector.broadcast %191 : vector<2x1xf32> to vector<2x10xf32>
    %193 = arith.subf %189, %192 : vector<2x10xf32>
    %194 = math.exp %193 : vector<2x10xf32>
    %cst_147 = arith.constant dense<0.000000e+00> : vector<2xf32>
    %195 = vector.multi_reduction <add>, %194, %cst_147 [1] : vector<2x10xf32> to vector<2xf32>
    %196 = vector.shape_cast %195 : vector<2xf32> to vector<2x1xf32>
    %197 = math.log %196 : vector<2x1xf32>
    %198 = vector.broadcast %197 : vector<2x1xf32> to vector<2x10xf32>
    %199 = arith.subf %193, %198 : vector<2x10xf32>
    %c0_148 = arith.constant 0 : index
    %c0_149 = arith.constant 0 : index
    %200 = vector.load %arg14[%c0_148, %c0_149] : memref<2x10xf32, #tpu.memory_space<vmem>>, vector<2x10xf32>
    tpu.vector_store %arg14[%c0_148, %c0_149], %199 {strides = array<i32>} : memref<2x10xf32, #tpu.memory_space<vmem>>, vector<2x10xf32>,
    return
  }
}

</mosaic_0001>

<bundles_post_ra>
// kernel: net_global_forward.1
= control target key start
LH: loop header
LB: loop body
LE: loop exit
PB: predicated region body
PF: predicated region fallthrough
CT: control target
= control target key end

     0   :  { %vm276_vm0 = vcmask 1041408   ;;  %vm107_vm1 = vcmask 80896   ;;  %s8651_s0 = inlined_call_operand.vmem [shape: f32[448,10], index: 0, kind: input, shape index: {}]   ;;  %s8652_s1 = inlined_call_operand.vmem [shape: f32[10,16], index: 1, kind: input, shape index: {}]   ;;  %s8653_s2 = inlined_call_operand.vmem [shape: bf16[504,224], index: 2, kind: input, shape index: {}]   ;;  %s8654_s3 = inlined_call_operand.vmem [shape: f32[9,16,32], index: 3, kind: input, shape index: {}]   ;;  %s8655_s4 = inlined_call_operand.vmem [shape: f32[1,32], index: 4, kind: input, shape index: {}]   ;;  %s8656_s5 = inlined_call_operand.vmem [shape: f32[32,256], index: 5, kind: input, shape index: {}]   ;;  %s8657_s6 = inlined_call_operand.vmem [shape: f32[56,256], index: 6, kind: input, shape index: {}]   ;;  %s8658_s7 = inlined_call_operand.vmem [shape: f32[256,8], index: 7, kind: input, shape index: {}]   ;;  %s8659_s8 = inlined_call_operand.vmem [shape: f32[1,8], index: 8, kind: input, shape index: {}]   ;;  %s8660_s9 = inlined_call_operand.vmem [shape: f32[4,8,8], index: 9, kind: input, shape index: {}]   ;;  %s8661_s10 = inlined_call_operand.vmem [shape: f32[4,1,8], index: 10, kind: input, shape index: {}]   ;;  %s8662_s11 = inlined_call_operand.vmem [shape: f32[4,8,8], index: 11, kind: input, shape index: {}]   ;;  %s8663_s12 = inlined_call_operand.vmem [shape: f32[8,10], index: 12, kind: input, shape index: {}]   ;;  %s8664_s13 = inlined_call_operand.vmem [shape: f32[1,10], index: 13, kind: input, shape index: {}]   ;;  %s8665_s14 = inlined_call_operand.hbm [shape: f32[2,10], index: 14, kind: output, shape index: {}]  }
   0x1   :  { %v106_v0 = vld [vmem:[%s8652_s1 + $0x8] sm:$0x3]  ;;  %v105_v1 = vld [vmem:[%s8652_s1] sm:$0xff]  ;;  %v51_v4 = vld [vmem:[%s8651_s0 + $0x10] sm:$0xff] }
   0x2   :  { %v49_v2 = vld [vmem:[%s8651_s0] sm:$0xff]  ;;  %5925 = vmatprep.subr.msk.mxu0 %vm276_vm0, %v106_v0  ;;  %v50_v3 = vld [vmem:[%s8651_s0 + $0x8] sm:$0xff]  ;;  %v52_v5 = vld [vmem:[%s8651_s0 + $0x18] sm:$0xff] }
   0x3   :  { %5929 = vmatprep.mubr.msk.f32.mxu0 %vm107_vm1, %v49_v2  ;;  %5926 = vmatpush3.msk.msra.mxu0 %vm276_vm0, %v106_v0  ;;  %v53_v6 = vld [vmem:[%s8651_s0 + $0x20] sm:$0xff]  ;;  %v54_v7 = vld [vmem:[%s8651_s0 + $0x28] sm:$0xff]  ;;  %v55_v8 = vld [vmem:[%s8651_s0 + $0x30] sm:$0xff] }
   0x4   :  { %5927 = vmatprep.subr.mxu0 %v105_v1  ;;  %v56_v9 = vld [vmem:[%s8651_s0 + $0x38] sm:$0xff]  ;;  %v57_v10 = vld [vmem:[%s8651_s0 + $0x40] sm:$0xff]  ;;  %v58_v11 = vld [vmem:[%s8651_s0 + $0x48] sm:$0xff] }
   0x5   :  { %5928 = vmatpush3.msra.mxu0 %v105_v1  ;;  %v59_v12 = vld [vmem:[%s8651_s0 + $0x50] sm:$0xff]  ;;  %v60_v13 = vld [vmem:[%s8651_s0 + $0x58] sm:$0xff]  ;;  %v61_v14 = vld [vmem:[%s8651_s0 + $0x60] sm:$0xff] }
   0x6   :  { %5930 = vmatmul.mubr.msk.f32.vlgmr.msra.gmra.mxu0 %vm107_vm1, %v50_v3  ;;  %v62_v15 = vld [vmem:[%s8651_s0 + $0x68] sm:$0xff]  ;;  %v63_v16 = vld [vmem:[%s8651_s0 + $0x70] sm:$0xff]  ;;  %v64_v17 = vld [vmem:[%s8651_s0 + $0x78] sm:$0xff] }
   0x7   :  { %5932 = vmatprep.mubr.msk.f32.mxu0 %vm107_vm1, %v51_v4 }
   0xa   :  { %5933 = vmatmul.mubr.msk.f32.gmra.mxu0 %vm107_vm1, %v52_v5 }
   0xb   :  { %5935 = vmatprep.mubr.msk.f32.mxu0 %vm107_vm1, %v53_v6 }
   0xe   :  { %5936 = vmatmul.mubr.msk.f32.gmra.mxu0 %vm107_vm1, %v54_v7 }
   0xf   :  { %5938 = vmatprep.mubr.msk.f32.mxu0 %vm107_vm1, %v55_v8 }
  0x12   :  { %5939 = vmatmul.mubr.msk.f32.gmra.mxu0 %vm107_vm1, %v56_v9 }
  0x13   :  { %5941 = vmatprep.mubr.msk.f32.mxu0 %vm107_vm1, %v57_v10 }
  0x16   :  { %5942 = vmatmul.mubr.msk.f32.gmra.mxu0 %vm107_vm1, %v58_v11 }
  0x17   :  { %5944 = vmatprep.mubr.msk.f32.mxu0 %vm107_vm1, %v59_v12 }
  0x1a   :  { %5945 = vmatmul.mubr.msk.f32.gmra.mxu0 %vm107_vm1, %v60_v13 }
  0x1b   :  { %5947 = vmatprep.mubr.msk.f32.mxu0 %vm107_vm1, %v61_v14 }
  0x1e   :  { %5948 = vmatmul.mubr.msk.f32.gmra.mxu0 %vm107_vm1, %v62_v15 }
  0x1f   :  { %5950 = vmatprep.mubr.msk.f32.mxu0 %vm107_vm1, %v63_v16 }
  0x20   :  { %19 = vsyncpa [#allocation3], 0  ;;  %v65_v18 = vld [vmem:[%s8651_s0 + $0x80] sm:$0xff]  ;;  %v66_v19 = vld [vmem:[%s8651_s0 + $0x88] sm:$0xff]  ;;  %v6730_v30 = vmov 0   ;;  %vm1079_vm2 = vcmask 785408  }
  0x21   :  { %v67_v20 = vld [vmem:[%s8651_s0 + $0x90] sm:$0xff]  ;;  %v68_v21 = vld [vmem:[%s8651_s0 + $0x98] sm:$0xff]  ;;  %v69_v22 = vld [vmem:[%s8651_s0 + $0xa0] sm:$0xff]  ;;  %1176 = vmatprep.subr.bf16.mxu1 %v6730_v30  ;;  %vm6732_vm3 = vmmov 0   ;;  %vm1469_vm4 = vcmask 130048   ;;  %vm2650_vm5 = vcmask 261120  }
  0x22   :  { %5951 = vmatmul.mubr.msk.f32.gmra.mxu0 %vm107_vm1, %v64_v17  ;;  %v70_v23 = vld [vmem:[%s8651_s0 + $0xa8] sm:$0xff]  ;;  %v71_v24 = vld [vmem:[%s8651_s0 + $0xb0] sm:$0xff]  ;;  %v72_v25 = vld [vmem:[%s8651_s0 + $0xb8] sm:$0xff]  ;;  %vm4423_vm6 = vcmask 1040384   ;;  %vm4543_vm7 = vcmask 64512   ;;  %vm5258_vm8 = vcmask 74752  }
  0x23   :  { %5953 = vmatprep.mubr.msk.f32.mxu0 %vm107_vm1, %v65_v18  ;;  %v73_v26 = vld [vmem:[%s8651_s0 + $0xc0] sm:$0xff]  ;;  %v74_v27 = vld [vmem:[%s8651_s0 + $0xc8] sm:$0xff]  ;;  %v75_v28 = vld [vmem:[%s8651_s0 + $0xd0] sm:$0xff] }
  0x24   :  { %v76_v29 = vld [vmem:[%s8651_s0 + $0xd8] sm:$0xff]  ;;  %v6514_v31 = vld [vmem:[%s8653_s2 + $0x4] ss:$8 sps:$4 sm:$0xff]  }
  0x25   :  { %5407 = vmatprep.mubr.msk.bf16.mxu1 %vm1079_vm2, %v6514_v31 }
  0x26   :  { %5954 = vmatmul.mubr.msk.f32.gmra.mxu0 %vm107_vm1, %v66_v19 }
  0x27   :  { %5956 = vmatprep.mubr.msk.f32.mxu0 %vm107_vm1, %v67_v20 }
  0x2a   :  { %5957 = vmatmul.mubr.msk.f32.gmra.mxu0 %vm107_vm1, %v68_v21 }
  0x2b   :  { %5959 = vmatprep.mubr.msk.f32.mxu0 %vm107_vm1, %v69_v22 }
  0x2e   :  { %5960 = vmatmul.mubr.msk.f32.gmra.mxu0 %vm107_vm1, %v70_v23 }
  0x2f   :  { %5962 = vmatprep.mubr.msk.f32.mxu0 %vm107_vm1, %v71_v24 }
  0x32   :  { %5963 = vmatmul.mubr.msk.f32.gmra.mxu0 %vm107_vm1, %v72_v25 }
  0x33   :  { %5965 = vmatprep.mubr.msk.f32.mxu0 %vm107_vm1, %v73_v26 }
  0x36   :  { %5966 = vmatmul.mubr.msk.f32.gmra.mxu0 %vm107_vm1, %v74_v27 }
  0x37   :  { %5968 = vmatprep.mubr.msk.f32.mxu0 %vm107_vm1, %v75_v28 }
  0x3a   :  { %5969 = vmatmul.mubr.msk.f32.gmra.mxu0 %vm107_vm1, %v76_v29 }
  0xc6   :  { %v6932_v32 = vpop.f32.mrf.mxu0 }
  0xc7   :  { %v626_v18 = vmax.f32 %v6932_v32, 0.0 }
  0xc8   :  { %v6934_v33 = vpop.f32.mrf.mxu0 }
  0xc9   :  { %v625_v15 = vmax.f32 %v6934_v33, 0.0 }
  0xca   :  { %v5934_v34 = vpop.f32.mrf.mxu0 }
  0xcb   :  { %v628_v14 = vmax.f32 %v5934_v34, 0.0  ;;  %v681_v19 = vpack.c.bf16 %v626_v18, %v625_v15  ;;  %v6542_v15 = vld [vmem:[%s8653_s2 + $0xa4] ss:$8 sps:$4 sm:$0xff]  }
  0xcc   :  { %v356_v35 = vpop.f32.mrf.mxu0  ;;  %v97_v18 = vld [vmem:[%s8651_s0 + $0x180] sm:$0xff] }
  0xcd   :  { %v627_v11 = vmax.f32 %v356_v35, 0.0 }
  0xce   :  { %v5937_v36 = vpop.f32.mrf.mxu0 }
  0xcf   :  { %v630_v10 = vmax.f32 %v5937_v36, 0.0  ;;  %v682_v16 = vpack.c.bf16 %v628_v14, %v627_v11  ;;  %v92_v11 = vld [vmem:[%s8651_s0 + $0x158] sm:$0xff]  ;;  %v94_v14 = vld [vmem:[%s8651_s0 + $0x168] sm:$0xff] }
  0xd0   :  { %v366_v37 = vpop.f32.mrf.mxu0 }
  0xd1   :  { %v629_v7 = vmax.f32 %v366_v37, 0.0 }
  0xd2   :  { %v5940_v38 = vpop.f32.mrf.mxu0 }
  0xd3   :  { %v632_v5 = vmax.f32 %v5940_v38, 0.0  ;;  %v683_v12 = vpack.c.bf16 %v630_v10, %v629_v7  ;;  %v90_v7 = vld [vmem:[%s8651_s0 + $0x148] sm:$0xff]  ;;  %v6539_v10 = vld [vmem:[%s8653_s2 + $0x94] ss:$8 sps:$4 sm:$0xff]  }
  0xd4   :  { %v376_v39 = vpop.f32.mrf.mxu0 }
  0xd5   :  { %v631_v2 = vmax.f32 %v376_v39, 0.0  ;;  %v6512_v39 = vld [vmem:[%s8653_s2] ss:$8 sps:$4 sm:$0xff]  }
  0xd6   :  { %v5943_v40 = vpop.f32.mrf.mxu0 }
  0xd7   :  { %v634_v0 = vmax.f32 %v5943_v40, 0.0  ;;  %v684_v8 = vpack.c.bf16 %v632_v5, %v631_v2  ;;  %v6515_v40 = vld [vmem:[%s8653_s2 + $0x14] ss:$8 sps:$4 sm:$0xff]  }
  0xd8   :  { %v386_v41 = vpop.f32.mrf.mxu0  ;;  %v87_v2 = vld [vmem:[%s8651_s0 + $0x130] sm:$0xff]  ;;  %v88_v5 = vld [vmem:[%s8651_s0 + $0x138] sm:$0xff] }
  0xd9   :  { %v633_v61 = vmax.f32 %v386_v41, 0.0  ;;  %v6517_v41 = vld [vmem:[%s8653_s2 + $0x10] ss:$8 sps:$4 sm:$0xff]  }
  0xda   :  { %v5946_v42 = vpop.f32.mrf.mxu0 }
  0xdb   :  { %v636_v59 = vmax.f32 %v5946_v42, 0.0  ;;  %v685_v3 = vpack.c.bf16 %v634_v0, %v633_v61  ;;  %v6518_v42 = vld [vmem:[%s8653_s2 + $0x24] ss:$8 sps:$4 sm:$0xff]   ;;  %v6532_v61 = vld [vmem:[%s8653_s2 + $0x60] ss:$8 sps:$4 sm:$0xff]  }
  0xdc   :  { %v396_v43 = vpop.f32.mrf.mxu0  ;;  %v85_v0 = vld [vmem:[%s8651_s0 + $0x120] sm:$0xff] }
  0xdd   :  { %v635_v56 = vmax.f32 %v396_v43, 0.0  ;;  %v6520_v43 = vld [vmem:[%s8653_s2 + $0x20] ss:$8 sps:$4 sm:$0xff]  }
  0xde   :  { %v5949_v44 = vpop.f32.mrf.mxu0 }
  0xdf   :  { %v638_v54 = vmax.f32 %v5949_v44, 0.0  ;;  %v686_v62 = vpack.c.bf16 %v636_v59, %v635_v56  ;;  %v6521_v44 = vld [vmem:[%s8653_s2 + $0x34] ss:$8 sps:$4 sm:$0xff]   ;;  %v6530_v56 = vld [vmem:[%s8653_s2 + $0x64] ss:$8 sps:$4 sm:$0xff]  }
  0xe0   :  { %v406_v45 = vpop.f32.mrf.mxu0  ;;  %v82_v59 = vld [vmem:[%s8651_s0 + $0x108] sm:$0xff] }
  0xe1   :  { %v637_v51 = vmax.f32 %v406_v45, 0.0  ;;  %v6523_v45 = vld [vmem:[%s8653_s2 + $0x30] ss:$8 sps:$4 sm:$0xff]  }
  0xe2   :  { %v5952_v46 = vpop.f32.mrf.mxu0 }
  0xe3   :  { %v640_v48 = vmax.f32 %v5952_v46, 0.0  ;;  %v687_v57 = vpack.c.bf16 %v638_v54, %v637_v51  ;;  %v6524_v46 = vld [vmem:[%s8653_s2 + $0x44] ss:$8 sps:$4 sm:$0xff]   ;;  %v79_v54 = vld [vmem:[%s8651_s0 + $0xf0] sm:$0xff] }
  0xe4   :  { %v416_v47 = vpop.f32.mrf.mxu0  ;;  %v5510_v51 = vld [vmem:[%s8654_s3 + $0x88] sm:$0xff] }
  0xe5   :  { %v639_v49 = vmax.f32 %v416_v47, 0.0  ;;  %v5440_v47 = vld [vmem:[%s8654_s3 + $0x18] sm:$0xff] }
  0xe6   :  { %v6936_v50 = vpop.f32.mrf.mxu0 }
  0xe7   :  { %v688_v52 = vpack.c.bf16 %v640_v48, %v639_v49  ;;  %v642_v35 = vmax.f32 %v6936_v50, 0.0  ;;  %v6731_v48 = vmov 0.0   ;;  %v6526_v49 = vld [vmem:[%s8653_s2 + $0x40] ss:$8 sps:$4 sm:$0xff]   ;;  %v6527_v50 = vld [vmem:[%s8653_s2 + $0x54] ss:$8 sps:$4 sm:$0xff]  }
  0xe8   :  { %v6938_v53 = vpop.f32.mrf.mxu0  ;;  %6013 = vmatprep.subr.mxu0 %v6731_v48 }
  0xe9   :  { %1177 = vmatpush1.bf16.msra.mxu1 %v688_v52  ;;  %v641_v36 = vmax.f32 %v6938_v53, 0.0  ;;  %6014 = vmatpush3.msra.mxu0 %v5440_v47  ;;  %v77_v52 = vld [vmem:[%s8651_s0 + $0xe0] sm:$0xff]  ;;  %v78_v53 = vld [vmem:[%s8651_s0 + $0xe8] sm:$0xff] }
  0xea   :  { %1178 = vmatprep.subr.bf16.mxu1 %v6730_v30  ;;  %v6941_v55 = vpop.f32.mrf.mxu0  ;;  %6015 = vmatprep.subr.mxu0 %v6731_v48  ;;  %v6572_v47 = vld [vmem:[%s8653_s2 + $0x144] ss:$8 sps:$4 sm:$0xff]  }
  0xeb   :  { %v644_v32 = vmax.f32 %v6941_v55, 0.0  ;;  %v689_v38 = vpack.c.bf16 %v642_v35, %v641_v36  ;;  %5971 = vmatprep.mubr.msk.f32.mxu0 %vm107_vm1, %v77_v52  ;;  %v6529_v55 = vld [vmem:[%s8653_s2 + $0x50] ss:$8 sps:$4 sm:$0xff]   ;;  %v6554_v35 = vld [vmem:[%s8653_s2 + $0xe4] ss:$8 sps:$4 sm:$0xff]  }
  0xec   :  { %v6943_v58 = vpop.f32.mrf.mxu0  ;;  %5972 = vmatmul.mubr.msk.f32.gmra.mxu0 %vm107_vm1, %v78_v53  ;;  %v6556_v36 = vld [vmem:[%s8653_s2 + $0xe0] ss:$8 sps:$4 sm:$0xff]   ;;  %v6577_v52 = vld [vmem:[%s8653_s2 + $0x150] ss:$8 sps:$4 sm:$0xff]   ;;  %v6578_v53 = vld [vmem:[%s8653_s2 + $0x164] ss:$8 sps:$4 sm:$0xff]  }
  0xed   :  { %1179 = vmatpush1.bf16.msra.mxu1 %v687_v57  ;;  %v643_v33 = vmax.f32 %v6943_v58, 0.0  ;;  %5974 = vmatprep.mubr.msk.f32.mxu0 %vm107_vm1, %v79_v54  ;;  %v80_v57 = vld [vmem:[%s8651_s0 + $0xf8] sm:$0xff]  ;;  %v81_v58 = vld [vmem:[%s8651_s0 + $0x100] sm:$0xff] }
  0xee   :  { %1180 = vmatprep.subr.bf16.mxu1 %v6730_v30  ;;  %v5961_v60 = vpop.f32.mrf.mxu0  ;;  %v6580_v54 = vld [vmem:[%s8653_s2 + $0x160] ss:$8 sps:$4 sm:$0xff]  }
  0xef   :  { %v646_v28 = vmax.f32 %v5961_v60, 0.0  ;;  %v690_v37 = vpack.c.bf16 %v644_v32, %v643_v33  ;;  %v83_v60 = vld [vmem:[%s8651_s0 + $0x110] sm:$0xff]  ;;  %v6550_v32 = vld [vmem:[%s8653_s2 + $0xc0] ss:$8 sps:$4 sm:$0xff]  }
  0xf0   :  { %v446_v63 = vpop.f32.mrf.mxu0  ;;  %5975 = vmatmul.mubr.msk.f32.gmra.mxu0 %vm107_vm1, %v80_v57  ;;  %v6551_v33 = vld [vmem:[%s8653_s2 + $0xd4] ss:$8 sps:$4 sm:$0xff]   ;;  %v6584_v57 = vld [vmem:[%s8653_s2 + $0x184] ss:$8 sps:$4 sm:$0xff]  }
  0xf1   :  { %1181 = vmatpush1.bf16.msra.mxu1 %v686_v62  ;;  %v645_v29 = vmax.f32 %v446_v63, 0.0  ;;  %5977 = vmatprep.mubr.msk.f32.mxu0 %vm107_vm1, %v81_v58  ;;  %v6533_v62 = vld [vmem:[%s8653_s2 + $0x74] ss:$8 sps:$4 sm:$0xff]   ;;  %v6586_v58 = vld [vmem:[%s8653_s2 + $0x180] ss:$8 sps:$4 sm:$0xff]  }
  0xf2   :  { %1182 = vmatprep.subr.bf16.mxu1 %v6730_v30  ;;  %v5964_v1 = vpop.f32.mrf.mxu0  ;;  %v84_v63 = vld [vmem:[%s8651_s0 + $0x118] sm:$0xff] }
  0xf3   :  { %v648_v25 = vmax.f32 %v5964_v1, 0.0  ;;  %v691_v34 = vpack.c.bf16 %v646_v28, %v645_v29  ;;  %v86_v1 = vld [vmem:[%s8651_s0 + $0x128] sm:$0xff]  ;;  %v103_v29 = vld [vmem:[%s8651_s0 + $0x1b0] sm:$0xff] }
  0xf4   :  { %v456_v4 = vpop.f32.mrf.mxu0  ;;  %5978 = vmatmul.mubr.msk.f32.gmra.mxu0 %vm107_vm1, %v82_v59  ;;  %v6548_v28 = vld [vmem:[%s8653_s2 + $0xc4] ss:$8 sps:$4 sm:$0xff]   ;;  %v6587_v59 = vld [vmem:[%s8653_s2 + $0x194] ss:$8 sps:$4 sm:$0xff]  }
  0xf5   :  { %1183 = vmatpush1.bf16.msra.mxu1 %v685_v3  ;;  %v647_v26 = vmax.f32 %v456_v4, 0.0  ;;  %5980 = vmatprep.mubr.msk.f32.mxu0 %vm107_vm1, %v83_v60  ;;  %v6535_v3 = vld [vmem:[%s8653_s2 + $0x70] ss:$8 sps:$4 sm:$0xff]   ;;  %v6536_v4 = vld [vmem:[%s8653_s2 + $0x84] ss:$8 sps:$4 sm:$0xff]  }
  0xf6   :  { %1184 = vmatprep.subr.bf16.mxu1 %v6730_v30  ;;  %v5967_v6 = vpop.f32.mrf.mxu0 }
  0xf7   :  { %v650_v22 = vmax.f32 %v5967_v6, 0.0  ;;  %v692_v31 = vpack.c.bf16 %v648_v25, %v647_v26  ;;  %v89_v6 = vld [vmem:[%s8651_s0 + $0x140] sm:$0xff]  ;;  %v6547_v25 = vld [vmem:[%s8653_s2 + $0xb0] ss:$8 sps:$4 sm:$0xff]  }
  0xf8   :  { %v466_v9 = vpop.f32.mrf.mxu0  ;;  %5981 = vmatmul.mubr.msk.f32.gmra.mxu0 %vm107_vm1, %v84_v63  ;;  %v5439_v26 = vld [vmem:[%s8654_s3 + $0x10] sm:$0xff] }
  0xf9   :  { %1185 = vmatpush1.bf16.msra.mxu1 %v684_v8  ;;  %v649_v23 = vmax.f32 %v466_v9, 0.0  ;;  %5983 = vmatprep.mubr.msk.f32.mxu0 %vm107_vm1, %v85_v0  ;;  %v91_v8 = vld [vmem:[%s8651_s0 + $0x150] sm:$0xff]  ;;  %v6538_v9 = vld [vmem:[%s8653_s2 + $0x80] ss:$8 sps:$4 sm:$0xff]   ;;  %v6590_v0 = vld [vmem:[%s8653_s2 + $0x1a4] ss:$8 sps:$4 sm:$0xff]  }
  0xfa   :  { %1186 = vmatprep.subr.bf16.mxu1 %v6730_v30  ;;  %v5970_v13 = vpop.f32.mrf.mxu0  ;;  %6016 = vmatpush3.msra.mxu0 %v5439_v26  ;;  %v6589_v63 = vld [vmem:[%s8653_s2 + $0x190] ss:$8 sps:$4 sm:$0xff]   ;;  %v6602_v26 = vld [vmem:[%s8653_s2 + $0x1e4] ss:$8 sps:$4 sm:$0xff]  }
  0xfb   :  { %v652_v20 = vmax.f32 %v5970_v13, 0.0  ;;  %v693_v27 = vpack.c.bf16 %v650_v22, %v649_v23  ;;  %v6541_v13 = vld [vmem:[%s8653_s2 + $0x90] ss:$8 sps:$4 sm:$0xff]   ;;  %6038 = vmatprep.subr.mxu0 %v6731_v48 }
  0xfc   :  { %v476_v17 = vpop.f32.mrf.mxu0  ;;  %5984 = vmatmul.mubr.msk.f32.gmra.mxu0 %vm107_vm1, %v86_v1  ;;  %v99_v22 = vld [vmem:[%s8651_s0 + $0x190] sm:$0xff]  ;;  %v100_v23 = vld [vmem:[%s8651_s0 + $0x198] sm:$0xff] }
  0xfd   :  { %1187 = vmatpush1.bf16.msra.mxu1 %v683_v12  ;;  %v651_v21 = vmax.f32 %v476_v17, 0.0  ;;  %5986 = vmatprep.mubr.msk.f32.mxu0 %vm107_vm1, %v87_v2  ;;  %v93_v12 = vld [vmem:[%s8651_s0 + $0x160] sm:$0xff]  ;;  %v96_v17 = vld [vmem:[%s8651_s0 + $0x178] sm:$0xff] }
  0xfe   :  { %1188 = vmatprep.subr.bf16.mxu1 %v6730_v30 }
  0xff   :  { %v694_v24 = vpack.c.bf16 %v652_v20, %v651_v21  ;;  %v98_v20 = vld [vmem:[%s8651_s0 + $0x188] sm:$0xff]  ;;  %v6545_v21 = vld [vmem:[%s8653_s2 + $0xb4] ss:$8 sps:$4 sm:$0xff]  }
 0x100   :  { %5987 = vmatmul.mubr.msk.f32.gmra.mxu0 %vm107_vm1, %v88_v5  ;;  %v6592_v5 = vld [vmem:[%s8653_s2 + $0x1a0] ss:$8 sps:$4 sm:$0xff]  }
 0x101   :  { %1189 = vmatpush1.bf16.msra.mxu1 %v682_v16  ;;  %5989 = vmatprep.mubr.msk.f32.mxu0 %vm107_vm1, %v89_v6  ;;  %v95_v16 = vld [vmem:[%s8651_s0 + $0x170] sm:$0xff] }
 0x102   :  { %1190 = vmatprep.subr.bf16.mxu1 %v6730_v30  ;;  %v6593_v6 = vld [vmem:[%s8653_s2 + $0x1b4] ss:$8 sps:$4 sm:$0xff]  }
 0x104   :  { %5990 = vmatmul.mubr.msk.f32.gmra.mxu0 %vm107_vm1, %v90_v7 }
 0x105   :  { %1191 = vmatpush1.bf16.msra.mxu1 %v681_v19  ;;  %5992 = vmatprep.mubr.msk.f32.mxu0 %vm107_vm1, %v91_v8  ;;  %v6544_v19 = vld [vmem:[%s8653_s2 + $0xa0] ss:$8 sps:$4 sm:$0xff]  }
 0x106   :  { %1196 = vmatprep.subr.bf16.mxu1 %v6730_v30 }
 0x108   :  { %5993 = vmatmul.mubr.msk.f32.gmra.mxu0 %vm107_vm1, %v92_v11  ;;  %v6595_v11 = vld [vmem:[%s8653_s2 + $0x1b0] ss:$8 sps:$4 sm:$0xff]  }
 0x109   :  { %1197 = vmatpush2.bf16.msra.mxu1 %v694_v24  ;;  %5995 = vmatprep.mubr.msk.f32.mxu0 %vm107_vm1, %v93_v12  ;;  %v101_v24 = vld [vmem:[%s8651_s0 + $0x1a0] sm:$0xff] }
 0x10a   :  { %1198 = vmatprep.subr.bf16.mxu1 %v6730_v30  ;;  %v6596_v12 = vld [vmem:[%s8653_s2 + $0x1c4] ss:$8 sps:$4 sm:$0xff]  }
 0x10c   :  { %5996 = vmatmul.mubr.msk.f32.gmra.mxu0 %vm107_vm1, %v94_v14 }
 0x10d   :  { %1199 = vmatpush2.bf16.msra.mxu1 %v693_v27  ;;  %5998 = vmatprep.mubr.msk.f32.mxu0 %vm107_vm1, %v95_v16  ;;  %v102_v27 = vld [vmem:[%s8651_s0 + $0x1a8] sm:$0xff] }
 0x10e   :  { %1200 = vmatprep.subr.bf16.mxu1 %v6730_v30  ;;  %v1465_v16 = vld [vmem:[%s8654_s3 + $0x8] sm:$0xff] }
 0x110   :  { %5999 = vmatmul.mubr.msk.f32.gmra.mxu0 %vm107_vm1, %v96_v17 }
 0x111   :  { %1201 = vmatpush2.bf16.msra.mxu1 %v692_v31  ;;  %6001 = vmatprep.mubr.msk.f32.mxu0 %vm107_vm1, %v97_v18  ;;  %v104_v31 = vld [vmem:[%s8651_s0 + $0x1b8] sm:$0xff]  ;;  %v6598_v18 = vld [vmem:[%s8653_s2 + $0x1c0] ss:$8 sps:$4 sm:$0xff]  }
 0x112   :  { %1202 = vmatprep.subr.bf16.mxu1 %v6730_v30 }
 0x114   :  { %6002 = vmatmul.mubr.msk.f32.gmra.mxu0 %vm107_vm1, %v98_v20  ;;  %v1464_v20 = vld [vmem:[%s8654_s3] sm:$0xff] }
 0x115   :  { %1203 = vmatpush2.bf16.msra.mxu1 %v691_v34  ;;  %6004 = vmatprep.mubr.msk.f32.mxu0 %vm107_vm1, %v99_v22  ;;  %v6553_v34 = vld [vmem:[%s8653_s2 + $0xd0] ss:$8 sps:$4 sm:$0xff]  }
 0x116   :  { %1204 = vmatprep.subr.bf16.mxu1 %v6730_v30 }
 0x118   :  { %6005 = vmatmul.mubr.msk.f32.gmra.mxu0 %vm107_vm1, %v100_v23 }
 0x119   :  { %1205 = vmatpush2.bf16.msra.mxu1 %v690_v37  ;;  %6007 = vmatprep.mubr.msk.f32.mxu0 %vm107_vm1, %v101_v24  ;;  %v6557_v37 = vld [vmem:[%s8653_s2 + $0xf4] ss:$8 sps:$4 sm:$0xff]  }
 0x11a   :  { %1206 = vmatprep.subr.bf16.mxu1 %v6730_v30 }
 0x11c   :  { %6008 = vmatmul.mubr.msk.f32.gmra.mxu0 %vm107_vm1, %v102_v27 }
 0x11d   :  { %1207 = vmatpush2.bf16.msra.mxu1 %v689_v38  ;;  %6010 = vmatprep.mubr.msk.f32.mxu0 %vm107_vm1, %v103_v29  ;;  %v6559_v38 = vld [vmem:[%s8653_s2 + $0xf0] ss:$8 sps:$4 sm:$0xff]  }
 0x11e   :  { %6213 = vmatprep.subr.mxu1 %v6731_v48 }
 0x120   :  { %1209 = vmatmul.mubr.bf16.vlgmr.msra.gmra.mxu1 %v6512_v39  ;;  %6011 = vmatmul.mubr.msk.f32.gmra.mxu0 %vm107_vm1, %v104_v31  ;;  %v6560_v39 = vld [vmem:[%s8653_s2 + $0x104] ss:$8 sps:$4 sm:$0xff]   ;;  %v771_v31 = vld [vmem:[%s8653_s2 + $0x1f0] sm:$0xff] }
 0x121   :  { %5408 = vmatprep.mubr.msk.bf16.mxu1 %vm1079_vm2, %v6515_v40  ;;  %6214 = vmatpush3.msra.mxu1 %v5510_v51  ;;  %v6562_v40 = vld [vmem:[%s8653_s2 + $0x100] ss:$8 sps:$4 sm:$0xff]  }
 0x122   :  { %6215 = vmatprep.subr.mxu1 %v6731_v48  ;;  %6017 = vmatprep.mubr.msk.f32.mxu0 %vm6732_vm3, %v6731_v48  ;;  %v5509_v51 = vld [vmem:[%s8654_s3 + $0x80] sm:$0xff] }
 0x123   :  { %6216 = vmatpush3.msra.mxu1 %v5509_v51 }
 0x124   :  { %2817 = vmatprep.subr.bf16.mxu1 %v6730_v30 }
 0x128   :  { %1217 = vmatmul.mubr.bf16.gmra.mxu1 %v6517_v41  ;;  %v6563_v41 = vld [vmem:[%s8653_s2 + $0x114] ss:$8 sps:$4 sm:$0xff]  }
 0x129   :  { %5409 = vmatprep.mubr.msk.bf16.mxu1 %vm1079_vm2, %v6518_v42  ;;  %v6565_v42 = vld [vmem:[%s8653_s2 + $0x110] ss:$8 sps:$4 sm:$0xff]  }
 0x130   :  { %1225 = vmatmul.mubr.bf16.gmra.mxu1 %v6520_v43  ;;  %v6566_v43 = vld [vmem:[%s8653_s2 + $0x124] ss:$8 sps:$4 sm:$0xff]  }
 0x131   :  { %5410 = vmatprep.mubr.msk.bf16.mxu1 %vm1079_vm2, %v6521_v44  ;;  %v6568_v44 = vld [vmem:[%s8653_s2 + $0x120] ss:$8 sps:$4 sm:$0xff]  }
 0x138   :  { %1233 = vmatmul.mubr.bf16.gmra.mxu1 %v6523_v45  ;;  %v6569_v45 = vld [vmem:[%s8653_s2 + $0x134] ss:$8 sps:$4 sm:$0xff]  }
 0x139   :  { %5411 = vmatprep.mubr.msk.bf16.mxu1 %vm1079_vm2, %v6524_v46  ;;  %v6571_v46 = vld [vmem:[%s8653_s2 + $0x130] ss:$8 sps:$4 sm:$0xff]  }
 0x140   :  { %1241 = vmatmul.mubr.bf16.gmra.mxu1 %v6526_v49  ;;  %v6574_v49 = vld [vmem:[%s8653_s2 + $0x140] ss:$8 sps:$4 sm:$0xff]  }
 0x141   :  { %5412 = vmatprep.mubr.msk.bf16.mxu1 %vm1079_vm2, %v6527_v50  ;;  %v6575_v50 = vld [vmem:[%s8653_s2 + $0x154] ss:$8 sps:$4 sm:$0xff]  }
 0x148   :  { %1249 = vmatmul.mubr.bf16.gmra.mxu1 %v6529_v55  ;;  %v6581_v55 = vld [vmem:[%s8653_s2 + $0x174] ss:$8 sps:$4 sm:$0xff]  }
 0x149   :  { %5413 = vmatprep.mubr.msk.bf16.mxu1 %vm1079_vm2, %v6530_v56  ;;  %v6583_v56 = vld [vmem:[%s8653_s2 + $0x170] ss:$8 sps:$4 sm:$0xff]  }
 0x150   :  { %1257 = vmatmul.mubr.bf16.gmra.mxu1 %v6532_v61 }
 0x151   :  { %5414 = vmatprep.mubr.msk.bf16.mxu1 %vm1079_vm2, %v6533_v62 }
 0x158   :  { %1265 = vmatmul.mubr.bf16.gmra.mxu1 %v6535_v3 }
 0x159   :  { %5415 = vmatprep.mubr.msk.bf16.mxu1 %vm1079_vm2, %v6536_v4 }
 0x160   :  { %1273 = vmatmul.mubr.bf16.gmra.mxu1 %v6538_v9 }
 0x161   :  { %5416 = vmatprep.mubr.msk.bf16.mxu1 %vm1079_vm2, %v6539_v10 }
 0x168   :  { %1281 = vmatmul.mubr.bf16.gmra.mxu1 %v6541_v13 }
 0x169   :  { %5417 = vmatprep.mubr.msk.bf16.mxu1 %vm1079_vm2, %v6542_v15 }
 0x170   :  { %1289 = vmatmul.mubr.bf16.gmra.mxu1 %v6544_v19  ;;  %v6599_v19 = vld [vmem:[%s8653_s2 + $0x1d4] ss:$8 sps:$4 sm:$0xff]  }
 0x171   :  { %5418 = vmatprep.mubr.msk.bf16.mxu1 %vm1079_vm2, %v6545_v21 }
 0x178   :  { %1297 = vmatmul.mubr.bf16.gmra.mxu1 %v6547_v25  ;;  %v6601_v25 = vld [vmem:[%s8653_s2 + $0x1d0] ss:$8 sps:$4 sm:$0xff]  }
 0x179   :  { %5419 = vmatprep.mubr.msk.bf16.mxu1 %vm1079_vm2, %v6548_v28 }
 0x180   :  { %1305 = vmatmul.mubr.bf16.gmra.mxu1 %v6550_v32 }
 0x181   :  { %5420 = vmatprep.mubr.msk.bf16.mxu1 %vm1079_vm2, %v6551_v33  ;;  %v6604_v33 = vld [vmem:[%s8653_s2 + $0x1e0] ss:$8 sps:$4 sm:$0xff]  }
 0x188   :  { %1313 = vmatmul.mubr.bf16.gmra.mxu1 %v6553_v34  ;;  %v7346_v34 = vcombine.high %v771_v31, %v771_v31 }
 0x189   :  { %5421 = vmatprep.mubr.msk.bf16.mxu1 %vm1079_vm2, %v6554_v35 }
 0x190   :  { %1321 = vmatmul.mubr.bf16.gmra.mxu1 %v6556_v36 }
 0x191   :  { %5422 = vmatprep.mubr.msk.bf16.mxu1 %vm1079_vm2, %v6557_v37 }
 0x198   :  { %1329 = vmatmul.mubr.bf16.gmra.mxu1 %v6559_v38 }
 0x199   :  { %5423 = vmatprep.mubr.msk.bf16.mxu1 %vm1079_vm2, %v6560_v39  ;;  %v7355_v39 = vcombine.low %v771_v31, %v771_v31 }
 0x1a0   :  { %1337 = vmatmul.mubr.bf16.gmra.mxu1 %v6562_v40 }
 0x1a1   :  { %5424 = vmatprep.mubr.msk.bf16.mxu1 %vm1079_vm2, %v6563_v41  ;;  %v5456_v41 = vld [vmem:[%s8654_s3 + $0x28] sm:$0xff] }
 0x1a8   :  { %1345 = vmatmul.mubr.bf16.gmra.mxu1 %v6565_v42 }
 0x1a9   :  { %5425 = vmatprep.mubr.msk.bf16.mxu1 %vm1079_vm2, %v6566_v43  ;;  %v5455_v43 = vld [vmem:[%s8654_s3 + $0x20] sm:$0xff] }
 0x1b0   :  { %1353 = vmatmul.mubr.bf16.gmra.mxu1 %v6568_v44 }
 0x1b1   :  { %5426 = vmatprep.mubr.msk.bf16.mxu1 %vm1079_vm2, %v6569_v45 }
 0x1b8   :  { %1361 = vmatmul.mubr.bf16.gmra.mxu1 %v6571_v46 }
 0x1b9   :  { %5427 = vmatprep.mubr.msk.bf16.mxu1 %vm1079_vm2, %v6572_v47 }
 0x1c0   :  { %1369 = vmatmul.mubr.bf16.gmra.mxu1 %v6574_v49 }
 0x1c1   :  { %5428 = vmatprep.mubr.msk.bf16.mxu1 %vm1079_vm2, %v6575_v50 }
 0x1c8   :  { %1377 = vmatmul.mubr.bf16.gmra.mxu1 %v6577_v52 }
 0x1c9   :  { %5429 = vmatprep.mubr.msk.bf16.mxu1 %vm1079_vm2, %v6578_v53 }
 0x1d0   :  { %1385 = vmatmul.mubr.bf16.gmra.mxu1 %v6580_v54 }
 0x1d1   :  { %5430 = vmatprep.mubr.msk.bf16.mxu1 %vm1079_vm2, %v6581_v55 }
 0x1d8   :  { %1393 = vmatmul.mubr.bf16.gmra.mxu1 %v6583_v56 }
 0x1d9   :  { %5431 = vmatprep.mubr.msk.bf16.mxu1 %vm1079_vm2, %v6584_v57 }
 0x1e0   :  { %v7269_v60 = vpop.f32.mrf.mxu1  ;;  %1401 = vmatmul.mubr.bf16.gmra.mxu1 %v6586_v58  ;;  %v5465_v58 = vld [vmem:[%s8654_s3 + $0x38] sm:$0xff] }
 0x1e1   :  { %5432 = vmatprep.mubr.msk.bf16.mxu1 %vm1079_vm2, %v6587_v59 }
 0x1e2   :  { %v1212_v61 = vpop.f32.mrf.mxu1 }
 0x1e4   :  { %v7272_v62 = vpop.f32.mrf.mxu1 }
 0x1e6   :  { %v1215_v1 = vpop.f32.mrf.mxu1 }
 0x1e8   :  { %v7280_v2 = vpop.f32.mrf.mxu1  ;;  %1409 = vmatmul.mubr.bf16.gmra.mxu1 %v6589_v63 }
 0x1e9   :  { %5433 = vmatprep.mubr.msk.bf16.mxu1 %vm1079_vm2, %v6590_v0 }
 0x1ea   :  { %v1220_v3 = vpop.f32.mrf.mxu1 }
 0x1ec   :  { %v7283_v4 = vpop.f32.mrf.mxu1 }
 0x1ee   :  { %v1223_v7 = vpop.f32.mrf.mxu1 }
 0x1f0   :  { %v7291_v8 = vpop.f32.mrf.mxu1  ;;  %1417 = vmatmul.mubr.bf16.gmra.mxu1 %v6592_v5 }
 0x1f1   :  { %5434 = vmatprep.mubr.msk.bf16.mxu1 %vm1079_vm2, %v6593_v6 }
 0x1f2   :  { %v1228_v9 = vpop.f32.mrf.mxu1 }
 0x1f3   :  { %v7426_v9 = vpop.f32.mrf.mxu0 }
 0x1f4   :  { %v7294_v10 = vpop.f32.mrf.mxu1 }
 0x1f6   :  { %v1231_v13 = vpop.f32.mrf.mxu1 }
 0x1f7   :  { %v5473_v13 = vld [vmem:[%s8654_s3 + $0x40] sm:$0xff] }
 0x1f8   :  { %v7302_v14 = vpop.f32.mrf.mxu1  ;;  %1425 = vmatmul.mubr.bf16.gmra.mxu1 %v6595_v11  ;;  %v5474_v11 = vld [vmem:[%s8654_s3 + $0x48] sm:$0xff] }
 0x1f9   :  { %5435 = vmatprep.mubr.msk.bf16.mxu1 %vm1079_vm2, %v6596_v12 }
 0x1fa   :  { %v1236_v15 = vpop.f32.mrf.mxu1 }
 0x1fc   :  { %v1237_v17 = vpop.f32.mrf.mxu1 }
 0x1fd   :  { %6018 = vmatmul.mubr.msk.f32.vlgmr.msra.gmra.mxu0 %vm1469_vm4, %v1237_v17 }
 0x1fe   :  { %v1239_v21 = vpop.f32.mrf.mxu1  ;;  %6020 = vmatprep.mubr.msk.f32.mxu0 %vm6732_vm3, %v6731_v48  ;;  %6039 = vmatpush3.msra.mxu0 %v1465_v16 }
 0x1ff   :  { %6040 = vmatprep.subr.mxu0 %v6731_v48 }
 0x200   :  { %v1242_v22 = vpop.f32.mrf.mxu1  ;;  %1433 = vmatmul.mubr.bf16.gmra.mxu1 %v6598_v18  ;;  %6041 = vmatpush3.msra.mxu0 %v1464_v20 }
 0x201   :  { %6021 = vmatmul.mubr.msk.f32.gmra.mxu0 %vm1469_vm4, %v1242_v22  ;;  %5436 = vmatprep.mubr.msk.bf16.mxu1 %vm1079_vm2, %v6599_v19 }
 0x202   :  { %v1244_v23 = vpop.f32.mrf.mxu1  ;;  %6023 = vmatprep.mubr.msk.f32.mxu0 %vm6732_vm3, %v6731_v48  ;;  %6063 = vmatprep.subr.mxu0 %v6731_v48 }
 0x204   :  { %v1245_v24 = vpop.f32.mrf.mxu1 }
 0x205   :  { %6024 = vmatmul.mubr.msk.f32.gmra.mxu0 %vm1469_vm4, %v1245_v24 }
 0x206   :  { %v1247_v27 = vpop.f32.mrf.mxu1  ;;  %6026 = vmatprep.mubr.msk.f32.mxu0 %vm6732_vm3, %v6731_v48 }
 0x208   :  { %v1250_v28 = vpop.f32.mrf.mxu1  ;;  %1441 = vmatmul.mubr.bf16.gmra.mxu1 %v6601_v25 }
 0x209   :  { %6027 = vmatmul.mubr.msk.f32.gmra.mxu0 %vm1469_vm4, %v1250_v28  ;;  %5437 = vmatprep.mubr.msk.bf16.mxu1 %vm1079_vm2, %v6602_v26 }
 0x20a   :  { %v1252_v29 = vpop.f32.mrf.mxu1  ;;  %6029 = vmatprep.mubr.msk.f32.mxu0 %vm6732_vm3, %v6731_v48 }
 0x20c   :  { %v1253_v32 = vpop.f32.mrf.mxu1 }
 0x20d   :  { %6030 = vmatmul.mubr.msk.f32.gmra.mxu0 %vm1469_vm4, %v1253_v32 }
 0x20e   :  { %v1255_v35 = vpop.f32.mrf.mxu1  ;;  %6032 = vmatprep.mubr.msk.f32.mxu0 %vm6732_vm3, %v6731_v48 }
 0x210   :  { %v1258_v36 = vpop.f32.mrf.mxu1  ;;  %1449 = vmatmul.mubr.bf16.gmra.mxu1 %v6604_v33 }
 0x211   :  { %6033 = vmatmul.mubr.msk.f32.gmra.mxu0 %vm1469_vm4, %v1258_v36  ;;  %5438 = vmatprep.mubr.msk.bf16.mxu1 %vm1079_vm2, %v7346_v34  ;;  %v5483_v36 = vld [vmem:[%s8654_s3 + $0x58] sm:$0xff] }
 0x212   :  { %v1260_v37 = vpop.f32.mrf.mxu1  ;;  %6035 = vmatprep.mubr.msk.f32.mxu0 %vm6732_vm3, %v6731_v48 }
 0x214   :  { %v1261_v38 = vpop.f32.mrf.mxu1 }
 0x215   :  { %6036 = vmatmul.mubr.msk.f32.gmra.mxu0 %vm1469_vm4, %v1261_v38  ;;  %v5482_v38 = vld [vmem:[%s8654_s3 + $0x50] sm:$0xff] }
 0x216   :  { %v1263_v40 = vpop.f32.mrf.mxu1  ;;  %6042 = vmatprep.mubr.msk.f32.mxu0 %vm6732_vm3, %v6731_v48 }
 0x218   :  { %v1266_v42 = vpop.f32.mrf.mxu1  ;;  %1457 = vmatmul.mubr.bf16.gmra.mxu1 %v7355_v39 }
 0x219   :  { %6043 = vmatmul.mubr.msk.f32.vlgmr.msra.gmra.mxu0 %vm1469_vm4, %v7269_v60  ;;  %6217 = vmatprep.mubr.msk.f32.mxu1 %vm6732_vm3, %v6731_v48  ;;  %v5464_v60 = vld [vmem:[%s8654_s3 + $0x30] sm:$0xff] }
 0x21a   :  { %v1268_v44 = vpop.f32.mrf.mxu1  ;;  %6045 = vmatprep.mubr.msk.f32.mxu0 %vm6732_vm3, %v6731_v48  ;;  %6064 = vmatpush3.msra.mxu0 %v5456_v41 }
 0x21b   :  { %6065 = vmatprep.subr.mxu0 %v6731_v48 }
 0x21c   :  { %v1269_v45 = vpop.f32.mrf.mxu1  ;;  %6066 = vmatpush3.msra.mxu0 %v5455_v43 }
 0x21d   :  { %6046 = vmatmul.mubr.msk.f32.gmra.mxu0 %vm1469_vm4, %v7272_v62  ;;  %6088 = vmatprep.subr.mxu0 %v6731_v48 }
 0x21e   :  { %v1271_v46 = vpop.f32.mrf.mxu1  ;;  %6048 = vmatprep.mubr.msk.f32.mxu0 %vm6732_vm3, %v6731_v48 }
 0x220   :  { %v1274_v47 = vpop.f32.mrf.mxu1 }
 0x221   :  { %6049 = vmatmul.mubr.msk.f32.gmra.mxu0 %vm1469_vm4, %v7280_v2 }
 0x222   :  { %v1276_v49 = vpop.f32.mrf.mxu1  ;;  %6051 = vmatprep.mubr.msk.f32.mxu0 %vm6732_vm3, %v6731_v48 }
 0x224   :  { %v1277_v50 = vpop.f32.mrf.mxu1 }
 0x225   :  { %6052 = vmatmul.mubr.msk.f32.gmra.mxu0 %vm1469_vm4, %v7283_v4 }
 0x226   :  { %v1279_v51 = vpop.f32.mrf.mxu1  ;;  %6054 = vmatprep.mubr.msk.f32.mxu0 %vm6732_vm3, %v6731_v48 }
 0x228   :  { %v1282_v52 = vpop.f32.mrf.mxu1 }
 0x229   :  { %6055 = vmatmul.mubr.msk.f32.gmra.mxu0 %vm1469_vm4, %v7291_v8 }
 0x22a   :  { %v1284_v53 = vpop.f32.mrf.mxu1  ;;  %6057 = vmatprep.mubr.msk.f32.mxu0 %vm6732_vm3, %v6731_v48 }
 0x22c   :  { %v1285_v54 = vpop.f32.mrf.mxu1 }
 0x22d   :  { %6058 = vmatmul.mubr.msk.f32.gmra.mxu0 %vm1469_vm4, %v7294_v10 }
 0x22e   :  { %v1287_v55 = vpop.f32.mrf.mxu1  ;;  %6060 = vmatprep.mubr.msk.f32.mxu0 %vm6732_vm3, %v6731_v48 }
 0x230   :  { %v1290_v56 = vpop.f32.mrf.mxu1 }
 0x231   :  { %6061 = vmatmul.mubr.msk.f32.gmra.mxu0 %vm1469_vm4, %v7302_v14  ;;  %v7437_v14 = vpop.f32.mrf.mxu0 }
 0x232   :  { %v1292_v57 = vpop.f32.mrf.mxu1  ;;  %6067 = vmatprep.mubr.msk.f32.mxu0 %vm6732_vm3, %v6731_v48 }
 0x233   :  { %v7444_v17 = vpop.f32.mrf.mxu0 }
 0x234   :  { %v1293_v59 = vpop.f32.mrf.mxu1 }
 0x235   :  { %6068 = vmatmul.mubr.msk.f32.vlgmr.msra.gmra.mxu0 %vm1469_vm4, %v1266_v42  ;;  %v7449_v20 = vpop.f32.mrf.mxu0 }
 0x236   :  { %v1295_v61 = vpop.f32.mrf.mxu1  ;;  %6070 = vmatprep.mubr.msk.f32.mxu0 %vm6732_vm3, %v6731_v48  ;;  %6089 = vmatpush3.msra.mxu0 %v5465_v58 }
 0x237   :  { %6090 = vmatprep.subr.mxu0 %v6731_v48  ;;  %v7454_v23 = vpop.f32.mrf.mxu0  ;;  %v5492_v61 = vld [vmem:[%s8654_s3 + $0x68] sm:$0xff] }
 0x238   :  { %v1298_v62 = vpop.f32.mrf.mxu1  ;;  %6091 = vmatpush3.msra.mxu0 %v5464_v60 }
 0x239   :  { %6071 = vmatmul.mubr.msk.f32.gmra.mxu0 %vm1469_vm4, %v1269_v45  ;;  %6113 = vmatprep.subr.mxu0 %v6731_v48  ;;  %v7459_v26 = vpop.f32.mrf.mxu0 }
 0x23a   :  { %v1300_v63 = vpop.f32.mrf.mxu1  ;;  %6073 = vmatprep.mubr.msk.f32.mxu0 %vm6732_vm3, %v6731_v48 }
 0x23b   :  { %v7464_v29 = vpop.f32.mrf.mxu0 }
 0x23c   :  { %v1301_v0 = vpop.f32.mrf.mxu1 }
 0x23d   :  { %6074 = vmatmul.mubr.msk.f32.gmra.mxu0 %vm1469_vm4, %v1274_v47  ;;  %v7469_v33 = vpop.f32.mrf.mxu0 }
 0x23e   :  { %v1303_v1 = vpop.f32.mrf.mxu1  ;;  %6076 = vmatprep.mubr.msk.f32.mxu0 %vm6732_vm3, %v6731_v48 }
 0x23f   :  { %v7480_v40 = vpop.f32.mrf.mxu0 }
 0x240   :  { %v1306_v2 = vpop.f32.mrf.mxu1 }
 0x241   :  { %6077 = vmatmul.mubr.msk.f32.gmra.mxu0 %vm1469_vm4, %v1277_v50  ;;  %v7486_v43 = vpop.f32.mrf.mxu0 }
 0x242   :  { %v1308_v3 = vpop.f32.mrf.mxu1  ;;  %6079 = vmatprep.mubr.msk.f32.mxu0 %vm6732_vm3, %v6731_v48 }
 0x243   :  { %v7492_v46 = vpop.f32.mrf.mxu0 }
 0x244   :  { %v1309_v4 = vpop.f32.mrf.mxu1 }
 0x245   :  { %6080 = vmatmul.mubr.msk.f32.gmra.mxu0 %vm1469_vm4, %v1282_v52  ;;  %v7497_v50 = vpop.f32.mrf.mxu0 }
 0x246   :  { %v1311_v5 = vpop.f32.mrf.mxu1  ;;  %6082 = vmatprep.mubr.msk.f32.mxu0 %vm6732_vm3, %v6731_v48 }
 0x247   :  { %v7502_v53 = vpop.f32.mrf.mxu0 }
 0x248   :  { %v1314_v6 = vpop.f32.mrf.mxu1 }
 0x249   :  { %6083 = vmatmul.mubr.msk.f32.gmra.mxu0 %vm1469_vm4, %v1285_v54 }
 0x24a   :  { %v1316_v7 = vpop.f32.mrf.mxu1  ;;  %6085 = vmatprep.mubr.msk.f32.mxu0 %vm6732_vm3, %v6731_v48 }
 0x24c   :  { %v1317_v8 = vpop.f32.mrf.mxu1 }
 0x24d   :  { %6086 = vmatmul.mubr.msk.f32.gmra.mxu0 %vm1469_vm4, %v1290_v56  ;;  %v7507_v56 = vpop.f32.mrf.mxu0 }
 0x24e   :  { %v1319_v10 = vpop.f32.mrf.mxu1  ;;  %6092 = vmatprep.mubr.msk.f32.mxu0 %vm6732_vm3, %v6731_v48 }
 0x250   :  { %v1322_v12 = vpop.f32.mrf.mxu1 }
 0x251   :  { %6093 = vmatmul.mubr.msk.f32.vlgmr.msra.gmra.mxu0 %vm1469_vm4, %v1293_v59  ;;  %v7512_v59 = vpop.f32.mrf.mxu0 }
 0x252   :  { %v1324_v15 = vpop.f32.mrf.mxu1  ;;  %6095 = vmatprep.mubr.msk.f32.mxu0 %vm6732_vm3, %v6731_v48  ;;  %6114 = vmatpush3.msra.mxu0 %v5474_v11 }
 0x253   :  { %6115 = vmatprep.subr.mxu0 %v6731_v48  ;;  %v7520_v63 = vpop.f32.mrf.mxu0 }
 0x254   :  { %v1325_v16 = vpop.f32.mrf.mxu1  ;;  %6116 = vmatpush3.msra.mxu0 %v5473_v13 }
 0x255   :  { %6096 = vmatmul.mubr.msk.f32.gmra.mxu0 %vm1469_vm4, %v1298_v62  ;;  %6138 = vmatprep.subr.mxu0 %v6731_v48  ;;  %v7529_v3 = vpop.f32.mrf.mxu0 }
 0x256   :  { %v1327_v18 = vpop.f32.mrf.mxu1  ;;  %6098 = vmatprep.mubr.msk.f32.mxu0 %vm6732_vm3, %v6731_v48 }
 0x258   :  { %v1330_v19 = vpop.f32.mrf.mxu1 }
 0x259   :  { %6099 = vmatmul.mubr.msk.f32.gmra.mxu0 %vm1469_vm4, %v1301_v0  ;;  %v5491_v0 = vld [vmem:[%s8654_s3 + $0x60] sm:$0xff] }
 0x25a   :  { %v1332_v21 = vpop.f32.mrf.mxu1  ;;  %6101 = vmatprep.mubr.msk.f32.mxu0 %vm6732_vm3, %v6731_v48 }
 0x25c   :  { %v1333_v22 = vpop.f32.mrf.mxu1 }
 0x25d   :  { %6102 = vmatmul.mubr.msk.f32.gmra.mxu0 %vm1469_vm4, %v1306_v2 }
 0x25e   :  { %v1335_v24 = vpop.f32.mrf.mxu1  ;;  %6104 = vmatprep.mubr.msk.f32.mxu0 %vm6732_vm3, %v6731_v48 }
 0x260   :  { %v1338_v25 = vpop.f32.mrf.mxu1 }
 0x261   :  { %6105 = vmatmul.mubr.msk.f32.gmra.mxu0 %vm1469_vm4, %v1309_v4 }
 0x262   :  { %v1340_v27 = vpop.f32.mrf.mxu1  ;;  %6107 = vmatprep.mubr.msk.f32.mxu0 %vm6732_vm3, %v6731_v48 }
 0x264   :  { %v1341_v28 = vpop.f32.mrf.mxu1 }
 0x265   :  { %6108 = vmatmul.mubr.msk.f32.gmra.mxu0 %vm1469_vm4, %v1314_v6  ;;  %v7535_v6 = vpop.f32.mrf.mxu0 }
 0x266   :  { %v1343_v31 = vpop.f32.mrf.mxu1  ;;  %6110 = vmatprep.mubr.msk.f32.mxu0 %vm6732_vm3, %v6731_v48 }
 0x267   :  { %v7540_v10 = vpop.f32.mrf.mxu0  ;;  %v5500_v31 = vld [vmem:[%s8654_s3 + $0x70] sm:$0xff] }
 0x268   :  { %v1346_v32 = vpop.f32.mrf.mxu1 }
 0x269   :  { %6111 = vmatmul.mubr.msk.f32.gmra.mxu0 %vm1469_vm4, %v1317_v8  ;;  %v7545_v13 = vpop.f32.mrf.mxu0 }
 0x26a   :  { %v1348_v35 = vpop.f32.mrf.mxu1  ;;  %6117 = vmatprep.mubr.msk.f32.mxu0 %vm6732_vm3, %v6731_v48 }
 0x26b   :  { %v7550_v18 = vpop.f32.mrf.mxu0 }
 0x26c   :  { %v1349_v37 = vpop.f32.mrf.mxu1 }
 0x26d   :  { %6118 = vmatmul.mubr.msk.f32.vlgmr.msra.gmra.mxu0 %vm1469_vm4, %v1322_v12 }
 0x26e   :  { %v1351_v41 = vpop.f32.mrf.mxu1  ;;  %6120 = vmatprep.mubr.msk.f32.mxu0 %vm6732_vm3, %v6731_v48  ;;  %6139 = vmatpush3.msra.mxu0 %v5483_v36 }
 0x26f   :  { %6140 = vmatprep.subr.mxu0 %v6731_v48 }
 0x270   :  { %v1354_v42 = vpop.f32.mrf.mxu1  ;;  %6141 = vmatpush3.msra.mxu0 %v5482_v38 }
 0x271   :  { %6121 = vmatmul.mubr.msk.f32.gmra.mxu0 %vm1469_vm4, %v1325_v16  ;;  %6163 = vmatprep.subr.mxu0 %v6731_v48 }
 0x272   :  { %v1356_v44 = vpop.f32.mrf.mxu1  ;;  %6123 = vmatprep.mubr.msk.f32.mxu0 %vm6732_vm3, %v6731_v48 }
 0x274   :  { %v1357_v45 = vpop.f32.mrf.mxu1 }
 0x275   :  { %6124 = vmatmul.mubr.msk.f32.gmra.mxu0 %vm1469_vm4, %v1330_v19 }
 0x276   :  { %v1359_v47 = vpop.f32.mrf.mxu1  ;;  %6126 = vmatprep.mubr.msk.f32.mxu0 %vm6732_vm3, %v6731_v48 }
 0x278   :  { %v1362_v49 = vpop.f32.mrf.mxu1 }
 0x279   :  { %6127 = vmatmul.mubr.msk.f32.gmra.mxu0 %vm1469_vm4, %v1333_v22  ;;  %v7555_v22 = vpop.f32.mrf.mxu0 }
 0x27a   :  { %v1364_v51 = vpop.f32.mrf.mxu1  ;;  %6129 = vmatprep.mubr.msk.f32.mxu0 %vm6732_vm3, %v6731_v48 }
 0x27c   :  { %v1365_v52 = vpop.f32.mrf.mxu1 }
 0x27d   :  { %6130 = vmatmul.mubr.msk.f32.gmra.mxu0 %vm1469_vm4, %v1338_v25  ;;  %v5501_v25 = vld [vmem:[%s8654_s3 + $0x78] sm:$0xff] }
 0x27e   :  { %v1367_v54 = vpop.f32.mrf.mxu1  ;;  %6132 = vmatprep.mubr.msk.f32.mxu0 %vm6732_vm3, %v6731_v48 }
 0x280   :  { %v1370_v55 = vpop.f32.mrf.mxu1 }
 0x281   :  { %6133 = vmatmul.mubr.msk.f32.gmra.mxu0 %vm1469_vm4, %v1341_v28  ;;  %v7563_v28 = vpop.f32.mrf.mxu0 }
 0x282   :  { %v1372_v57 = vpop.f32.mrf.mxu1  ;;  %6135 = vmatprep.mubr.msk.f32.mxu0 %vm6732_vm3, %v6731_v48 }
 0x283   :  { %v7572_v36 = vpop.f32.mrf.mxu0 }
 0x284   :  { %v1373_v58 = vpop.f32.mrf.mxu1 }
 0x285   :  { %6136 = vmatmul.mubr.msk.f32.gmra.mxu0 %vm1469_vm4, %v1346_v32  ;;  %v7577_v41 = vpop.f32.mrf.mxu0 }
 0x286   :  { %v1375_v60 = vpop.f32.mrf.mxu1  ;;  %6142 = vmatprep.mubr.msk.f32.mxu0 %vm6732_vm3, %v6731_v48 }
 0x287   :  { %v667_v60 = vmax.f32 %v7520_v63, 0.0 }
 0x288   :  { %v1378_v62 = vpop.f32.mrf.mxu1 }
 0x289   :  { %6143 = vmatmul.mubr.msk.f32.vlgmr.msra.gmra.mxu0 %vm1469_vm4, %v1349_v37 }
 0x28a   :  { %v1380_v1 = vpop.f32.mrf.mxu1  ;;  %6145 = vmatprep.mubr.msk.f32.mxu0 %vm6732_vm3, %v6731_v48  ;;  %6164 = vmatpush3.msra.mxu0 %v5492_v61 }
 0x28b   :  { %6165 = vmatprep.subr.mxu0 %v6731_v48 }
 0x28c   :  { %v1381_v2 = vpop.f32.mrf.mxu1  ;;  %6166 = vmatpush3.msra.mxu0 %v5491_v0 }
 0x28d   :  { %6146 = vmatmul.mubr.msk.f32.gmra.mxu0 %vm1469_vm4, %v1354_v42  ;;  %6188 = vmatprep.subr.mxu0 %v6731_v48 }
 0x28e   :  { %v1383_v4 = vpop.f32.mrf.mxu1  ;;  %6148 = vmatprep.mubr.msk.f32.mxu0 %vm6732_vm3, %v6731_v48 }
 0x28f   :  { %v665_v4 = vmax.f32 %v7507_v56, 0.0  ;;  %v663_v56 = vmax.f32 %v7497_v50, 0.0  ;;  %v661_v50 = vmax.f32 %v7486_v43, 0.0  ;;  %v659_v43 = vmax.f32 %v7469_v33, 0.0 }
 0x290   :  { %v1386_v5 = vpop.f32.mrf.mxu1  ;;  %v657_v33 = vmax.f32 %v7459_v26, 0.0  ;;  %v655_v26 = vmax.f32 %v7449_v20, 0.0  ;;  %v653_v20 = vmax.f32 %v7437_v14, 0.0 }
 0x291   :  { %6149 = vmatmul.mubr.msk.f32.gmra.mxu0 %vm1469_vm4, %v1357_v45  ;;  %v7584_v45 = vpop.f32.mrf.mxu0 }
 0x292   :  { %v1388_v7 = vpop.f32.mrf.mxu1  ;;  %6151 = vmatprep.mubr.msk.f32.mxu0 %vm6732_vm3, %v6731_v48 }
 0x293   :  { %v7591_v51 = vpop.f32.mrf.mxu0 }
 0x294   :  { %v1389_v8 = vpop.f32.mrf.mxu1 }
 0x295   :  { %6152 = vmatmul.mubr.msk.f32.gmra.mxu0 %vm1469_vm4, %v1362_v49 }
 0x296   :  { %v1391_v11 = vpop.f32.mrf.mxu1  ;;  %6154 = vmatprep.mubr.msk.f32.mxu0 %vm6732_vm3, %v6731_v48 }
 0x298   :  { %v1394_v12 = vpop.f32.mrf.mxu1 }
 0x299   :  { %6155 = vmatmul.mubr.msk.f32.gmra.mxu0 %vm1469_vm4, %v1365_v52 }
 0x29a   :  { %v1396_v15 = vpop.f32.mrf.mxu1  ;;  %6157 = vmatprep.mubr.msk.f32.mxu0 %vm6732_vm3, %v6731_v48 }
 0x29c   :  { %v1397_v16 = vpop.f32.mrf.mxu1 }
 0x29d   :  { %6158 = vmatmul.mubr.msk.f32.gmra.mxu0 %vm1469_vm4, %v1370_v55  ;;  %v7598_v55 = vpop.f32.mrf.mxu0 }
 0x29e   :  { %v1399_v19 = vpop.f32.mrf.mxu1  ;;  %6160 = vmatprep.mubr.msk.f32.mxu0 %vm6732_vm3, %v6731_v48 }
 0x2a0   :  { %v1402_v21 = vpop.f32.mrf.mxu1 }
 0x2a1   :  { %6161 = vmatmul.mubr.msk.f32.gmra.mxu0 %vm1469_vm4, %v1373_v58  ;;  %v668_v58 = vmax.f32 %v7512_v59, 0.0 }
 0x2a2   :  { %v1404_v24 = vpop.f32.mrf.mxu1  ;;  %6167 = vmatprep.mubr.msk.f32.mxu0 %vm6732_vm3, %v6731_v48 }
 0x2a4   :  { %v1405_v27 = vpop.f32.mrf.mxu1 }
 0x2a5   :  { %6168 = vmatmul.mubr.msk.f32.vlgmr.msra.gmra.mxu0 %vm1469_vm4, %v1378_v62 }
 0x2a6   :  { %v1407_v32 = vpop.f32.mrf.mxu1  ;;  %6170 = vmatprep.mubr.msk.f32.mxu0 %vm6732_vm3, %v6731_v48  ;;  %6189 = vmatpush3.msra.mxu0 %v5501_v25 }
 0x2a7   :  { %6190 = vmatprep.subr.mxu0 %v6731_v48 }
 0x2a8   :  { %v1410_v35 = vpop.f32.mrf.mxu1  ;;  %6191 = vmatpush3.msra.mxu0 %v5500_v31 }
 0x2a9   :  { %6171 = vmatmul.mubr.msk.f32.gmra.mxu0 %vm1469_vm4, %v1381_v2  ;;  %v666_v2 = vmax.f32 %v7502_v53, 0.0  ;;  %v664_v53 = vmax.f32 %v7492_v46, 0.0  ;;  %v662_v46 = vmax.f32 %v7480_v40, 0.0  ;;  %v660_v40 = vmax.f32 %v7464_v29, 0.0 }
 0x2aa   :  { %v1412_v37 = vpop.f32.mrf.mxu1  ;;  %6173 = vmatprep.mubr.msk.f32.mxu0 %vm6732_vm3, %v6731_v48  ;;  %v658_v29 = vmax.f32 %v7454_v23, 0.0  ;;  %v656_v23 = vmax.f32 %v7444_v17, 0.0  ;;  %v654_v17 = vmax.f32 %v7426_v9, 0.0 }
 0x2ab   :  { %v701_v11 = vpack.c.bf16 %v666_v2, %v665_v4  ;;  %v699_v32 = vpack.c.bf16 %v662_v46, %v661_v50  ;;  %v677_v46 = vmax.f32 %v7584_v45, 0.0  ;;  %v674_v45 = vmax.f32 %v7550_v18, 0.0 }
 0x2ac   :  { %v1413_v38 = vpop.f32.mrf.mxu1  ;;  %v696_v4 = vpack.c.bf16 %v656_v23, %v655_v26  ;;  %v695_v14 = vpack.c.bf16 %v654_v17, %v653_v20  ;;  %v6620_v23 = vld [vmem:[%s8653_s2] ss:$8 sps:$4 sm:$0xff]   ;;  %v6621_v26 = vld [vmem:[%s8653_s2 + $0x14] ss:$8 sps:$4 sm:$0xff]   ;;  %v6623_v20 = vld [vmem:[%s8653_s2 + $0x24] ss:$8 sps:$4 sm:$0xff]  }
 0x2ad   :  { %6174 = vmatmul.mubr.msk.f32.gmra.mxu0 %vm1469_vm4, %v1386_v5  ;;  %v702_v5 = vpack.c.bf16 %v668_v58, %v667_v60  ;;  %v697_v60 = vpack.c.bf16 %v658_v29, %v657_v33 }
 0x2ae   :  { %v1415_v42 = vpop.f32.mrf.mxu1  ;;  %6176 = vmatprep.mubr.msk.f32.mxu0 %vm6732_vm3, %v6731_v48 }
 0x2b0   :  { %v7581_v44 = vpop.f32.mrf.mxu1 }
 0x2b1   :  { %6177 = vmatmul.mubr.msk.f32.gmra.mxu0 %vm1469_vm4, %v1389_v8 }
 0x2b2   :  { %v1420_v47 = vpop.f32.mrf.mxu1  ;;  %6179 = vmatprep.mubr.msk.f32.mxu0 %vm6732_vm3, %v6731_v48 }
 0x2b3   :  { %v698_v47 = vpack.c.bf16 %v660_v40, %v659_v43 }
 0x2b4   :  { %v7588_v49 = vpop.f32.mrf.mxu1 }
 0x2b5   :  { %6180 = vmatmul.mubr.msk.f32.gmra.mxu0 %vm1469_vm4, %v1394_v12 }
 0x2b6   :  { %v1423_v52 = vpop.f32.mrf.mxu1  ;;  %6182 = vmatprep.mubr.msk.f32.mxu0 %vm6732_vm3, %v6731_v48 }
 0x2b8   :  { %v7595_v54 = vpop.f32.mrf.mxu1 }
 0x2b9   :  { %6183 = vmatmul.mubr.msk.f32.gmra.mxu0 %vm1469_vm4, %v1397_v16 }
 0x2ba   :  { %v1428_v57 = vpop.f32.mrf.mxu1  ;;  %6185 = vmatprep.mubr.msk.f32.mxu0 %vm6732_vm3, %v6731_v48 }
 0x2bc   :  { %v7604_v61 = vpop.f32.mrf.mxu1 }
 0x2bd   :  { %v7606_v62 = vpop.f32.mrf.mxu0  ;;  %6186 = vmatmul.mubr.msk.f32.gmra.mxu0 %vm1469_vm4, %v1402_v21  ;;  %v700_v21 = vpack.c.bf16 %v664_v53, %v663_v56  ;;  %v679_v53 = vmax.f32 %v7598_v55, 0.0  ;;  %v676_v55 = vmax.f32 %v7563_v28, 0.0 }
 0x2be   :  { %v1431_v0 = vpop.f32.mrf.mxu1  ;;  %6192 = vmatprep.mubr.msk.f32.mxu0 %vm6732_vm3, %v6731_v48 }
 0x2bf   :  { %v6019_v1 = vpop.f32.mrf.mxu0 }
 0x2c0   :  { %v1434_v7 = vpop.f32.mrf.mxu1 }
 0x2c1   :  { %v7613_v59 = vpop.f32.mrf.mxu0  ;;  %6193 = vmatmul.mubr.msk.f32.vlgmr.msra.gmra.mxu0 %vm1469_vm4, %v1405_v27  ;;  %6218 = vmatmul.mubr.msk.f32.vlgmr.msra.gmra.mxu1 %vm1469_vm4, %v1434_v7 }
 0x2c2   :  { %2818 = vmatpush1.bf16.msra.mxu1 %v702_v5  ;;  %v1436_v63 = vpop.f32.mrf.mxu1  ;;  %6195 = vmatprep.mubr.msk.f32.mxu0 %vm6732_vm3, %v6731_v48 }
 0x2c3   :  { %v6022_v8 = vpop.f32.mrf.mxu0  ;;  %6220 = vmatprep.mubr.msk.f32.mxu1 %vm6732_vm3, %v6731_v48  ;;  %2819 = vmatprep.subr.bf16.mxu1 %v6730_v30 }
 0x2c4   :  { %v1437_v12 = vpop.f32.mrf.mxu1  ;;  %v6619_v8 = vld [vmem:[%s8653_s2 + $0x4] ss:$8 sps:$4 sm:$0xff]  }
 0x2c5   :  { %v7624_v15 = vpop.f32.mrf.mxu0  ;;  %6196 = vmatmul.mubr.msk.f32.gmra.mxu0 %vm1469_vm4, %v1410_v35  ;;  %6221 = vmatmul.mubr.msk.f32.gmra.mxu1 %vm1469_vm4, %v1437_v12 }
 0x2c6   :  { %2820 = vmatpush1.bf16.msra.mxu1 %v701_v11  ;;  %v1439_v16 = vpop.f32.mrf.mxu1  ;;  %6198 = vmatprep.mubr.msk.f32.mxu0 %vm6732_vm3, %v6731_v48 }
 0x2c7   :  { %v6025_v19 = vpop.f32.mrf.mxu0  ;;  %2821 = vmatprep.subr.bf16.mxu1 %v6730_v30  ;;  %6223 = vmatprep.mubr.msk.f32.mxu1 %vm6732_vm3, %v6731_v48 }
 0x2c8   :  { %v1442_v24 = vpop.f32.mrf.mxu1  ;;  %v678_v19 = vmax.f32 %v7577_v41, 0.0 }
 0x2c9   :  { %v7635_v25 = vpop.f32.mrf.mxu0  ;;  %6199 = vmatmul.mubr.msk.f32.gmra.mxu0 %vm1469_vm4, %v1413_v38  ;;  %6224 = vmatmul.mubr.msk.f32.gmra.mxu1 %vm1469_vm4, %v1442_v24 }
 0x2ca   :  { %2822 = vmatpush1.bf16.msra.mxu1 %v700_v21  ;;  %v1444_v27 = vpop.f32.mrf.mxu1  ;;  %6201 = vmatprep.mubr.msk.f32.mxu0 %vm6732_vm3, %v6731_v48 }
 0x2cb   :  { %v6028_v31 = vpop.f32.mrf.mxu0  ;;  %2823 = vmatprep.subr.bf16.mxu1 %v6730_v30  ;;  %6226 = vmatprep.mubr.msk.f32.mxu1 %vm6732_vm3, %v6731_v48  ;;  %v707_v27 = vpack.c.bf16 %v678_v19, %v677_v46  ;;  %v6625_v19 = vld [vmem:[%s8653_s2 + $0x34] ss:$8 sps:$4 sm:$0xff]  }
 0x2cc   :  { %v1445_v35 = vpop.f32.mrf.mxu1 }
 0x2cd   :  { %v7646_v37 = vpop.f32.mrf.mxu0  ;;  %6202 = vmatmul.mubr.msk.f32.gmra.mxu0 %vm1469_vm4, %v7581_v44  ;;  %6227 = vmatmul.mubr.msk.f32.gmra.mxu1 %vm1469_vm4, %v1445_v35 }
 0x2ce   :  { %2824 = vmatpush1.bf16.msra.mxu1 %v699_v32  ;;  %v1447_v38 = vpop.f32.mrf.mxu1  ;;  %6204 = vmatprep.mubr.msk.f32.mxu0 %vm6732_vm3, %v6731_v48 }
 0x2cf   :  { %v6031_v42 = vpop.f32.mrf.mxu0  ;;  %2825 = vmatprep.subr.bf16.mxu1 %v6730_v30  ;;  %6229 = vmatprep.mubr.msk.f32.mxu1 %vm6732_vm3, %v6731_v48 }
 0x2d0   :  { %v1450_v52 = vpop.f32.mrf.mxu1 }
 0x2d1   :  { %v7658_v44 = vpop.f32.mrf.mxu0  ;;  %6205 = vmatmul.mubr.msk.f32.gmra.mxu0 %vm1469_vm4, %v7588_v49  ;;  %6230 = vmatmul.mubr.msk.f32.gmra.mxu1 %vm1469_vm4, %v1450_v52 }
 0x2d2   :  { %2826 = vmatpush1.bf16.msra.mxu1 %v698_v47  ;;  %v1452_v57 = vpop.f32.mrf.mxu1  ;;  %6207 = vmatprep.mubr.msk.f32.mxu0 %vm6732_vm3, %v6731_v48 }
 0x2d3   :  { %v6034_v58 = vpop.f32.mrf.mxu0  ;;  %2827 = vmatprep.subr.bf16.mxu1 %v6730_v30  ;;  %6232 = vmatprep.mubr.msk.f32.mxu1 %vm6732_vm3, %v6731_v48 }
 0x2d4   :  { %v1453_v0 = vpop.f32.mrf.mxu1 }
 0x2d5   :  { %v7670_v49 = vpop.f32.mrf.mxu0  ;;  %6208 = vmatmul.mubr.msk.f32.gmra.mxu0 %vm1469_vm4, %v7595_v54  ;;  %6233 = vmatmul.mubr.msk.f32.gmra.mxu1 %vm1469_vm4, %v1453_v0 }
 0x2d6   :  { %2828 = vmatpush1.bf16.msra.mxu1 %v697_v60  ;;  %v1455_v1 = vpop.f32.mrf.mxu1  ;;  %6210 = vmatprep.mubr.msk.f32.mxu0 %vm6732_vm3, %v6731_v48 }
 0x2d7   :  { %v6037_v2 = vpop.f32.mrf.mxu0  ;;  %2829 = vmatprep.subr.bf16.mxu1 %v6730_v30  ;;  %6235 = vmatprep.mubr.msk.f32.mxu1 %vm6732_vm3, %v6731_v48  ;;  %v6622_v1 = vld [vmem:[%s8653_s2 + $0x10] ss:$8 sps:$4 sm:$0xff]  }
 0x2d8   :  { %v1458_v5 = vpop.f32.mrf.mxu1 }
 0x2d9   :  { %v1678_v54 = vpop.f32.mrf.mxu0  ;;  %6211 = vmatmul.mubr.msk.f32.gmra.mxu0 %vm1469_vm4, %v7604_v61  ;;  %6236 = vmatmul.mubr.msk.f32.gmra.mxu1 %vm1469_vm4, %v1458_v5  ;;  %v680_v61 = vmax.f32 %v7591_v51, 0.0 }
 0x2da   :  { %v1679_v7 = vadd.f32 %v1678_v54, %v7606_v62  ;;  %2830 = vmatpush1.bf16.msra.mxu1 %v696_v4  ;;  %v1460_v63 = vpop.f32.mrf.mxu1  ;;  %5526 = vmatprep.mubr.msk.bf16.mxu1 %vm1079_vm2, %v6619_v8  ;;  %v779_v4 = vld [vmem:[%s8656_s5 + $0x38] sm:$0xff]  ;;  %v778_v54 = vld [vmem:[%s8656_s5 + $0x30] sm:$0xff]  ;;  %v776_v8 = vld [vmem:[%s8656_s5 + $0x20] sm:$0xff] }
 0x2db   :  { %v6044_v9 = vpop.f32.mrf.mxu0  ;;  %2831 = vmatprep.subr.bf16.mxu1 %v6730_v30  ;;  %2736 = vmatprep.mubr.f32.mxu0 %v6731_v48  ;;  %v708_v50 = vpack.c.bf16 %v680_v61, %v679_v53  ;;  %v774_v53 = vld [vmem:[%s8656_s5 + $0x10] sm:$0xff] }
 0x2dc   :  { %v1461_v56 = vpop.f32.mrf.mxu1  ;;  %2696 = vmatprep.subr.mxu0 %v779_v4  ;;  %v6636_v4 = vld [vmem:[%s8653_s2 + $0x80] ss:$8 sps:$4 sm:$0xff]  }
 0x2dd   :  { %v1683_v62 = vpop.f32.mrf.mxu0  ;;  %2697 = vmatpush1.msra.mxu0 %v778_v54  ;;  %v773_v56 = vld [vmem:[%s8656_s5 + $0x8] sm:$0xff]  ;;  %v6637_v54 = vld [vmem:[%s8653_s2 + $0x94] ss:$8 sps:$4 sm:$0xff]  }
 0x2de   :  { %v1684_v11 = vadd.f32 %v1683_v62, %v7613_v59  ;;  %2832 = vmatpush1.bf16.msra.mxu1 %v695_v14  ;;  %v1462_v12 = vpop.f32.mrf.mxu1  ;;  %v675_v59 = vmax.f32 %v7572_v36, 0.0  ;;  %v672_v36 = vmax.f32 %v7540_v10, 0.0  ;;  %v775_v14 = vld [vmem:[%s8656_s5 + $0x18] sm:$0xff]  ;;  %v6624_v62 = vld [vmem:[%s8653_s2 + $0x20] ss:$8 sps:$4 sm:$0xff]  }
 0x2df   :  { %v6047_v16 = vpop.f32.mrf.mxu0  ;;  %2837 = vmatprep.subr.bf16.mxu1 %v6730_v30  ;;  %v772_v12 = vld [vmem:[%s8656_s5] sm:$0xff] }
 0x2e0   :  { %v706_v43 = vpack.c.bf16 %v676_v55, %v675_v59 }
 0x2e1   :  { %v1688_v21 = vpop.f32.mrf.mxu0 }
 0x2e2   :  { %v1689_v24 = vadd.f32 %v1688_v21, %v7624_v15  ;;  %2838 = vmatpush2.bf16.msra.mxu1 %v708_v50  ;;  %v673_v15 = vmax.f32 %v7555_v22, 0.0  ;;  %v670_v22 = vmax.f32 %v7529_v3, 0.0 }
 0x2e3   :  { %v6050_v51 = vpop.f32.mrf.mxu0  ;;  %2839 = vmatprep.subr.bf16.mxu1 %v6730_v30 }
 0x2e4   :  { %v705_v38 = vpack.c.bf16 %v674_v45, %v673_v15  ;;  %v6626_v51 = vld [vmem:[%s8653_s2 + $0x30] ss:$8 sps:$4 sm:$0xff]   ;;  %v6628_v15 = vld [vmem:[%s8653_s2 + $0x40] ss:$8 sps:$4 sm:$0xff]  }
 0x2e5   :  { %v1693_v31 = vpop.f32.mrf.mxu0 }
 0x2e6   :  { %v1694_v40 = vadd.f32 %v1693_v31, %v7635_v25  ;;  %2840 = vmatpush2.bf16.msra.mxu1 %v707_v27  ;;  %v671_v25 = vmax.f32 %v7545_v13, 0.0  ;;  %v6627_v27 = vld [vmem:[%s8653_s2 + $0x44] ss:$8 sps:$4 sm:$0xff]  }
 0x2e7   :  { %v6053_v41 = vpop.f32.mrf.mxu0  ;;  %2841 = vmatprep.subr.bf16.mxu1 %v6730_v30 }
 0x2e8   :  { %v704_v33 = vpack.c.bf16 %v672_v36, %v671_v25 }
 0x2e9   :  { %v1698_v32 = vpop.f32.mrf.mxu0 }
 0x2ea   :  { %v1699_v35 = vadd.f32 %v1698_v32, %v7646_v37  ;;  %2842 = vmatpush2.bf16.msra.mxu1 %v706_v43  ;;  %v669_v37 = vmax.f32 %v7535_v6, 0.0 }
 0x2eb   :  { %v6056_v28 = vpop.f32.mrf.mxu0  ;;  %2843 = vmatprep.subr.bf16.mxu1 %v6730_v30 }
 0x2ec   :  { %v703_v13 = vpack.c.bf16 %v670_v22, %v669_v37  ;;  %v6631_v22 = vld [vmem:[%s8653_s2 + $0x64] ss:$8 sps:$4 sm:$0xff]  }
 0x2ed   :  { %v1703_v42 = vpop.f32.mrf.mxu0 }
 0x2ee   :  { %v1704_v29 = vadd.f32 %v1703_v42, %v7658_v44  ;;  %2844 = vmatpush2.bf16.msra.mxu1 %v705_v38  ;;  %v6630_v42 = vld [vmem:[%s8653_s2 + $0x50] ss:$8 sps:$4 sm:$0xff]  }
 0x2ef   :  { %v6059_v18 = vpop.f32.mrf.mxu0  ;;  %2845 = vmatprep.subr.bf16.mxu1 %v6730_v30 }
 0x2f1   :  { %v1708_v47 = vpop.f32.mrf.mxu0 }
 0x2f2   :  { %v1709_v52 = vadd.f32 %v1708_v47, %v7670_v49  ;;  %2846 = vmatpush2.bf16.msra.mxu1 %v704_v33 }
 0x2f3   :  { %v6062_v10 = vpop.f32.mrf.mxu0  ;;  %2847 = vmatprep.subr.bf16.mxu1 %v6730_v30 }
 0x2f4   :  { %v6632_v10 = vld [vmem:[%s8653_s2 + $0x60] ss:$8 sps:$4 sm:$0xff]  }
 0x2f5   :  { %v1802_v57 = vpop.f32.mrf.mxu0 }
 0x2f6   :  { %v1836_v58 = vadd.f32 %v1802_v57, %v1679_v7  ;;  %2848 = vmatpush2.bf16.msra.mxu1 %v703_v13  ;;  %v777_v7 = vld [vmem:[%s8656_s5 + $0x28] sm:$0xff] }
 0x2f7   :  { %v6069_v44 = vpop.f32.mrf.mxu0  ;;  %2698 = vmatprep.subr.mxu0 %v777_v7 }
 0x2f8   :  { %2699 = vmatpush1.msra.mxu0 %v776_v8 }
 0x2f9   :  { %2850 = vmatmul.mubr.bf16.vlgmr.msra.gmra.mxu1 %v6620_v23  ;;  %v1807_v3 = vpop.f32.mrf.mxu0  ;;  %2700 = vmatprep.subr.mxu0 %v775_v14 }
 0x2fa   :  { %v1837_v6 = vadd.f32 %v1807_v3, %v1684_v11  ;;  %5527 = vmatprep.mubr.msk.bf16.mxu1 %vm1079_vm2, %v6621_v26  ;;  %2701 = vmatpush1.msra.mxu0 %v774_v53 }
 0x2fb   :  { %v6072_v60 = vpop.f32.mrf.mxu0  ;;  %2702 = vmatprep.subr.mxu0 %v773_v56  ;;  %v6639_v56 = vld [vmem:[%s8653_s2 + $0xa4] ss:$8 sps:$4 sm:$0xff]  }
 0x2fc   :  { %2703 = vmatpush1.msra.mxu0 %v772_v12  ;;  %v6634_v60 = vld [vmem:[%s8653_s2 + $0x70] ss:$8 sps:$4 sm:$0xff]  }
 0x2fd   :  { %v1812_v30 = vpop.f32.mrf.mxu0  ;;  %6238 = vmatprep.subr.mxu0 %v6731_v48 }
 0x2fe   :  { %v1838_v0 = vadd.f32 %v1812_v30, %v1689_v24 }
 0x2ff   :  { %v6075_v49 = vpop.f32.mrf.mxu0 }
 0x301   :  { %2858 = vmatmul.mubr.bf16.gmra.mxu1 %v6622_v1  ;;  %v1817_v2 = vpop.f32.mrf.mxu0 }
 0x302   :  { %v1839_v17 = vadd.f32 %v1817_v2, %v1694_v40  ;;  %5528 = vmatprep.mubr.msk.bf16.mxu1 %vm1079_vm2, %v6623_v20 }
 0x303   :  { %v6078_v5 = vpop.f32.mrf.mxu0 }
 0x305   :  { %v1822_v63 = vpop.f32.mrf.mxu0 }
 0x306   :  { %v1840_v9 = vadd.f32 %v1822_v63, %v1699_v35  ;;  %v6629_v35 = vld [vmem:[%s8653_s2 + $0x54] ss:$8 sps:$4 sm:$0xff]  }
 0x307   :  { %v6081_v61 = vpop.f32.mrf.mxu0 }
 0x308   :  { %v6638_v61 = vld [vmem:[%s8653_s2 + $0x90] ss:$8 sps:$4 sm:$0xff]  }
 0x309   :  { %2866 = vmatmul.mubr.bf16.gmra.mxu1 %v6624_v62  ;;  %v1827_v11 = vpop.f32.mrf.mxu0 }
 0x30a   :  { %v1841_v16 = vadd.f32 %v1827_v11, %v1704_v29  ;;  %5529 = vmatprep.mubr.msk.bf16.mxu1 %vm1079_vm2, %v6625_v19 }
 0x30b   :  { %v6084_v46 = vpop.f32.mrf.mxu0 }
 0x30c   :  { %v6640_v46 = vld [vmem:[%s8653_s2 + $0xa0] ss:$8 sps:$4 sm:$0xff]  }
 0x30d   :  { %v1832_v50 = vpop.f32.mrf.mxu0 }
 0x30e   :  { %v1842_v21 = vadd.f32 %v1832_v50, %v1709_v52  ;;  %v6641_v50 = vld [vmem:[%s8653_s2 + $0xb4] ss:$8 sps:$4 sm:$0xff]  }
 0x30f   :  { %v6087_v24 = vpop.f32.mrf.mxu0 }
 0x311   :  { %2874 = vmatmul.mubr.bf16.gmra.mxu1 %v6626_v51  ;;  %v1933_v55 = vpop.f32.mrf.mxu0 }
 0x312   :  { %v1967_v59 = vadd.f32 %v1933_v55, %v1836_v58  ;;  %5530 = vmatprep.mubr.msk.bf16.mxu1 %vm1079_vm2, %v6627_v27  ;;  %v6633_v58 = vld [vmem:[%s8653_s2 + $0x74] ss:$8 sps:$4 sm:$0xff]   ;;  %v6643_v27 = vld [vmem:[%s8653_s2 + $0xc4] ss:$8 sps:$4 sm:$0xff]  }
 0x313   :  { %v6094_v31 = vpop.f32.mrf.mxu0 }
 0x315   :  { %v1938_v40 = vpop.f32.mrf.mxu0 }
 0x316   :  { %v1968_v41 = vadd.f32 %v1938_v40, %v1837_v6 }
 0x317   :  { %v6097_v45 = vpop.f32.mrf.mxu0 }
 0x319   :  { %2882 = vmatmul.mubr.bf16.gmra.mxu1 %v6628_v15  ;;  %v1943_v43 = vpop.f32.mrf.mxu0  ;;  %v6644_v15 = vld [vmem:[%s8653_s2 + $0xc0] ss:$8 sps:$4 sm:$0xff]  }
 0x31a   :  { %v1969_v32 = vadd.f32 %v1943_v43, %v1838_v0  ;;  %5531 = vmatprep.mubr.msk.bf16.mxu1 %vm1079_vm2, %v6629_v35  ;;  %v6635_v0 = vld [vmem:[%s8653_s2 + $0x84] ss:$8 sps:$4 sm:$0xff]   ;;  %v6645_v43 = vld [vmem:[%s8653_s2 + $0xd4] ss:$8 sps:$4 sm:$0xff]  }
 0x31b   :  { %v6100_v28 = vpop.f32.mrf.mxu0 }
 0x31d   :  { %v1948_v36 = vpop.f32.mrf.mxu0 }
 0x31e   :  { %v1970_v25 = vadd.f32 %v1948_v36, %v1839_v17 }
 0x31f   :  { %v6103_v38 = vpop.f32.mrf.mxu0 }
 0x320   :  { %v6647_v38 = vld [vmem:[%s8653_s2 + $0xe4] ss:$8 sps:$4 sm:$0xff]  }
 0x321   :  { %2890 = vmatmul.mubr.bf16.gmra.mxu1 %v6630_v42  ;;  %v1953_v29 = vpop.f32.mrf.mxu0 }
 0x322   :  { %v1971_v18 = vadd.f32 %v1953_v29, %v1840_v9  ;;  %5532 = vmatprep.mubr.msk.bf16.mxu1 %vm1079_vm2, %v6631_v22 }
 0x323   :  { %v6106_v37 = vpop.f32.mrf.mxu0 }
 0x324   :  { %v6648_v37 = vld [vmem:[%s8653_s2 + $0xe0] ss:$8 sps:$4 sm:$0xff]  }
 0x325   :  { %v1958_v33 = vpop.f32.mrf.mxu0 }
 0x326   :  { %v1972_v47 = vadd.f32 %v1958_v33, %v1841_v16  ;;  %v6649_v33 = vld [vmem:[%s8653_s2 + $0xf4] ss:$8 sps:$4 sm:$0xff]  }
 0x327   :  { %v6109_v52 = vpop.f32.mrf.mxu0 }
 0x329   :  { %2898 = vmatmul.mubr.bf16.gmra.mxu1 %v6632_v10  ;;  %v1963_v13 = vpop.f32.mrf.mxu0 }
 0x32a   :  { %v1973_v57 = vadd.f32 %v1963_v13, %v1842_v21  ;;  %5533 = vmatprep.mubr.msk.bf16.mxu1 %vm1079_vm2, %v6633_v58  ;;  %v6651_v58 = vld [vmem:[%s8653_s2 + $0x104] ss:$8 sps:$4 sm:$0xff]  }
 0x32b   :  { %v6112_v44 = vpop.f32.mrf.mxu0 }
 0x32d   :  { %v2064_v23 = vpop.f32.mrf.mxu0 }
 0x32e   :  { %v7790_v3 = vadd.f32 %v2064_v23, %v1967_v59  ;;  %v6642_v59 = vld [vmem:[%s8653_s2 + $0xb0] ss:$8 sps:$4 sm:$0xff]  }
 0x32f   :  { %v6119_v6 = vpop.f32.mrf.mxu0 }
 0x331   :  { %v2069_v26 = vpop.f32.mrf.mxu0  ;;  %2906 = vmatmul.mubr.bf16.gmra.mxu1 %v6634_v60  ;;  %v6652_v60 = vld [vmem:[%s8653_s2 + $0x100] ss:$8 sps:$4 sm:$0xff]  }
 0x332   :  { %v7795_v30 = vadd.f32 %v2069_v26, %v1968_v41  ;;  %5534 = vmatprep.mubr.msk.bf16.mxu1 %vm1079_vm2, %v6635_v0  ;;  %v6653_v0 = vld [vmem:[%s8653_s2 + $0x114] ss:$8 sps:$4 sm:$0xff]  }
 0x333   :  { %v6122_v49 = vpop.f32.mrf.mxu0 }
 0x335   :  { %v2074_v1 = vpop.f32.mrf.mxu0 }
 0x336   :  { %v7801_v2 = vadd.f32 %v2074_v1, %v1969_v32 }
 0x337   :  { %v6125_v17 = vpop.f32.mrf.mxu0 }
 0x339   :  { %v2079_v20 = vpop.f32.mrf.mxu0  ;;  %2914 = vmatmul.mubr.bf16.gmra.mxu1 %v6636_v4 }
 0x33a   :  { %v7806_v5 = vadd.f32 %v2079_v20, %v1970_v25  ;;  %5535 = vmatprep.mubr.msk.bf16.mxu1 %vm1079_vm2, %v6637_v54  ;;  %v6646_v25 = vld [vmem:[%s8653_s2 + $0xd0] ss:$8 sps:$4 sm:$0xff]  }
 0x33b   :  { %v6128_v7 = vpop.f32.mrf.mxu0 }
 0x33d   :  { %v2084_v63 = vpop.f32.mrf.mxu0 }
 0x33e   :  { %v7812_v8 = vadd.f32 %v2084_v63, %v1971_v18  ;;  %v6654_v63 = vld [vmem:[%s8653_s2 + $0x110] ss:$8 sps:$4 sm:$0xff]  }
 0x33f   :  { %v6131_v9 = vpop.f32.mrf.mxu0 }
 0x341   :  { %v2089_v14 = vpop.f32.mrf.mxu0  ;;  %2922 = vmatmul.mubr.bf16.gmra.mxu1 %v6638_v61  ;;  %v6655_v61 = vld [vmem:[%s8653_s2 + $0x124] ss:$8 sps:$4 sm:$0xff]  }
 0x342   :  { %v7817_v53 = vadd.f32 %v2089_v14, %v1972_v47  ;;  %5536 = vmatprep.mubr.msk.bf16.mxu1 %vm1079_vm2, %v6639_v56 }
 0x343   :  { %v6134_v62 = vpop.f32.mrf.mxu0 }
 0x345   :  { %v2094_v11 = vpop.f32.mrf.mxu0 }
 0x346   :  { %v7823_v12 = vadd.f32 %v2094_v11, %v1973_v57  ;;  %v6650_v57 = vld [vmem:[%s8653_s2 + $0xf0] ss:$8 sps:$4 sm:$0xff]  }
 0x347   :  { %v6137_v16 = vpop.f32.mrf.mxu0 }
 0x349   :  { %v2195_v19 = vpop.f32.mrf.mxu0  ;;  %2930 = vmatmul.mubr.bf16.gmra.mxu1 %v6640_v46 }
 0x34a   :  { %5537 = vmatprep.mubr.msk.bf16.mxu1 %vm1079_vm2, %v6641_v50  ;;  %v2229_v17 = vadd.f32 %v2195_v19, %v7790_v3  ;;  %v7902_v3 = vld [vmem:[%s8655_s4] ss:$0 sm:$0xff] }
 0x34b   :  { %v6144_v21 = vpop.f32.mrf.mxu0 }
 0x34d   :  { %v2200_v24 = vpop.f32.mrf.mxu0 }
 0x34e   :  { %v2230_v9 = vadd.f32 %v2200_v24, %v7795_v30 }
 0x34f   :  { %v6147_v51 = vpop.f32.mrf.mxu0 }
 0x351   :  { %v7832_v55 = vpop.f32.mrf.mxu0  ;;  %2938 = vmatmul.mubr.bf16.gmra.mxu1 %v6642_v59 }
 0x352   :  { %5538 = vmatprep.mubr.msk.bf16.mxu1 %vm1079_vm2, %v6643_v27  ;;  %v2231_v30 = vadd.f32 %v7832_v55, %v7801_v2 }
 0x353   :  { %v6150_v31 = vpop.f32.mrf.mxu0 }
 0x355   :  { %v7841_v40 = vpop.f32.mrf.mxu0 }
 0x357   :  { %v6153_v41 = vpop.f32.mrf.mxu0 }
 0x359   :  { %v7843_v45 = vpop.f32.mrf.mxu0  ;;  %2946 = vmatmul.mubr.bf16.gmra.mxu1 %v6644_v15 }
 0x35a   :  { %5539 = vmatprep.mubr.msk.bf16.mxu1 %vm1079_vm2, %v6645_v43  ;;  %v6656_v43 = vld [vmem:[%s8653_s2 + $0x120] ss:$8 sps:$4 sm:$0xff]  }
 0x35b   :  { %v6156_v32 = vpop.f32.mrf.mxu0 }
 0x35c   :  { %v2232_v32 = vadd.f32 %v7841_v40, %v7806_v5 }
 0x35d   :  { %v7852_v35 = vpop.f32.mrf.mxu0 }
 0x35f   :  { %v6159_v28 = vpop.f32.mrf.mxu0 }
 0x360   :  { %v6657_v28 = vld [vmem:[%s8653_s2 + $0x134] ss:$8 sps:$4 sm:$0xff]  }
 0x361   :  { %v7854_v36 = vpop.f32.mrf.mxu0  ;;  %2954 = vmatmul.mubr.bf16.gmra.mxu1 %v6646_v25 }
 0x362   :  { %5540 = vmatprep.mubr.msk.bf16.mxu1 %vm1079_vm2, %v6647_v38 }
 0x363   :  { %v6162_v42 = vpop.f32.mrf.mxu0 }
 0x364   :  { %v6658_v42 = vld [vmem:[%s8654_s3 + $0x18] sm:$0xff] }
 0x365   :  { %v2326_v29 = vpop.f32.mrf.mxu0 }
 0x366   :  { %v2360_v4 = vadd.f32 %v2326_v29, %v2229_v17 }
 0x367   :  { %v6169_v18 = vpop.f32.mrf.mxu0 }
 0x369   :  { %v2331_v22 = vpop.f32.mrf.mxu0  ;;  %2962 = vmatmul.mubr.bf16.gmra.mxu1 %v6648_v37  ;;  %v6659_v37 = vld [vmem:[%s8654_s3 + $0x10] sm:$0xff] }
 0x36a   :  { %5541 = vmatprep.mubr.msk.bf16.mxu1 %vm1079_vm2, %v6649_v33  ;;  %v2361_v11 = vadd.f32 %v2331_v22, %v2230_v9  ;;  %v2233_v33 = vadd.f32 %v7843_v45, %v7812_v8  ;;  %v6660_v8 = vld [vmem:[%s8653_s2 + $0x130] ss:$8 sps:$4 sm:$0xff]   ;;  %v2234_v45 = vadd.f32 %v7852_v35, %v7817_v53 }
 0x36b   :  { %v6172_v47 = vpop.f32.mrf.mxu0 }
 0x36d   :  { %v2336_v52 = vpop.f32.mrf.mxu0 }
 0x36e   :  { %v2362_v59 = vadd.f32 %v2336_v52, %v2231_v30  ;;  %v6663_v30 = vld [vmem:[%s8653_s2 + $0x154] ss:$8 sps:$4 sm:$0xff]  }
 0x36f   :  { %v6175_v10 = vpop.f32.mrf.mxu0 }
 0x371   :  { %v2341_v13 = vpop.f32.mrf.mxu0  ;;  %2970 = vmatmul.mubr.bf16.gmra.mxu1 %v6650_v57 }
 0x372   :  { %5542 = vmatprep.mubr.msk.bf16.mxu1 %vm1079_vm2, %v6651_v58  ;;  %v2363_v5 = vadd.f32 %v2341_v13, %v2232_v32 }
 0x373   :  { %v6178_v44 = vpop.f32.mrf.mxu0 }
 0x375   :  { %v7877_v23 = vpop.f32.mrf.mxu0 }
 0x376   :  { %v2364_v57 = vadd.f32 %v7877_v23, %v2233_v33  ;;  %v6661_v23 = vld [vmem:[%s8653_s2 + $0x144] ss:$8 sps:$4 sm:$0xff]   ;;  %v6674_v33 = vld [vmem:[%s8653_s2 + $0x1a0] ss:$8 sps:$4 sm:$0xff]  }
 0x377   :  { %v6181_v6 = vpop.f32.mrf.mxu0 }
 0x379   :  { %v7879_v26 = vpop.f32.mrf.mxu0  ;;  %2978 = vmatmul.mubr.bf16.gmra.mxu1 %v6652_v60 }
 0x37a   :  { %5543 = vmatprep.mubr.msk.bf16.mxu1 %vm1079_vm2, %v6653_v0 }
 0x37b   :  { %v6184_v49 = vpop.f32.mrf.mxu0 }
 0x37d   :  { %v7888_v1 = vpop.f32.mrf.mxu0 }
 0x37f   :  { %v6187_v20 = vpop.f32.mrf.mxu0 }
 0x381   :  { %v2457_v54 = vpop.f32.mrf.mxu0  ;;  %v2588_v7 = vpop.f32.mrf.mxu1  ;;  %2986 = vmatmul.mubr.bf16.gmra.mxu1 %v6654_v63  ;;  %v2235_v63 = vadd.f32 %v7854_v36, %v7823_v12 }
 0x382   :  { %v2491_v14 = vadd.f32 %v2457_v54, %v2360_v4  ;;  %5544 = vmatprep.mubr.msk.bf16.mxu1 %vm1079_vm2, %v6655_v61  ;;  %v2365_v4 = vadd.f32 %v7879_v26, %v2234_v45 }
 0x383   :  { %v6194_v56 = vpop.f32.mrf.mxu0  ;;  %v6219_v62 = vpop.f32.mrf.mxu1 }
 0x384   :  { %v2622_v16 = vadd.f32 %v2588_v7, %v2491_v14  ;;  %v2366_v62 = vadd.f32 %v7888_v1, %v2235_v63 }
 0x385   :  { %v2462_v19 = vpop.f32.mrf.mxu0  ;;  %v2593_v46 = vpop.f32.mrf.mxu1 }
 0x386   :  { %v2636_v50 = vadd.f32 %v7902_v3, %v2622_v16  ;;  %v2492_v21 = vadd.f32 %v2462_v19, %v2361_v11 }
 0x387   :  { %v6197_v24 = vpop.f32.mrf.mxu0  ;;  %v6222_v51 = vpop.f32.mrf.mxu1 }
 0x388   :  { %v2643_v27 = vmax.f32 %v2636_v50, 0.0  ;;  %v2623_v31 = vadd.f32 %v2593_v46, %v2492_v21  ;;  %v6662_v46 = vld [vmem:[%s8653_s2 + $0x140] ss:$8 sps:$4 sm:$0xff]  }
 0x389   :  { %v2467_v41 = vpop.f32.mrf.mxu0  ;;  %v2598_v15 = vpop.f32.mrf.mxu1  ;;  %2994 = vmatmul.mubr.bf16.gmra.mxu1 %v6656_v43  ;;  %v6669_v43 = vld [vmem:[%s8653_s2 + $0x184] ss:$8 sps:$4 sm:$0xff]  }
 0x38a   :  { %v2637_v2 = vadd.f32 %v7902_v3, %v2623_v31  ;;  %v2493_v55 = vadd.f32 %v2467_v41, %v2362_v59  ;;  %5519 = vmatmul.mubr.msk.f32.vlgmr.msra.gmra.mxu0 %vm2650_vm5, %v2643_v27  ;;  %5545 = vmatprep.mubr.msk.bf16.mxu1 %vm1079_vm2, %v6657_v28  ;;  %v6664_v27 = vld [vmem:[%s8653_s2 + $0x150] ss:$8 sps:$4 sm:$0xff]   ;;  %v6665_v31 = vld [vmem:[%s8653_s2 + $0x164] ss:$8 sps:$4 sm:$0xff]   ;;  %v6667_v41 = vld [vmem:[%s8653_s2 + $0x174] ss:$8 sps:$4 sm:$0xff]  }
 0x38b   :  { %v6200_v25 = vpop.f32.mrf.mxu0  ;;  %v6225_v38 = vpop.f32.mrf.mxu1  ;;  %2742 = vmatprep.mubr.f32.mxu0 %v6731_v48  ;;  %6239 = vmatpush3.msra.mxu0 %v6658_v42 }
 0x38c   :  { %v2644_v40 = vmax.f32 %v2637_v2, 0.0  ;;  %v2624_v29 = vadd.f32 %v2598_v15, %v2493_v55  ;;  %6240 = vmatprep.subr.mxu0 %v6731_v48  ;;  %v6668_v15 = vld [vmem:[%s8653_s2 + $0x170] ss:$8 sps:$4 sm:$0xff]   ;;  %v6670_v2 = vld [vmem:[%s8653_s2 + $0x180] ss:$8 sps:$4 sm:$0xff]  }
 0x38d   :  { %v2472_v18 = vpop.f32.mrf.mxu0  ;;  %v2603_v22 = vpop.f32.mrf.mxu1  ;;  %6241 = vmatpush3.msra.mxu0 %v6659_v37  ;;  %v6671_v55 = vld [vmem:[%s8653_s2 + $0x194] ss:$8 sps:$4 sm:$0xff]  }
 0x38e   :  { %v2638_v47 = vadd.f32 %v7902_v3, %v2624_v29  ;;  %v2494_v52 = vadd.f32 %v2472_v18, %v2363_v5  ;;  %5520 = vmatmul.mubr.msk.f32.gmra.mxu0 %vm2650_vm5, %v2644_v40  ;;  %6263 = vmatprep.subr.mxu0 %v6731_v48  ;;  %v6672_v5 = vld [vmem:[%s8653_s2 + $0x190] ss:$8 sps:$4 sm:$0xff]   ;;  %v6673_v40 = vld [vmem:[%s8653_s2 + $0x1a4] ss:$8 sps:$4 sm:$0xff]  }
 0x38f   :  { %v6203_v10 = vpop.f32.mrf.mxu0  ;;  %v6228_v13 = vpop.f32.mrf.mxu1  ;;  %2748 = vmatprep.mubr.f32.mxu0 %v6731_v48 }
 0x390   :  { %v2645_v58 = vmax.f32 %v2638_v47, 0.0  ;;  %v2625_v44 = vadd.f32 %v2603_v22, %v2494_v52  ;;  %v6675_v47 = vld [vmem:[%s8653_s2 + $0x1b4] ss:$8 sps:$4 sm:$0xff]  }
 0x391   :  { %v2477_v6 = vpop.f32.mrf.mxu0  ;;  %v2608_v60 = vpop.f32.mrf.mxu1  ;;  %3002 = vmatmul.mubr.bf16.gmra.mxu1 %v6660_v8  ;;  %v6678_v8 = vld [vmem:[%s8654_s3 + $0x8] sm:$0xff] }
 0x392   :  { %v2639_v0 = vadd.f32 %v7902_v3, %v2625_v44  ;;  %v2495_v49 = vadd.f32 %v2477_v6, %v2364_v57  ;;  %5521 = vmatmul.mubr.msk.f32.gmra.mxu0 %vm2650_vm5, %v2645_v58  ;;  %5546 = vmatprep.mubr.msk.bf16.mxu1 %vm1079_vm2, %v6661_v23  ;;  %v6676_v58 = vld [vmem:[%s8653_s2 + $0x1b0] ss:$8 sps:$4 sm:$0xff]   ;;  %v6677_v44 = vld [vmem:[%s8653_s2 + $0x1c4] ss:$8 sps:$4 sm:$0xff]   ;;  %v6680_v23 = vld [vmem:[%s8653_s2 + $0x1c0] ss:$8 sps:$4 sm:$0xff]  }
 0x393   :  { %v6206_v17 = vpop.f32.mrf.mxu0  ;;  %v6231_v20 = vpop.f32.mrf.mxu1  ;;  %2754 = vmatprep.mubr.f32.mxu0 %v6731_v48 }
 0x394   :  { %v2646_v54 = vmax.f32 %v2639_v0, 0.0  ;;  %v2626_v7 = vadd.f32 %v2608_v60, %v2495_v49  ;;  %v6679_v49 = vld [vmem:[%s8654_s3] sm:$0xff]  ;;  %v6681_v20 = vld [vmem:[%s8653_s2 + $0x1d4] ss:$8 sps:$4 sm:$0xff]  }
 0x395   :  { %v2482_v53 = vpop.f32.mrf.mxu0  ;;  %v2613_v35 = vpop.f32.mrf.mxu1 }
 0x396   :  { %v2640_v9 = vadd.f32 %v7902_v3, %v2626_v7  ;;  %v2496_v14 = vadd.f32 %v2482_v53, %v2365_v4  ;;  %5522 = vmatmul.mubr.msk.f32.gmra.mxu0 %vm2650_vm5, %v2646_v54  ;;  %v6682_v53 = vld [vmem:[%s8653_s2 + $0x1d0] ss:$8 sps:$4 sm:$0xff]  }
 0x397   :  { %v6209_v61 = vpop.f32.mrf.mxu0  ;;  %v6234_v56 = vpop.f32.mrf.mxu1  ;;  %2760 = vmatprep.mubr.f32.mxu0 %v6731_v48 }
 0x398   :  { %v2647_v11 = vmax.f32 %v2640_v9, 0.0  ;;  %v2627_v26 = vadd.f32 %v2613_v35, %v2496_v14  ;;  %v6683_v35 = vld [vmem:[%s8653_s2 + $0x1e4] ss:$8 sps:$4 sm:$0xff]   ;;  %v6684_v56 = vld [vmem:[%s8653_s2 + $0x1e0] ss:$8 sps:$4 sm:$0xff]  }
 0x399   :  { %v2487_v16 = vpop.f32.mrf.mxu0  ;;  %v2618_v19 = vpop.f32.mrf.mxu1  ;;  %3010 = vmatmul.mubr.bf16.gmra.mxu1 %v6662_v46  ;;  %v6686_v46 = vld [vmem:[%s8654_s3 + $0x20] sm:$0xff] }
 0x39a   :  { %v2641_v12 = vadd.f32 %v7902_v3, %v2627_v26  ;;  %v2497_v36 = vadd.f32 %v2487_v16, %v2366_v62  ;;  %5523 = vmatmul.mubr.msk.f32.gmra.mxu0 %vm2650_vm5, %v2647_v11  ;;  %5547 = vmatprep.mubr.msk.bf16.mxu1 %vm1079_vm2, %v6663_v30 }
 0x39b   :  { %v6212_v1 = vpop.f32.mrf.mxu0  ;;  %2766 = vmatprep.mubr.f32.mxu0 %v6731_v48  ;;  %v6237_v50 = vpop.f32.mrf.mxu1 }
 0x39c   :  { %v2648_v21 = vmax.f32 %v2641_v12, 0.0  ;;  %v2628_v24 = vadd.f32 %v2618_v19, %v2497_v36 }
 0x39e   :  { %v2642_v51 = vadd.f32 %v7902_v3, %v2628_v24  ;;  %5524 = vmatmul.mubr.msk.f32.gmra.mxu0 %vm2650_vm5, %v2648_v21  ;;  %v6666_v3 = vld [vmem:[%s8653_s2 + $0x160] ss:$8 sps:$4 sm:$0xff]  }
 0x39f   :  { %2772 = vmatprep.mubr.f32.mxu0 %v6731_v48 }
 0x3a0   :  { %v2649_v59 = vmax.f32 %v2642_v51, 0.0 }
 0x3a1   :  { %3018 = vmatmul.mubr.bf16.gmra.mxu1 %v6664_v27 }
 0x3a2   :  { %5525 = vmatmul.mubr.msk.f32.gmra.mxu0 %vm2650_vm5, %v2649_v59  ;;  %5548 = vmatprep.mubr.msk.bf16.mxu1 %vm1079_vm2, %v6665_v31 }
 0x3a3   :  { %6242 = vmatprep.mubr.msk.f32.mxu0 %vm6732_vm3, %v6731_v48 }
 0x3a9   :  { %3026 = vmatmul.mubr.bf16.gmra.mxu1 %v6666_v3 }
 0x3aa   :  { %5549 = vmatprep.mubr.msk.bf16.mxu1 %vm1079_vm2, %v6667_v41  ;;  %v6687_v41 = vld [vmem:[%s8654_s3 + $0x38] sm:$0xff] }
 0x3b1   :  { %3034 = vmatmul.mubr.bf16.gmra.mxu1 %v6668_v15 }
 0x3b2   :  { %5550 = vmatprep.mubr.msk.bf16.mxu1 %vm1079_vm2, %v6669_v43  ;;  %v6688_v43 = vld [vmem:[%s8654_s3 + $0x30] sm:$0xff] }
 0x3b9   :  { %v7989_v32 = vpop.f32.mrf.mxu1  ;;  %3042 = vmatmul.mubr.bf16.gmra.mxu1 %v6670_v2 }
 0x3ba   :  { %5551 = vmatprep.mubr.msk.bf16.mxu1 %vm1079_vm2, %v6671_v55 }
 0x3bb   :  { %v2853_v28 = vpop.f32.mrf.mxu1 }
 0x3bd   :  { %v7998_v25 = vpop.f32.mrf.mxu1 }
 0x3bf   :  { %v2856_v38 = vpop.f32.mrf.mxu1 }
 0x3c1   :  { %v8000_v42 = vpop.f32.mrf.mxu1  ;;  %3050 = vmatmul.mubr.bf16.gmra.mxu1 %v6672_v5 }
 0x3c2   :  { %5552 = vmatprep.mubr.msk.bf16.mxu1 %vm1079_vm2, %v6673_v40 }
 0x3c3   :  { %v2861_v29 = vpop.f32.mrf.mxu1 }
 0x3c5   :  { %v8009_v18 = vpop.f32.mrf.mxu1 }
 0x3c7   :  { %v2864_v22 = vpop.f32.mrf.mxu1 }
 0x3c9   :  { %v8011_v37 = vpop.f32.mrf.mxu1  ;;  %3058 = vmatmul.mubr.bf16.gmra.mxu1 %v6674_v33  ;;  %v6689_v33 = vld [vmem:[%s8654_s3 + $0x48] sm:$0xff] }
 0x3ca   :  { %5553 = vmatprep.mubr.msk.bf16.mxu1 %vm1079_vm2, %v6675_v47 }
 0x3cb   :  { %v2869_v52 = vpop.f32.mrf.mxu1 }
 0x3cc   :  { %v6690_v52 = vld [vmem:[%s8654_s3 + $0x40] sm:$0xff] }
 0x3cd   :  { %v8020_v10 = vpop.f32.mrf.mxu1 }
 0x3cf   :  { %v2872_v13 = vpop.f32.mrf.mxu1 }
 0x3d1   :  { %v8022_v57 = vpop.f32.mrf.mxu1  ;;  %3066 = vmatmul.mubr.bf16.gmra.mxu1 %v6676_v58 }
 0x3d2   :  { %5554 = vmatprep.mubr.msk.bf16.mxu1 %vm1079_vm2, %v6677_v44 }
 0x3d3   :  { %v2877_v6 = vpop.f32.mrf.mxu1 }
 0x3d5   :  { %v2878_v60 = vpop.f32.mrf.mxu1 }
 0x3d6   :  { %6243 = vmatmul.mubr.msk.f32.vlgmr.msra.gmra.mxu0 %vm1469_vm4, %v2878_v60 }
 0x3d7   :  { %6264 = vmatpush3.msra.mxu0 %v6678_v8  ;;  %v2880_v45 = vpop.f32.mrf.mxu1  ;;  %6245 = vmatprep.mubr.msk.f32.mxu0 %vm6732_vm3, %v6731_v48 }
 0x3d8   :  { %6265 = vmatprep.subr.mxu0 %v6731_v48 }
 0x3d9   :  { %v2883_v0 = vpop.f32.mrf.mxu1  ;;  %6266 = vmatpush3.msra.mxu0 %v6679_v49  ;;  %3074 = vmatmul.mubr.bf16.gmra.mxu1 %v6680_v23 }
 0x3da   :  { %6246 = vmatmul.mubr.msk.f32.gmra.mxu0 %vm1469_vm4, %v2883_v0  ;;  %6288 = vmatprep.subr.mxu0 %v6731_v48 }
 0x3db   :  { %v2885_v17 = vpop.f32.mrf.mxu1  ;;  %6248 = vmatprep.mubr.msk.f32.mxu0 %vm6732_vm3, %v6731_v48  ;;  %5555 = vmatprep.mubr.msk.bf16.mxu1 %vm1079_vm2, %v6681_v20  ;;  %v6691_v20 = vld [vmem:[%s8654_s3 + $0x58] sm:$0xff] }
 0x3dd   :  { %v2886_v4 = vpop.f32.mrf.mxu1 }
 0x3de   :  { %6249 = vmatmul.mubr.msk.f32.gmra.mxu0 %vm1469_vm4, %v2886_v4 }
 0x3df   :  { %v2888_v54 = vpop.f32.mrf.mxu1  ;;  %6251 = vmatprep.mubr.msk.f32.mxu0 %vm6732_vm3, %v6731_v48 }
 0x3e0   :  { %v6692_v54 = vld [vmem:[%s8654_s3 + $0x50] sm:$0xff] }
 0x3e1   :  { %v2891_v7 = vpop.f32.mrf.mxu1  ;;  %3082 = vmatmul.mubr.bf16.gmra.mxu1 %v6682_v53 }
 0x3e2   :  { %6252 = vmatmul.mubr.msk.f32.gmra.mxu0 %vm1469_vm4, %v2891_v7  ;;  %5556 = vmatprep.mubr.msk.bf16.mxu1 %vm1079_vm2, %v6683_v35 }
 0x3e3   :  { %v2893_v63 = vpop.f32.mrf.mxu1  ;;  %6254 = vmatprep.mubr.msk.f32.mxu0 %vm6732_vm3, %v6731_v48 }
 0x3e4   :  { %v8195_v63 = vld [vmem:[%s8657_s6] sm:$0xff] }
 0x3e5   :  { %v2894_v9 = vpop.f32.mrf.mxu1 }
 0x3e6   :  { %6255 = vmatmul.mubr.msk.f32.gmra.mxu0 %vm1469_vm4, %v2894_v9 }
 0x3e7   :  { %v2896_v14 = vpop.f32.mrf.mxu1  ;;  %6257 = vmatprep.mubr.msk.f32.mxu0 %vm6732_vm3, %v6731_v48 }
 0x3e8   :  { %v8202_v14 = vld [vmem:[%s8657_s6 + $0x10] sm:$0xff] }
 0x3e9   :  { %v2899_v61 = vpop.f32.mrf.mxu1  ;;  %3090 = vmatmul.mubr.bf16.gmra.mxu1 %v6684_v56 }
 0x3ea   :  { %6258 = vmatmul.mubr.msk.f32.gmra.mxu0 %vm1469_vm4, %v2899_v61  ;;  %5557 = vmatprep.mubr.msk.bf16.mxu1 %vm1079_vm2, %v7346_v34  ;;  %v6685_v34 = vld [vmem:[%s8654_s3 + $0x28] sm:$0xff] }
 0x3eb   :  { %v2901_v62 = vpop.f32.mrf.mxu1  ;;  %6260 = vmatprep.mubr.msk.f32.mxu0 %vm6732_vm3, %v6731_v48 }
 0x3ed   :  { %v2902_v11 = vpop.f32.mrf.mxu1 }
 0x3ee   :  { %6261 = vmatmul.mubr.msk.f32.gmra.mxu0 %vm1469_vm4, %v2902_v11 }
 0x3ef   :  { %v2904_v26 = vpop.f32.mrf.mxu1  ;;  %6267 = vmatprep.mubr.msk.f32.mxu0 %vm6732_vm3, %v6731_v48 }
 0x3f1   :  { %v2907_v16 = vpop.f32.mrf.mxu1  ;;  %3098 = vmatmul.mubr.bf16.gmra.mxu1 %v7355_v39 }
 0x3f2   :  { %6268 = vmatmul.mubr.msk.f32.vlgmr.msra.gmra.mxu0 %vm1469_vm4, %v7989_v32 }
 0x3f3   :  { %6289 = vmatpush3.msra.mxu0 %v6685_v34  ;;  %6270 = vmatprep.mubr.msk.f32.mxu0 %vm6732_vm3, %v6731_v48  ;;  %v2909_v19 = vpop.f32.mrf.mxu1  ;;  %v8216_v34 = vld [vmem:[%s8657_s6 + $0x20] sm:$0xff] }
 0x3f4   :  { %6290 = vmatprep.subr.mxu0 %v6731_v48 }
 0x3f5   :  { %6291 = vmatpush3.msra.mxu0 %v6686_v46  ;;  %v2910_v39 = vpop.f32.mrf.mxu1 }
 0x3f6   :  { %6271 = vmatmul.mubr.msk.f32.gmra.mxu0 %vm1469_vm4, %v7998_v25  ;;  %6313 = vmatprep.subr.mxu0 %v6731_v48 }
 0x3f7   :  { %6273 = vmatprep.mubr.msk.f32.mxu0 %vm6732_vm3, %v6731_v48  ;;  %v2912_v12 = vpop.f32.mrf.mxu1 }
 0x3f9   :  { %v2915_v36 = vpop.f32.mrf.mxu1 }
 0x3fa   :  { %6274 = vmatmul.mubr.msk.f32.gmra.mxu0 %vm1469_vm4, %v8000_v42 }
 0x3fb   :  { %6276 = vmatprep.mubr.msk.f32.mxu0 %vm6732_vm3, %v6731_v48  ;;  %v2917_v30 = vpop.f32.mrf.mxu1 }
 0x3fd   :  { %v2918_v1 = vpop.f32.mrf.mxu1 }
 0x3fe   :  { %6277 = vmatmul.mubr.msk.f32.gmra.mxu0 %vm1469_vm4, %v8009_v18 }
 0x3ff   :  { %6279 = vmatprep.mubr.msk.f32.mxu0 %vm6732_vm3, %v6731_v48  ;;  %v2920_v50 = vpop.f32.mrf.mxu1 }
 0x401   :  { %v2923_v21 = vpop.f32.mrf.mxu1 }
 0x402   :  { %6280 = vmatmul.mubr.msk.f32.gmra.mxu0 %vm1469_vm4, %v8011_v37 }
 0x403   :  { %6282 = vmatprep.mubr.msk.f32.mxu0 %vm6732_vm3, %v6731_v48  ;;  %v2925_v24 = vpop.f32.mrf.mxu1 }
 0x405   :  { %v2926_v51 = vpop.f32.mrf.mxu1 }
 0x406   :  { %6283 = vmatmul.mubr.msk.f32.gmra.mxu0 %vm1469_vm4, %v8020_v10 }
 0x407   :  { %6285 = vmatprep.mubr.msk.f32.mxu0 %vm6732_vm3, %v6731_v48  ;;  %v2928_v59 = vpop.f32.mrf.mxu1 }
 0x409   :  { %v2931_v27 = vpop.f32.mrf.mxu1 }
 0x40a   :  { %6286 = vmatmul.mubr.msk.f32.gmra.mxu0 %vm1469_vm4, %v8022_v57 }
 0x40b   :  { %6292 = vmatprep.mubr.msk.f32.mxu0 %vm6732_vm3, %v6731_v48  ;;  %v2933_v31 = vpop.f32.mrf.mxu1 }
 0x40c   :  { %v8238_v31 = vld [vmem:[%s8657_s6 + $0x40] sm:$0xff] }
 0x40d   :  { %v2934_v3 = vpop.f32.mrf.mxu1 }
 0x40e   :  { %6293 = vmatmul.mubr.msk.f32.vlgmr.msra.gmra.mxu0 %vm1469_vm4, %v2907_v16 }
 0x40f   :  { %6314 = vmatpush3.msra.mxu0 %v6687_v41  ;;  %6295 = vmatprep.mubr.msk.f32.mxu0 %vm6732_vm3, %v6731_v48  ;;  %v2936_v15 = vpop.f32.mrf.mxu1 }
 0x410   :  { %6315 = vmatprep.subr.mxu0 %v6731_v48 }
 0x411   :  { %6316 = vmatpush3.msra.mxu0 %v6688_v43  ;;  %v2939_v32 = vpop.f32.mrf.mxu1 }
 0x412   :  { %6296 = vmatmul.mubr.msk.f32.gmra.mxu0 %vm1469_vm4, %v2910_v39  ;;  %6338 = vmatprep.subr.mxu0 %v6731_v48 }
 0x413   :  { %6298 = vmatprep.mubr.msk.f32.mxu0 %vm6732_vm3, %v6731_v48  ;;  %v2941_v2 = vpop.f32.mrf.mxu1 }
 0x415   :  { %v2942_v55 = vpop.f32.mrf.mxu1 }
 0x416   :  { %6299 = vmatmul.mubr.msk.f32.gmra.mxu0 %vm1469_vm4, %v2915_v36 }
 0x417   :  { %6301 = vmatprep.mubr.msk.f32.mxu0 %vm6732_vm3, %v6731_v48  ;;  %v2944_v28 = vpop.f32.mrf.mxu1 }
 0x419   :  { %v2947_v25 = vpop.f32.mrf.mxu1 }
 0x41a   :  { %6302 = vmatmul.mubr.msk.f32.gmra.mxu0 %vm1469_vm4, %v2918_v1  ;;  %v8227_v1 = vld [vmem:[%s8657_s6 + $0x30] sm:$0xff] }
 0x41b   :  { %6304 = vmatprep.mubr.msk.f32.mxu0 %vm6732_vm3, %v6731_v48  ;;  %v2949_v38 = vpop.f32.mrf.mxu1 }
 0x41d   :  { %v2950_v42 = vpop.f32.mrf.mxu1 }
 0x41e   :  { %6305 = vmatmul.mubr.msk.f32.gmra.mxu0 %vm1469_vm4, %v2923_v21 }
 0x41f   :  { %6307 = vmatprep.mubr.msk.f32.mxu0 %vm6732_vm3, %v6731_v48  ;;  %v2952_v5 = vpop.f32.mrf.mxu1 }
 0x421   :  { %v2955_v40 = vpop.f32.mrf.mxu1 }
 0x422   :  { %6308 = vmatmul.mubr.msk.f32.gmra.mxu0 %vm1469_vm4, %v2926_v51 }
 0x423   :  { %6310 = vmatprep.mubr.msk.f32.mxu0 %vm6732_vm3, %v6731_v48  ;;  %v2957_v29 = vpop.f32.mrf.mxu1 }
 0x424   :  { %v8260_v29 = vld [vmem:[%s8657_s6 + $0x60] sm:$0xff] }
 0x425   :  { %v2958_v18 = vpop.f32.mrf.mxu1 }
 0x426   :  { %6311 = vmatmul.mubr.msk.f32.gmra.mxu0 %vm1469_vm4, %v2931_v27 }
 0x427   :  { %6317 = vmatprep.mubr.msk.f32.mxu0 %vm6732_vm3, %v6731_v48  ;;  %v2960_v22 = vpop.f32.mrf.mxu1 }
 0x429   :  { %v2963_v37 = vpop.f32.mrf.mxu1 }
 0x42a   :  { %6318 = vmatmul.mubr.msk.f32.vlgmr.msra.gmra.mxu0 %vm1469_vm4, %v2934_v3 }
 0x42b   :  { %6339 = vmatpush3.msra.mxu0 %v6689_v33  ;;  %6320 = vmatprep.mubr.msk.f32.mxu0 %vm6732_vm3, %v6731_v48  ;;  %v2965_v47 = vpop.f32.mrf.mxu1  ;;  %v6693_v33 = vld [vmem:[%s8654_s3 + $0x68] sm:$0xff] }
 0x42c   :  { %6340 = vmatprep.subr.mxu0 %v6731_v48 }
 0x42d   :  { %6341 = vmatpush3.msra.mxu0 %v6690_v52  ;;  %v2966_v10 = vpop.f32.mrf.mxu1 }
 0x42e   :  { %6321 = vmatmul.mubr.msk.f32.gmra.mxu0 %vm1469_vm4, %v2939_v32  ;;  %6363 = vmatprep.subr.mxu0 %v6731_v48 }
 0x42f   :  { %6323 = vmatprep.mubr.msk.f32.mxu0 %vm6732_vm3, %v6731_v48  ;;  %v2968_v13 = vpop.f32.mrf.mxu1 }
 0x430   :  { %v6694_v13 = vld [vmem:[%s8654_s3 + $0x60] sm:$0xff] }
 0x431   :  { %v2971_v57 = vpop.f32.mrf.mxu1 }
 0x432   :  { %6324 = vmatmul.mubr.msk.f32.gmra.mxu0 %vm1469_vm4, %v2942_v55  ;;  %v8249_v55 = vld [vmem:[%s8657_s6 + $0x50] sm:$0xff] }
 0x433   :  { %6326 = vmatprep.mubr.msk.f32.mxu0 %vm6732_vm3, %v6731_v48  ;;  %v2973_v58 = vpop.f32.mrf.mxu1 }
 0x435   :  { %v2974_v44 = vpop.f32.mrf.mxu1 }
 0x436   :  { %6327 = vmatmul.mubr.msk.f32.gmra.mxu0 %vm1469_vm4, %v2947_v25 }
 0x437   :  { %6329 = vmatprep.mubr.msk.f32.mxu0 %vm6732_vm3, %v6731_v48  ;;  %v2976_v6 = vpop.f32.mrf.mxu1 }
 0x439   :  { %v2979_v60 = vpop.f32.mrf.mxu1 }
 0x43a   :  { %6330 = vmatmul.mubr.msk.f32.gmra.mxu0 %vm1469_vm4, %v2950_v42 }
 0x43b   :  { %6332 = vmatprep.mubr.msk.f32.mxu0 %vm6732_vm3, %v6731_v48  ;;  %v2981_v8 = vpop.f32.mrf.mxu1 }
 0x43d   :  { %v2982_v45 = vpop.f32.mrf.mxu1 }
 0x43e   :  { %6333 = vmatmul.mubr.msk.f32.gmra.mxu0 %vm1469_vm4, %v2955_v40 }
 0x43f   :  { %6335 = vmatprep.mubr.msk.f32.mxu0 %vm6732_vm3, %v6731_v48  ;;  %v2984_v0 = vpop.f32.mrf.mxu1 }
 0x441   :  { %v2987_v49 = vpop.f32.mrf.mxu1 }
 0x442   :  { %6336 = vmatmul.mubr.msk.f32.gmra.mxu0 %vm1469_vm4, %v2958_v18 }
 0x443   :  { %6342 = vmatprep.mubr.msk.f32.mxu0 %vm6732_vm3, %v6731_v48  ;;  %v2989_v23 = vpop.f32.mrf.mxu1 }
 0x445   :  { %v8174_v17 = vpop.f32.mrf.mxu1 }
 0x446   :  { %6343 = vmatmul.mubr.msk.f32.vlgmr.msra.gmra.mxu0 %vm1469_vm4, %v2963_v37 }
 0x447   :  { %6364 = vmatpush3.msra.mxu0 %v6691_v20  ;;  %6345 = vmatprep.mubr.msk.f32.mxu0 %vm6732_vm3, %v6731_v48  ;;  %v2992_v4 = vpop.f32.mrf.mxu1 }
 0x448   :  { %6365 = vmatprep.subr.mxu0 %v6731_v48 }
 0x449   :  { %6366 = vmatpush3.msra.mxu0 %v6692_v54  ;;  %v8186_v7 = vpop.f32.mrf.mxu1  ;;  %v6695_v54 = vld [vmem:[%s8654_s3 + $0x78] sm:$0xff] }
 0x44a   :  { %6346 = vmatmul.mubr.msk.f32.gmra.mxu0 %vm1469_vm4, %v2966_v10  ;;  %v2738_v53 = vpop.f32.mrf.mxu0  ;;  %6388 = vmatprep.subr.mxu0 %v6731_v48 }
 0x44b   :  { %6348 = vmatprep.mubr.msk.f32.mxu0 %vm6732_vm3, %v6731_v48  ;;  %v2997_v35 = vpop.f32.mrf.mxu1  ;;  %v2779_v62 = vmul.f32 %v2738_v53, %v8195_v63  ;;  %v6696_v53 = vld [vmem:[%s8654_s3 + $0x70] sm:$0xff] }
 0x44c   :  { %v8197_v9 = vpop.f32.mrf.mxu0 }
 0x44d   :  { %v8204_v61 = vpop.f32.mrf.mxu1 }
 0x44e   :  { %6349 = vmatmul.mubr.msk.f32.gmra.mxu0 %vm1469_vm4, %v2971_v57  ;;  %v2744_v56 = vpop.f32.mrf.mxu0 }
 0x44f   :  { %v2781_v11 = vmul.f32 %v2744_v56, %v8202_v14  ;;  %6351 = vmatprep.mubr.msk.f32.mxu0 %vm6732_vm3, %v6731_v48  ;;  %v3000_v26 = vpop.f32.mrf.mxu1 }
 0x450   :  { %v8211_v16 = vpop.f32.mrf.mxu0 }
 0x451   :  { %v2793_v19 = vadd.f32 %v2781_v11, %v2779_v62  ;;  %v3003_v46 = vpop.f32.mrf.mxu1 }
 0x452   :  { %6352 = vmatmul.mubr.msk.f32.gmra.mxu0 %vm1469_vm4, %v2974_v44  ;;  %v2750_v39 = vpop.f32.mrf.mxu0 }
 0x453   :  { %v2783_v12 = vmul.f32 %v2750_v39, %v8216_v34  ;;  %6354 = vmatprep.mubr.msk.f32.mxu0 %vm6732_vm3, %v6731_v48  ;;  %v3005_v36 = vpop.f32.mrf.mxu1 }
 0x454   :  { %v8222_v30 = vpop.f32.mrf.mxu0 }
 0x455   :  { %v2794_v50 = vadd.f32 %v2793_v19, %v2783_v12  ;;  %v3006_v21 = vpop.f32.mrf.mxu1 }
 0x456   :  { %6355 = vmatmul.mubr.msk.f32.gmra.mxu0 %vm1469_vm4, %v2979_v60  ;;  %v2756_v24 = vpop.f32.mrf.mxu0 }
 0x457   :  { %v2785_v51 = vmul.f32 %v2756_v24, %v8227_v1  ;;  %6357 = vmatprep.mubr.msk.f32.mxu0 %vm6732_vm3, %v6731_v48  ;;  %v3008_v59 = vpop.f32.mrf.mxu1 }
 0x458   :  { %v8233_v27 = vpop.f32.mrf.mxu0 }
 0x459   :  { %v2795_v3 = vadd.f32 %v2794_v50, %v2785_v51  ;;  %v3011_v41 = vpop.f32.mrf.mxu1 }
 0x45a   :  { %6358 = vmatmul.mubr.msk.f32.gmra.mxu0 %vm1469_vm4, %v2982_v45  ;;  %v2762_v15 = vpop.f32.mrf.mxu0 }
 0x45b   :  { %v2787_v43 = vmul.f32 %v2762_v15, %v8238_v31  ;;  %6360 = vmatprep.mubr.msk.f32.mxu0 %vm6732_vm3, %v6731_v48  ;;  %v3013_v32 = vpop.f32.mrf.mxu1 }
 0x45c   :  { %v8244_v2 = vpop.f32.mrf.mxu0  ;;  %v6698_v32 = vld [vmem:[%s8654_s3 + $0x80] sm:$0xff] }
 0x45d   :  { %v2796_v28 = vadd.f32 %v2795_v3, %v2787_v43  ;;  %v3014_v25 = vpop.f32.mrf.mxu1 }
 0x45e   :  { %6361 = vmatmul.mubr.msk.f32.gmra.mxu0 %vm1469_vm4, %v2987_v49  ;;  %v2768_v38 = vpop.f32.mrf.mxu0 }
 0x45f   :  { %v2789_v42 = vmul.f32 %v2768_v38, %v8249_v55  ;;  %6367 = vmatprep.mubr.msk.f32.mxu0 %vm6732_vm3, %v6731_v48  ;;  %v3016_v5 = vpop.f32.mrf.mxu1  ;;  %v6699_v38 = vld [vmem:[%s8656_s5 + $0x38] sm:$0xff] }
 0x460   :  { %v8255_v40 = vpop.f32.mrf.mxu0 }
 0x461   :  { %v2797_v18 = vadd.f32 %v2796_v28, %v2789_v42  ;;  %v3019_v22 = vpop.f32.mrf.mxu1 }
 0x462   :  { %6368 = vmatmul.mubr.msk.f32.vlgmr.msra.gmra.mxu0 %vm1469_vm4, %v8174_v17  ;;  %v2774_v37 = vpop.f32.mrf.mxu0 }
 0x463   :  { %6389 = vmatpush3.msra.mxu0 %v6693_v33  ;;  %v2791_v47 = vmul.f32 %v2774_v37, %v8260_v29  ;;  %6370 = vmatprep.mubr.msk.f32.mxu0 %vm6732_vm3, %v6731_v48  ;;  %v3021_v52 = vpop.f32.mrf.mxu1 }
 0x464   :  { %6390 = vmatprep.subr.mxu0 %v6731_v48  ;;  %v8323_v36 = vpop.f32.mrf.mxu0 }
 0x465   :  { %v8271_v10 = vadd.f32 %v2797_v18, %v2791_v47  ;;  %6391 = vmatpush3.msra.mxu0 %v6694_v13  ;;  %v3022_v57 = vpop.f32.mrf.mxu1 }
 0x466   :  { %6371 = vmatmul.mubr.msk.f32.gmra.mxu0 %vm1469_vm4, %v8186_v7  ;;  %6413 = vmatprep.subr.mxu0 %v6731_v48 }
 0x467   :  { %6373 = vmatprep.mubr.msk.f32.mxu0 %vm6732_vm3, %v6731_v48  ;;  %v3024_v58 = vpop.f32.mrf.mxu1 }
 0x469   :  { %v3027_v44 = vpop.f32.mrf.mxu1 }
 0x46a   :  { %6374 = vmatmul.mubr.msk.f32.gmra.mxu0 %vm1469_vm4, %v8204_v61 }
 0x46b   :  { %6376 = vmatprep.mubr.msk.f32.mxu0 %vm6732_vm3, %v6731_v48  ;;  %v3029_v6 = vpop.f32.mrf.mxu1 }
 0x46d   :  { %v3030_v60 = vpop.f32.mrf.mxu1 }
 0x46e   :  { %6377 = vmatmul.mubr.msk.f32.gmra.mxu0 %vm1469_vm4, %v3003_v46 }
 0x46f   :  { %6379 = vmatprep.mubr.msk.f32.mxu0 %vm6732_vm3, %v6731_v48  ;;  %v3032_v8 = vpop.f32.mrf.mxu1 }
 0x471   :  { %v3035_v45 = vpop.f32.mrf.mxu1 }
 0x472   :  { %6380 = vmatmul.mubr.msk.f32.gmra.mxu0 %vm1469_vm4, %v3006_v21 }
 0x473   :  { %6382 = vmatprep.mubr.msk.f32.mxu0 %vm6732_vm3, %v6731_v48  ;;  %v3037_v0 = vpop.f32.mrf.mxu1 }
 0x475   :  { %v3038_v49 = vpop.f32.mrf.mxu1 }
 0x476   :  { %6383 = vmatmul.mubr.msk.f32.gmra.mxu0 %vm1469_vm4, %v3011_v41  ;;  %v6697_v41 = vld [vmem:[%s8654_s3 + $0x88] sm:$0xff] }
 0x477   :  { %6385 = vmatprep.mubr.msk.f32.mxu0 %vm6732_vm3, %v6731_v48  ;;  %v3040_v23 = vpop.f32.mrf.mxu1 }
 0x479   :  { %v3043_v17 = vpop.f32.mrf.mxu1 }
 0x47a   :  { %6386 = vmatmul.mubr.msk.f32.gmra.mxu0 %vm1469_vm4, %v3014_v25 }
 0x47b   :  { %6392 = vmatprep.mubr.msk.f32.mxu0 %vm6732_vm3, %v6731_v48  ;;  %v3045_v20 = vpop.f32.mrf.mxu1 }
 0x47d   :  { %v3046_v4 = vpop.f32.mrf.mxu1 }
 0x47e   :  { %6393 = vmatmul.mubr.msk.f32.vlgmr.msra.gmra.mxu0 %vm1469_vm4, %v3019_v22 }
 0x47f   :  { %6414 = vmatpush3.msra.mxu0 %v6695_v54  ;;  %6395 = vmatprep.mubr.msk.f32.mxu0 %vm6732_vm3, %v6731_v48  ;;  %v3048_v7 = vpop.f32.mrf.mxu1 }
 0x480   :  { %6415 = vmatprep.subr.mxu0 %v6731_v48 }
 0x481   :  { %6416 = vmatpush3.msra.mxu0 %v6696_v53  ;;  %v3051_v35 = vpop.f32.mrf.mxu1 }
 0x482   :  { %6396 = vmatmul.mubr.msk.f32.gmra.mxu0 %vm1469_vm4, %v3022_v57  ;;  %6438 = vmatprep.subr.mxu0 %v6731_v48 }
 0x483   :  { %6398 = vmatprep.mubr.msk.f32.mxu0 %vm6732_vm3, %v6731_v48  ;;  %v3053_v61 = vpop.f32.mrf.mxu1 }
 0x485   :  { %v3054_v56 = vpop.f32.mrf.mxu1 }
 0x486   :  { %6399 = vmatmul.mubr.msk.f32.gmra.mxu0 %vm1469_vm4, %v3027_v44 }
 0x487   :  { %6401 = vmatprep.mubr.msk.f32.mxu0 %vm6732_vm3, %v6731_v48  ;;  %v3056_v62 = vpop.f32.mrf.mxu1 }
 0x489   :  { %v3059_v11 = vpop.f32.mrf.mxu1 }
 0x48a   :  { %6402 = vmatmul.mubr.msk.f32.gmra.mxu0 %vm1469_vm4, %v3030_v60 }
 0x48b   :  { %6404 = vmatprep.mubr.msk.f32.mxu0 %vm6732_vm3, %v6731_v48  ;;  %v3061_v26 = vpop.f32.mrf.mxu1 }
 0x48c   :  { %v6702_v26 = vld [vmem:[%s8656_s5 + $0x20] sm:$0xff] }
 0x48d   :  { %v3062_v19 = vpop.f32.mrf.mxu1 }
 0x48e   :  { %6405 = vmatmul.mubr.msk.f32.gmra.mxu0 %vm1469_vm4, %v3035_v45 }
 0x48f   :  { %6407 = vmatprep.mubr.msk.f32.mxu0 %vm6732_vm3, %v6731_v48  ;;  %v3064_v46 = vpop.f32.mrf.mxu1 }
 0x490   :  { %v6703_v46 = vld [vmem:[%s8656_s5 + $0x18] sm:$0xff] }
 0x491   :  { %v3067_v39 = vpop.f32.mrf.mxu1 }
 0x492   :  { %6408 = vmatmul.mubr.msk.f32.gmra.mxu0 %vm1469_vm4, %v3038_v49 }
 0x493   :  { %6410 = vmatprep.mubr.msk.f32.mxu0 %vm6732_vm3, %v6731_v48  ;;  %v3069_v12 = vpop.f32.mrf.mxu1 }
 0x494   :  { %v6704_v12 = vld [vmem:[%s8656_s5 + $0x10] sm:$0xff] }
 0x495   :  { %v3070_v50 = vpop.f32.mrf.mxu1 }
 0x496   :  { %v3192_v21 = vpop.f32.mrf.mxu0  ;;  %6411 = vmatmul.mubr.msk.f32.gmra.mxu0 %vm1469_vm4, %v3043_v17 }
 0x497   :  { %6417 = vmatprep.mubr.msk.f32.mxu0 %vm6732_vm3, %v6731_v48  ;;  %v3072_v24 = vpop.f32.mrf.mxu1 }
 0x498   :  { %v6244_v51 = vpop.f32.mrf.mxu0  ;;  %v6706_v24 = vld [vmem:[%s8656_s5] sm:$0xff] }
 0x499   :  { %v3075_v59 = vpop.f32.mrf.mxu1 }
 0x49a   :  { %v3197_v3 = vpop.f32.mrf.mxu0  ;;  %6418 = vmatmul.mubr.msk.f32.vlgmr.msra.gmra.mxu0 %vm1469_vm4, %v3046_v4 }
 0x49b   :  { %6439 = vmatpush3.msra.mxu0 %v6697_v41  ;;  %6420 = vmatprep.mubr.msk.f32.mxu0 %vm6732_vm3, %v6731_v48  ;;  %v3077_v15 = vpop.f32.mrf.mxu1 }
 0x49c   :  { %v6247_v43 = vpop.f32.mrf.mxu0  ;;  %6440 = vmatprep.subr.mxu0 %v6731_v48 }
 0x49d   :  { %6441 = vmatpush3.msra.mxu0 %v6698_v32  ;;  %v3078_v28 = vpop.f32.mrf.mxu1 }
 0x49e   :  { %v3202_v25 = vpop.f32.mrf.mxu0  ;;  %6421 = vmatmul.mubr.msk.f32.gmra.mxu0 %vm1469_vm4, %v3051_v35  ;;  %4302 = vmatprep.subr.mxu0 %v6699_v38 }
 0x49f   :  { %6423 = vmatprep.mubr.msk.f32.mxu0 %vm6732_vm3, %v6731_v48  ;;  %v3080_v42 = vpop.f32.mrf.mxu1 }
 0x4a0   :  { %v6250_v5 = vpop.f32.mrf.mxu0 }
 0x4a1   :  { %v3083_v18 = vpop.f32.mrf.mxu1 }
 0x4a2   :  { %v3207_v22 = vpop.f32.mrf.mxu0  ;;  %6424 = vmatmul.mubr.msk.f32.gmra.mxu0 %vm1469_vm4, %v3054_v56  ;;  %v6700_v56 = vld [vmem:[%s8656_s5 + $0x30] sm:$0xff] }
 0x4a3   :  { %6426 = vmatprep.mubr.msk.f32.mxu0 %vm6732_vm3, %v6731_v48  ;;  %v3085_v37 = vpop.f32.mrf.mxu1 }
 0x4a4   :  { %v6253_v33 = vpop.f32.mrf.mxu0 }
 0x4a5   :  { %v3086_v47 = vpop.f32.mrf.mxu1 }
 0x4a6   :  { %v3212_v52 = vpop.f32.mrf.mxu0  ;;  %6427 = vmatmul.mubr.msk.f32.gmra.mxu0 %vm1469_vm4, %v3059_v11  ;;  %v6701_v11 = vld [vmem:[%s8656_s5 + $0x28] sm:$0xff] }
 0x4a7   :  { %6429 = vmatprep.mubr.msk.f32.mxu0 %vm6732_vm3, %v6731_v48  ;;  %v3088_v13 = vpop.f32.mrf.mxu1 }
 0x4a8   :  { %v6256_v57 = vpop.f32.mrf.mxu0 }
 0x4a9   :  { %v3091_v58 = vpop.f32.mrf.mxu1 }
 0x4aa   :  { %v3217_v44 = vpop.f32.mrf.mxu0  ;;  %6430 = vmatmul.mubr.msk.f32.gmra.mxu0 %vm1469_vm4, %v3062_v19 }
 0x4ab   :  { %6432 = vmatprep.mubr.msk.f32.mxu0 %vm6732_vm3, %v6731_v48  ;;  %v3093_v6 = vpop.f32.mrf.mxu1 }
 0x4ac   :  { %v6259_v60 = vpop.f32.mrf.mxu0 }
 0x4ad   :  { %v3094_v8 = vpop.f32.mrf.mxu1 }
 0x4ae   :  { %v3222_v45 = vpop.f32.mrf.mxu0  ;;  %6433 = vmatmul.mubr.msk.f32.gmra.mxu0 %vm1469_vm4, %v3067_v39 }
 0x4af   :  { %6435 = vmatprep.mubr.msk.f32.mxu0 %vm6732_vm3, %v6731_v48  ;;  %v3096_v0 = vpop.f32.mrf.mxu1 }
 0x4b0   :  { %v6262_v49 = vpop.f32.mrf.mxu0 }
 0x4b1   :  { %v3099_v23 = vpop.f32.mrf.mxu1 }
 0x4b2   :  { %v3313_v17 = vpop.f32.mrf.mxu0  ;;  %6436 = vmatmul.mubr.msk.f32.gmra.mxu0 %vm1469_vm4, %v3070_v50 }
 0x4b3   :  { %v3314_v20 = vadd.f32 %v3313_v17, %v3192_v21  ;;  %6442 = vmatprep.mubr.msk.f32.mxu0 %vm6732_vm3, %v6731_v48  ;;  %v3101_v4 = vpop.f32.mrf.mxu1  ;;  %v6705_v21 = vld [vmem:[%s8656_s5 + $0x8] sm:$0xff] }
 0x4b4   :  { %v6269_v54 = vpop.f32.mrf.mxu0 }
 0x4b5   :  { %v3102_v7 = vpop.f32.mrf.mxu1 }
 0x4b6   :  { %v3318_v53 = vpop.f32.mrf.mxu0  ;;  %6443 = vmatmul.mubr.msk.f32.vlgmr.msra.gmra.mxu0 %vm1469_vm4, %v3075_v59  ;;  %v4457_v7 = vld [vmem:[%s8658_s7 + $0xf8] sm:$0xff] }
 0x4b7   :  { %v3319_v35 = vadd.f32 %v3318_v53, %v3197_v3  ;;  %6445 = vmatprep.mubr.msk.f32.mxu0 %vm6732_vm3, %v6731_v48  ;;  %v3103_v61 = vpop.f32.mrf.mxu1  ;;  %4303 = vmatpush1.msra.mxu0 %v6700_v56 }
 0x4b8   :  { %v6272_v62 = vpop.f32.mrf.mxu0  ;;  %4304 = vmatprep.subr.mxu0 %v6701_v11  ;;  %5872 = vmatprep.subr.mxu1 %v4457_v7  ;;  %v4441_v61 = vld [vmem:[%s8658_s7 + $0x78] sm:$0xff]  ;;  %v4451_v7 = vld [vmem:[%s8658_s7 + $0xc8] sm:$0xff] }
 0x4b9   :  { %4305 = vmatpush1.msra.mxu0 %v6702_v26  ;;  %5873 = vmatpush3.msra.mxu1 %v4441_v61 }
 0x4ba   :  { %v3323_v19 = vpop.f32.mrf.mxu0  ;;  %6446 = vmatmul.mubr.msk.f32.gmra.mxu0 %vm1469_vm4, %v3078_v28  ;;  %4306 = vmatprep.subr.mxu0 %v6703_v46 }
 0x4bb   :  { %v3324_v39 = vadd.f32 %v3323_v19, %v3202_v25  ;;  %6448 = vmatprep.mubr.msk.f32.mxu0 %vm6732_vm3, %v6731_v48  ;;  %4307 = vmatpush1.msra.mxu0 %v6704_v12 }
 0x4bc   :  { %v6275_v50 = vpop.f32.mrf.mxu0  ;;  %4308 = vmatprep.subr.mxu0 %v6705_v21 }
 0x4bd   :  { %4309 = vmatpush1.msra.mxu0 %v6706_v24 }
 0x4be   :  { %v3328_v51 = vpop.f32.mrf.mxu0  ;;  %6449 = vmatmul.mubr.msk.f32.gmra.mxu0 %vm1469_vm4, %v3083_v18  ;;  %6488 = vmatprep.subr.mxu0 %v6731_v48 }
 0x4bf   :  { %v3329_v59 = vadd.f32 %v3328_v51, %v3207_v22  ;;  %6451 = vmatprep.mubr.msk.f32.mxu0 %vm6732_vm3, %v6731_v48 }
 0x4c0   :  { %v6278_v3 = vpop.f32.mrf.mxu0 }
 0x4c2   :  { %v3333_v41 = vpop.f32.mrf.mxu0  ;;  %6452 = vmatmul.mubr.msk.f32.gmra.mxu0 %vm1469_vm4, %v3086_v47 }
 0x4c3   :  { %v3334_v15 = vadd.f32 %v3333_v41, %v3212_v52  ;;  %6454 = vmatprep.mubr.msk.f32.mxu0 %vm6732_vm3, %v6731_v48 }
 0x4c4   :  { %v6281_v43 = vpop.f32.mrf.mxu0 }
 0x4c5   :  { %v4440_v43 = vld [vmem:[%s8658_s7 + $0x70] sm:$0xff] }
 0x4c6   :  { %v3338_v32 = vpop.f32.mrf.mxu0  ;;  %6455 = vmatmul.mubr.msk.f32.gmra.mxu0 %vm1469_vm4, %v3091_v58 }
 0x4c7   :  { %v3339_v28 = vadd.f32 %v3338_v32, %v3217_v44  ;;  %6457 = vmatprep.mubr.msk.f32.mxu0 %vm6732_vm3, %v6731_v48 }
 0x4c8   :  { %v6284_v25 = vpop.f32.mrf.mxu0 }
 0x4ca   :  { %v3343_v38 = vpop.f32.mrf.mxu0  ;;  %6458 = vmatmul.mubr.msk.f32.gmra.mxu0 %vm1469_vm4, %v3094_v8 }
 0x4cb   :  { %v3344_v42 = vadd.f32 %v3343_v38, %v3222_v45  ;;  %6460 = vmatprep.mubr.msk.f32.mxu0 %vm6732_vm3, %v6731_v48 }
 0x4cc   :  { %v6287_v5 = vpop.f32.mrf.mxu0 }
 0x4ce   :  { %v3434_v18 = vpop.f32.mrf.mxu0  ;;  %6461 = vmatmul.mubr.msk.f32.gmra.mxu0 %vm1469_vm4, %v3099_v23 }
 0x4cf   :  { %v3468_v22 = vadd.f32 %v3434_v18, %v3314_v20  ;;  %4342 = vmatprep.mubr.f32.mxu0 %v6731_v48 }
 0x4d0   :  { %v6294_v37 = vpop.f32.mrf.mxu0 }
 0x4d2   :  { %v3439_v33 = vpop.f32.mrf.mxu0 }
 0x4d3   :  { %v3469_v47 = vadd.f32 %v3439_v33, %v3319_v35  ;;  %v4455_v33 = vld [vmem:[%s8658_s7 + $0xe8] sm:$0xff] }
 0x4d4   :  { %v6297_v52 = vpop.f32.mrf.mxu0 }
 0x4d6   :  { %v3444_v13 = vpop.f32.mrf.mxu0 }
 0x4d7   :  { %v3470_v57 = vadd.f32 %v3444_v13, %v3324_v39 }
 0x4d8   :  { %v6300_v58 = vpop.f32.mrf.mxu0 }
 0x4da   :  { %v3449_v44 = vpop.f32.mrf.mxu0 }
 0x4db   :  { %v3471_v6 = vadd.f32 %v3449_v44, %v3329_v59  ;;  %v4456_v59 = vld [vmem:[%s8658_s7 + $0xf0] sm:$0xff] }
 0x4dc   :  { %v6303_v60 = vpop.f32.mrf.mxu0  ;;  %5874 = vmatprep.subr.mxu1 %v4456_v59  ;;  %v4431_v59 = vld [vmem:[%s8658_s7 + $0x28] sm:$0xff] }
 0x4dd   :  { %5875 = vmatpush3.msra.mxu1 %v4440_v43  ;;  %v4430_v43 = vld [vmem:[%s8658_s7 + $0x20] sm:$0xff] }
 0x4de   :  { %v3454_v8 = vpop.f32.mrf.mxu0  ;;  %5876 = vmatprep.subr.mxu1 %v4455_v33 }
 0x4df   :  { %v3472_v45 = vadd.f32 %v3454_v8, %v3334_v15  ;;  %v4454_v8 = vld [vmem:[%s8658_s7 + $0xe0] sm:$0xff] }
 0x4e0   :  { %v6306_v0 = vpop.f32.mrf.mxu0 }
 0x4e1   :  { %v4453_v0 = vld [vmem:[%s8658_s7 + $0xd8] sm:$0xff] }
 0x4e2   :  { %v3459_v49 = vpop.f32.mrf.mxu0 }
 0x4e3   :  { %v3473_v17 = vadd.f32 %v3459_v49, %v3339_v28 }
 0x4e4   :  { %v6309_v4 = vpop.f32.mrf.mxu0 }
 0x4e6   :  { %v3464_v23 = vpop.f32.mrf.mxu0 }
 0x4e7   :  { %v3474_v20 = vadd.f32 %v3464_v23, %v3344_v42  ;;  %v4452_v23 = vld [vmem:[%s8658_s7 + $0xd0] sm:$0xff] }
 0x4e8   :  { %v6312_v54 = vpop.f32.mrf.mxu0 }
 0x4e9   :  { %v4436_v54 = vld [vmem:[%s8658_s7 + $0x50] sm:$0xff] }
 0x4ea   :  { %v3562_v53 = vpop.f32.mrf.mxu0 }
 0x4eb   :  { %v3596_v35 = vadd.f32 %v3562_v53, %v3468_v22 }
 0x4ec   :  { %v6319_v56 = vpop.f32.mrf.mxu0 }
 0x4ed   :  { %v4450_v56 = vld [vmem:[%s8658_s7 + $0xc0] sm:$0xff] }
 0x4ee   :  { %v3567_v62 = vpop.f32.mrf.mxu0 }
 0x4ef   :  { %v3597_v11 = vadd.f32 %v3567_v62, %v3469_v47 }
 0x4f0   :  { %v6322_v26 = vpop.f32.mrf.mxu0 }
 0x4f1   :  { %v4449_v26 = vld [vmem:[%s8658_s7 + $0xb8] sm:$0xff] }
 0x4f2   :  { %v3572_v19 = vpop.f32.mrf.mxu0 }
 0x4f3   :  { %v3598_v46 = vadd.f32 %v3572_v19, %v3470_v57  ;;  %v4439_v57 = vld [vmem:[%s8658_s7 + $0x68] sm:$0xff] }
 0x4f4   :  { %v6325_v39 = vpop.f32.mrf.mxu0  ;;  %5877 = vmatpush3.msra.mxu1 %v4439_v57 }
 0x4f5   :  { %5878 = vmatprep.subr.mxu1 %v4454_v8 }
 0x4f6   :  { %v3577_v12 = vpop.f32.mrf.mxu0 }
 0x4f7   :  { %v3599_v50 = vadd.f32 %v3577_v12, %v3471_v6  ;;  %v4448_v12 = vld [vmem:[%s8658_s7 + $0xb0] sm:$0xff] }
 0x4f8   :  { %v6328_v21 = vpop.f32.mrf.mxu0 }
 0x4f9   :  { %v4432_v21 = vld [vmem:[%s8658_s7 + $0x30] sm:$0xff] }
 0x4fa   :  { %v3582_v24 = vpop.f32.mrf.mxu0 }
 0x4fb   :  { %v3600_v51 = vadd.f32 %v3582_v24, %v3472_v45  ;;  %v4438_v45 = vld [vmem:[%s8658_s7 + $0x60] sm:$0xff]  ;;  %v4447_v24 = vld [vmem:[%s8658_s7 + $0xa8] sm:$0xff] }
 0x4fc   :  { %v6331_v3 = vpop.f32.mrf.mxu0  ;;  %5879 = vmatpush3.msra.mxu1 %v4438_v45 }
 0x4fd   :  { %5880 = vmatprep.subr.mxu1 %v4453_v0 }
 0x4fe   :  { %v3587_v41 = vpop.f32.mrf.mxu0 }
 0x4ff   :  { %v3601_v15 = vadd.f32 %v3587_v41, %v3473_v17  ;;  %v4437_v17 = vld [vmem:[%s8658_s7 + $0x58] sm:$0xff]  ;;  %v4446_v41 = vld [vmem:[%s8658_s7 + $0xa0] sm:$0xff] }
 0x500   :  { %v6334_v32 = vpop.f32.mrf.mxu0  ;;  %5881 = vmatpush3.msra.mxu1 %v4437_v17 }
 0x501   :  { %5882 = vmatprep.subr.mxu1 %v4452_v23  ;;  %v4445_v32 = vld [vmem:[%s8658_s7 + $0x98] sm:$0xff] }
 0x502   :  { %v3592_v28 = vpop.f32.mrf.mxu0  ;;  %5883 = vmatpush3.msra.mxu1 %v4436_v54 }
 0x503   :  { %v3602_v25 = vadd.f32 %v3592_v28, %v3474_v20  ;;  %5884 = vmatprep.subr.mxu1 %v4451_v7 }
 0x504   :  { %v6337_v38 = vpop.f32.mrf.mxu0 }
 0x506   :  { %v3690_v42 = vpop.f32.mrf.mxu0 }
 0x507   :  { %v3724_v5 = vadd.f32 %v3690_v42, %v3596_v35  ;;  %v4435_v35 = vld [vmem:[%s8658_s7 + $0x48] sm:$0xff]  ;;  %v4444_v42 = vld [vmem:[%s8658_s7 + $0x90] sm:$0xff] }
 0x508   :  { %v6344_v18 = vpop.f32.mrf.mxu0  ;;  %5885 = vmatpush3.msra.mxu1 %v4435_v35 }
 0x509   :  { %5886 = vmatprep.subr.mxu1 %v4450_v56  ;;  %v4428_v18 = vld [vmem:[%s8658_s7 + $0x10] sm:$0xff] }
 0x50a   :  { %v3695_v22 = vpop.f32.mrf.mxu0 }
 0x50b   :  { %v3725_v37 = vadd.f32 %v3695_v22, %v3597_v11  ;;  %v4434_v11 = vld [vmem:[%s8658_s7 + $0x40] sm:$0xff] }
 0x50c   :  { %v6347_v47 = vpop.f32.mrf.mxu0  ;;  %5887 = vmatpush3.msra.mxu1 %v4434_v11 }
 0x50d   :  { %5888 = vmatprep.subr.mxu1 %v4449_v26 }
 0x50e   :  { %v3700_v52 = vpop.f32.mrf.mxu0 }
 0x50f   :  { %v8416_v13 = vadd.f32 %v3700_v52, %v3598_v46  ;;  %v4433_v46 = vld [vmem:[%s8658_s7 + $0x38] sm:$0xff] }
 0x510   :  { %v6350_v58 = vpop.f32.mrf.mxu0  ;;  %5889 = vmatpush3.msra.mxu1 %v4433_v46 }
 0x511   :  { %5890 = vmatprep.subr.mxu1 %v4448_v12 }
 0x512   :  { %v3705_v44 = vpop.f32.mrf.mxu0  ;;  %5891 = vmatpush3.msra.mxu1 %v4432_v21 }
 0x513   :  { %v8421_v6 = vadd.f32 %v3705_v44, %v3599_v50  ;;  %5892 = vmatprep.subr.mxu1 %v4447_v24 }
 0x514   :  { %v6353_v60 = vpop.f32.mrf.mxu0  ;;  %5893 = vmatpush3.msra.mxu1 %v4431_v59 }
 0x515   :  { %5894 = vmatprep.subr.mxu1 %v4446_v41 }
 0x516   :  { %v3710_v49 = vpop.f32.mrf.mxu0  ;;  %5895 = vmatpush3.msra.mxu1 %v4430_v43 }
 0x517   :  { %v3728_v4 = vadd.f32 %v3710_v49, %v3600_v51  ;;  %5896 = vmatprep.subr.mxu1 %v4445_v32 }
 0x518   :  { %v6356_v20 = vpop.f32.mrf.mxu0 }
 0x51a   :  { %v3715_v53 = vpop.f32.mrf.mxu0 }
 0x51b   :  { %v3729_v61 = vadd.f32 %v3715_v53, %v3601_v15 }
 0x51c   :  { %v6359_v62 = vpop.f32.mrf.mxu0 }
 0x51e   :  { %v3720_v19 = vpop.f32.mrf.mxu0 }
 0x51f   :  { %v3730_v39 = vadd.f32 %v3720_v19, %v3602_v25  ;;  %v4429_v25 = vld [vmem:[%s8658_s7 + $0x18] sm:$0xff] }
 0x520   :  { %v6362_v50 = vpop.f32.mrf.mxu0  ;;  %5897 = vmatpush3.msra.mxu1 %v4429_v25 }
 0x521   :  { %5898 = vmatprep.subr.mxu1 %v4444_v42 }
 0x522   :  { %v3818_v51 = vpop.f32.mrf.mxu0  ;;  %5899 = vmatpush3.msra.mxu1 %v4428_v18 }
 0x523   :  { %v3852_v3 = vadd.f32 %v3818_v51, %v3724_v5 }
 0x524   :  { %v6369_v15 = vpop.f32.mrf.mxu0 }
 0x526   :  { %v3823_v28 = vpop.f32.mrf.mxu0 }
 0x527   :  { %v3853_v38 = vadd.f32 %v3823_v28, %v3725_v37 }
 0x528   :  { %v6372_v5 = vpop.f32.mrf.mxu0 }
 0x52a   :  { %v3828_v22 = vpop.f32.mrf.mxu0 }
 0x52b   :  { %v3854_v33 = vadd.f32 %v3828_v22, %v8416_v13 }
 0x52c   :  { %v6375_v47 = vpop.f32.mrf.mxu0 }
 0x52e   :  { %v3833_v52 = vpop.f32.mrf.mxu0 }
 0x52f   :  { %v3855_v37 = vadd.f32 %v3833_v52, %v8421_v6 }
 0x530   :  { %v6378_v57 = vpop.f32.mrf.mxu0 }
 0x532   :  { %v3838_v58 = vpop.f32.mrf.mxu0 }
 0x533   :  { %v8491_v44 = vadd.f32 %v3838_v58, %v3728_v4  ;;  %v6707_v58 = vld [vmem:[%s8655_s4] ss:$0 sm:$0xff] }
 0x534   :  { %v6381_v60 = vpop.f32.mrf.mxu0 }
 0x536   :  { %v3843_v8 = vpop.f32.mrf.mxu0 }
 0x537   :  { %v8493_v45 = vadd.f32 %v3843_v8, %v3729_v61 }
 0x538   :  { %v6384_v0 = vpop.f32.mrf.mxu0 }
 0x53a   :  { %v3848_v49 = vpop.f32.mrf.mxu0 }
 0x53b   :  { %v8495_v17 = vadd.f32 %v3848_v49, %v3730_v39 }
 0x53c   :  { %v6387_v23 = vpop.f32.mrf.mxu0 }
 0x53e   :  { %v3946_v20 = vpop.f32.mrf.mxu0 }
 0x53f   :  { %v3980_v25 = vadd.f32 %v3946_v20, %v3852_v3 }
 0x540   :  { %v6394_v13 = vpop.f32.mrf.mxu0 }
 0x542   :  { %v3951_v54 = vpop.f32.mrf.mxu0 }
 0x543   :  { %v3981_v22 = vadd.f32 %v3951_v54, %v3853_v38 }
 0x544   :  { %v6397_v7 = vpop.f32.mrf.mxu0 }
 0x546   :  { %v3956_v53 = vpop.f32.mrf.mxu0 }
 0x547   :  { %v3982_v0 = vadd.f32 %v3956_v53, %v3854_v33 }
 0x548   :  { %v6400_v35 = vpop.f32.mrf.mxu0 }
 0x54a   :  { %v3961_v6 = vpop.f32.mrf.mxu0 }
 0x54b   :  { %v3983_v38 = vadd.f32 %v3961_v6, %v3855_v37 }
 0x54c   :  { %v6403_v56 = vpop.f32.mrf.mxu0 }
 0x54e   :  { %v3966_v62 = vpop.f32.mrf.mxu0 }
 0x54f   :  { %v3984_v33 = vadd.f32 %v3966_v62, %v8491_v44 }
 0x550   :  { %v6406_v4 = vpop.f32.mrf.mxu0 }
 0x552   :  { %v3971_v11 = vpop.f32.mrf.mxu0 }
 0x553   :  { %v3985_v6 = vadd.f32 %v3971_v11, %v8493_v45 }
 0x554   :  { %v6409_v26 = vpop.f32.mrf.mxu0 }
 0x556   :  { %v3976_v19 = vpop.f32.mrf.mxu0 }
 0x557   :  { %v3986_v62 = vadd.f32 %v3976_v19, %v8495_v17  ;;  %v4443_v17 = vld [vmem:[%s8658_s7 + $0x88] sm:$0xff] }
 0x558   :  { %v6412_v61 = vpop.f32.mrf.mxu0  ;;  %v4427_v19 = vld [vmem:[%s8658_s7 + $0x8] sm:$0xff]  ;;  %5900 = vmatprep.subr.mxu1 %v4443_v17 }
 0x559   :  { %5901 = vmatpush3.msra.mxu1 %v4427_v19 }
 0x55a   :  { %v4074_v46 = vpop.f32.mrf.mxu0 }
 0x55b   :  { %v4108_v5 = vadd.f32 %v4074_v46, %v3980_v25 }
 0x55c   :  { %v6419_v12 = vpop.f32.mrf.mxu0 }
 0x55e   :  { %v4079_v50 = vpop.f32.mrf.mxu0 }
 0x55f   :  { %v4109_v57 = vadd.f32 %v4079_v50, %v3981_v22 }
 0x560   :  { %v6422_v39 = vpop.f32.mrf.mxu0 }
 0x562   :  { %v4084_v21 = vpop.f32.mrf.mxu0 }
 0x563   :  { %v4110_v7 = vadd.f32 %v4084_v21, %v3982_v0 }
 0x564   :  { %v6425_v24 = vpop.f32.mrf.mxu0 }
 0x566   :  { %v4089_v51 = vpop.f32.mrf.mxu0 }
 0x567   :  { %v4111_v4 = vadd.f32 %v4089_v51, %v3983_v38 }
 0x568   :  { %v6428_v59 = vpop.f32.mrf.mxu0 }
 0x56a   :  { %v4094_v41 = vpop.f32.mrf.mxu0 }
 0x56b   :  { %v4112_v50 = vadd.f32 %v4094_v41, %v3984_v33 }
 0x56c   :  { %v6431_v15 = vpop.f32.mrf.mxu0 }
 0x56e   :  { %v4099_v43 = vpop.f32.mrf.mxu0 }
 0x56f   :  { %v4113_v59 = vadd.f32 %v4099_v43, %v3985_v6 }
 0x570   :  { %v6434_v32 = vpop.f32.mrf.mxu0 }
 0x572   :  { %v4104_v28 = vpop.f32.mrf.mxu0 }
 0x574   :  { %v6437_v42 = vpop.f32.mrf.mxu0 }
 0x575   :  { %v4114_v42 = vadd.f32 %v4104_v28, %v3986_v62  ;;  %v4442_v28 = vld [vmem:[%s8658_s7 + $0x80] sm:$0xff] }
 0x576   :  { %v4202_v18 = vpop.f32.mrf.mxu0  ;;  %5902 = vmatprep.subr.mxu1 %v4442_v28 }
 0x577   :  { %v4236_v47 = vadd.f32 %v4202_v18, %v4108_v5 }
 0x578   :  { %v6444_v52 = vpop.f32.mrf.mxu0 }
 0x579   :  { %v4243_v60 = vadd.f32 %v6707_v58, %v4236_v47  ;;  %v4426_v52 = vld [vmem:[%s8658_s7] sm:$0xff] }
 0x57a   :  { %v4207_v8 = vpop.f32.mrf.mxu0  ;;  %5903 = vmatpush3.msra.mxu1 %v4426_v52 }
 0x57b   :  { %v4250_v49 = vmax.f32 %v4243_v60, 0.0  ;;  %v4237_v23 = vadd.f32 %v4207_v8, %v4109_v57  ;;  %6463 = vmatprep.subr.mxu1 %v6731_v48  ;;  %v783_v57 = vld [vmem:[%s8657_s6 + $0x18] sm:$0xff]  ;;  %v781_v60 = vld [vmem:[%s8657_s6 + $0x8] sm:$0xff] }
 0x57c   :  { %v6447_v13 = vpop.f32.mrf.mxu0  ;;  %v785_v8 = vld [vmem:[%s8657_s6 + $0x28] sm:$0xff] }
 0x57d   :  { %v4244_v35 = vadd.f32 %v6707_v58, %v4237_v23  ;;  %5621 = vmatmul.mubr.msk.f32.vlgmr.msra.gmra.mxu0 %vm2650_vm5, %v4250_v49  ;;  %v2782_v49 = vmul.f32 %v8211_v16, %v783_v57  ;;  %v787_v23 = vld [vmem:[%s8657_s6 + $0x38] sm:$0xff]  ;;  %v2780_v13 = vmul.f32 %v8197_v9, %v781_v60  ;;  %v793_v9 = vld [vmem:[%s8657_s6 + $0x68] sm:$0xff] }
 0x57e   :  { %v4212_v3 = vpop.f32.mrf.mxu0  ;;  %4348 = vmatprep.mubr.f32.mxu0 %v6731_v48  ;;  %v791_v16 = vld [vmem:[%s8657_s6 + $0x58] sm:$0xff] }
 0x57f   :  { %v4251_v20 = vmax.f32 %v4244_v35, 0.0  ;;  %v4238_v54 = vadd.f32 %v4212_v3, %v4110_v7  ;;  %v2784_v35 = vmul.f32 %v8222_v30, %v785_v8  ;;  %v789_v3 = vld [vmem:[%s8657_s6 + $0x48] sm:$0xff]  ;;  %v2805_v38 = vadd.f32 %v2782_v49, %v2780_v13 }
 0x580   :  { %v6450_v56 = vpop.f32.mrf.mxu0  ;;  %v2790_v33 = vmul.f32 %v8255_v40, %v791_v16 }
 0x581   :  { %v4245_v26 = vadd.f32 %v6707_v58, %v4238_v54  ;;  %5622 = vmatmul.mubr.msk.f32.gmra.mxu0 %vm2650_vm5, %v4251_v20  ;;  %v2786_v54 = vmul.f32 %v8233_v27, %v787_v23  ;;  %v2792_v27 = vmul.f32 %v8323_v36, %v793_v9 }
 0x582   :  { %v4217_v61 = vpop.f32.mrf.mxu0  ;;  %4354 = vmatprep.mubr.f32.mxu0 %v6731_v48 }
 0x583   :  { %v4252_v53 = vmax.f32 %v4245_v26, 0.0  ;;  %v4239_v46 = vadd.f32 %v4217_v61, %v4111_v4  ;;  %v2806_v4 = vadd.f32 %v2805_v38, %v2784_v35  ;;  %v2788_v26 = vmul.f32 %v8244_v2, %v789_v3 }
 0x584   :  { %v6453_v12 = vpop.f32.mrf.mxu0 }
 0x585   :  { %v4246_v39 = vadd.f32 %v6707_v58, %v4239_v46  ;;  %5623 = vmatmul.mubr.msk.f32.gmra.mxu0 %vm2650_vm5, %v4252_v53  ;;  %v2807_v61 = vadd.f32 %v2806_v4, %v2786_v54 }
 0x586   :  { %v4222_v37 = vpop.f32.mrf.mxu0  ;;  %4360 = vmatprep.mubr.f32.mxu0 %v6731_v48 }
 0x587   :  { %v4253_v21 = vmax.f32 %v4246_v39, 0.0  ;;  %v4240_v24 = vadd.f32 %v4222_v37, %v4112_v50  ;;  %v2808_v46 = vadd.f32 %v2807_v61, %v2788_v26 }
 0x588   :  { %v6456_v51 = vpop.f32.mrf.mxu0 }
 0x589   :  { %v4247_v15 = vadd.f32 %v6707_v58, %v4240_v24  ;;  %5624 = vmatmul.mubr.msk.f32.gmra.mxu0 %vm2650_vm5, %v4253_v21  ;;  %v2809_v39 = vadd.f32 %v2808_v46, %v2790_v33  ;;  %v4535_v46 = vld [vmem:[%s8660_s9] sm:$0xff] }
 0x58a   :  { %v4227_v44 = vpop.f32.mrf.mxu0  ;;  %4366 = vmatprep.mubr.f32.mxu0 %v6731_v48 }
 0x58b   :  { %v4254_v41 = vmax.f32 %v4247_v15, 0.0  ;;  %v4241_v32 = vadd.f32 %v4227_v44, %v4113_v59  ;;  %v2810_v24 = vadd.f32 %v2809_v39, %v2792_v27 }
 0x58c   :  { %v6459_v25 = vpop.f32.mrf.mxu0 }
 0x58d   :  { %v4248_v5 = vadd.f32 %v6707_v58, %v4241_v32  ;;  %5625 = vmatmul.mubr.msk.f32.gmra.mxu0 %vm2650_vm5, %v4254_v41  ;;  %v2811_v25 = vrot.slane %v2810_v24, 4 }
 0x58e   :  { %v4232_v45 = vpop.f32.mrf.mxu0  ;;  %4372 = vmatprep.mubr.f32.mxu0 %v6731_v48 }
 0x58f   :  { %v4255_v11 = vmax.f32 %v4248_v5, 0.0  ;;  %v4242_v43 = vadd.f32 %v4232_v45, %v4114_v42  ;;  %v2799_v45 = vrot.slane %v8271_v10, 4  ;;  %v2812_v28 = vadd.f32 %v2811_v25, %v2810_v24 }
 0x590   :  { %v6462_v18 = vpop.f32.mrf.mxu0 }
 0x591   :  { %v4249_v22 = vadd.f32 %v6707_v58, %v4242_v43  ;;  %5626 = vmatmul.mubr.msk.f32.gmra.mxu0 %vm2650_vm5, %v4255_v11 }
 0x592   :  { %4378 = vmatprep.mubr.f32.mxu0 %v6731_v48 }
 0x593   :  { %v4256_v47 = vmax.f32 %v4249_v22, 0.0 }
 0x595   :  { %5627 = vmatmul.mubr.msk.f32.gmra.mxu0 %vm2650_vm5, %v4256_v47 }
 0x596   :  { %6490 = vmatprep.mubr.msk.f32.mxu0 %vm6732_vm3, %v6731_v48 }
 0x63d   :  { %v4344_v58 = vpop.f32.mrf.mxu0 }
 0x63e   :  { %v4385_v37 = vmul.f32 %v4344_v58, %v8195_v63 }
 0x63f   :  { %v4346_v0 = vpop.f32.mrf.mxu0 }
 0x640   :  { %v4386_v51 = vmul.f32 %v4346_v0, %v781_v60 }
 0x641   :  { %v4350_v7 = vpop.f32.mrf.mxu0 }
 0x642   :  { %v4387_v12 = vmul.f32 %v4350_v7, %v8202_v14 }
 0x643   :  { %v4352_v20 = vpop.f32.mrf.mxu0 }
 0x644   :  { %v4388_v6 = vmul.f32 %v4352_v20, %v783_v57  ;;  %v4399_v59 = vadd.f32 %v4387_v12, %v4385_v37  ;;  %v5628_v12 = vld [vmem:[%s8659_s8] ss:$0 sm:$0xff] }
 0x645   :  { %v4356_v56 = vpop.f32.mrf.mxu0 }
 0x646   :  { %v4389_v2 = vmul.f32 %v4356_v56, %v8216_v34  ;;  %v4411_v62 = vadd.f32 %v4388_v6, %v4386_v51  ;;  %v4618_v6 = vld [vmem:[%s8662_s11] sm:$0xff] }
 0x647   :  { %v4358_v30 = vpop.f32.mrf.mxu0 }
 0x648   :  { %v4390_v15 = vmul.f32 %v4358_v30, %v785_v8  ;;  %v4400_v41 = vadd.f32 %v4399_v59, %v4389_v2  ;;  %v5629_v2 = vld [vmem:[%s8661_s10] ss:$0 sm:$0xff] }
 0x649   :  { %v4362_v53 = vpop.f32.mrf.mxu0 }
 0x64a   :  { %v4391_v40 = vmul.f32 %v4362_v53, %v8227_v1  ;;  %v4412_v42 = vadd.f32 %v4411_v62, %v4390_v15  ;;  %v5632_v15 = vld [vmem:[%s8660_s9 + $0x8] sm:$0xff] }
 0x64b   :  { %v4364_v50 = vpop.f32.mrf.mxu0 }
 0x64c   :  { %v4392_v36 = vmul.f32 %v4364_v50, %v787_v23  ;;  %v4401_v63 = vadd.f32 %v4400_v41, %v4391_v40 }
 0x64d   :  { %v4368_v21 = vpop.f32.mrf.mxu0 }
 0x64e   :  { %v4393_v14 = vmul.f32 %v4368_v21, %v8238_v31  ;;  %v4413_v43 = vadd.f32 %v4412_v42, %v4392_v36  ;;  %v2800_v31 = vadd.f32 %v2799_v45, %v8271_v10  ;;  %v5636_v36 = vld [vmem:[%s8662_s11 + $0x8] sm:$0xff] }
 0x64f   :  { %v4370_v44 = vpop.f32.mrf.mxu0 }
 0x650   :  { %v4394_v5 = vmul.f32 %v4370_v44, %v789_v3  ;;  %v4402_v18 = vadd.f32 %v4401_v63, %v4393_v14  ;;  %v2801_v49 = vrot.slane %v2800_v31, 2  ;;  %v5634_v14 = vld [vmem:[%s8661_s10 + $0x1] ss:$0 sm:$0xff] }
 0x651   :  { %v4374_v32 = vpop.f32.mrf.mxu0 }
 0x652   :  { %v4395_v34 = vmul.f32 %v4374_v32, %v8249_v55  ;;  %v4414_v47 = vadd.f32 %v4413_v43, %v4394_v5  ;;  %v2813_v55 = vrot.slane %v2812_v28, 2  ;;  %v2802_v38 = vadd.f32 %v2801_v49, %v2800_v31  ;;  %v5638_v5 = vld [vmem:[%s8660_s9 + $0x10] sm:$0xff] }
 0x653   :  { %v4376_v11 = vpop.f32.mrf.mxu0 }
 0x654   :  { %v4396_v22 = vmul.f32 %v4376_v11, %v791_v16  ;;  %v4403_v17 = vadd.f32 %v4402_v18, %v4395_v34  ;;  %v2814_v3 = vadd.f32 %v2813_v55, %v2812_v28  ;;  %v2803_v10 = vrot.slane %v2802_v38, 1  ;;  %v5642_v34 = vld [vmem:[%s8662_s11 + $0x10] sm:$0xff]  ;;  %v5644_v28 = vld [vmem:[%s8660_s9 + $0x18] sm:$0xff] }
 0x655   :  { %v4380_v1 = vpop.f32.mrf.mxu0  ;;  %6489 = vmatpush3.msra.mxu0 %v5642_v34 }
 0x656   :  { %v4397_v19 = vmul.f32 %v4380_v1, %v8260_v29  ;;  %v4415_v57 = vadd.f32 %v4414_v47, %v4396_v22  ;;  %v2815_v56 = vrot.slane %v2814_v3, 1  ;;  %v2804_v61 = vadd.f32 %v2803_v10, %v2802_v38  ;;  %6498 = vmatprep.subr.mxu0 %v6731_v48  ;;  %v5640_v22 = vld [vmem:[%s8661_s10 + $0x2] ss:$0 sm:$0xff]  ;;  %v5650_v38 = vld [vmem:[%s8664_s13] ss:$0 sm:$0xff] }
 0x657   :  { %v4382_v52 = vpop.f32.mrf.mxu0 }
 0x658   :  { %v4404_v58 = vadd.f32 %v4403_v17, %v4397_v19  ;;  %v4398_v60 = vmul.f32 %v4382_v52, %v793_v9  ;;  %v2816_v30 = vadd.f32 %v2815_v56, %v2814_v3 }
 0x65a   :  { %v4405_v8 = vrot.slane %v4404_v58, 4  ;;  %v4416_v0 = vadd.f32 %v4415_v57, %v4398_v60  ;;  %v5648_v60 = vld [vmem:[%s8662_s11 + $0x18] sm:$0xff] }
 0x65c   :  { %v4406_v23 = vadd.f32 %v4405_v8, %v4404_v58  ;;  %v4417_v13 = vrot.slane %v4416_v0, 4  ;;  %v5646_v8 = vld [vmem:[%s8661_s10 + $0x3] ss:$0 sm:$0xff] }
 0x65e   :  { %v4407_v7 = vrot.slane %v4406_v23, 2  ;;  %v4418_v35 = vadd.f32 %v4417_v13, %v4416_v0 }
 0x660   :  { %v4408_v20 = vadd.f32 %v4407_v7, %v4406_v23  ;;  %v4419_v54 = vrot.slane %v4418_v35, 2 }
 0x662   :  { %v4409_v29 = vrot.slane %v4408_v20, 1  ;;  %v4420_v16 = vadd.f32 %v4419_v54, %v4418_v35 }
 0x664   :  { %v4421_v4 = vrot.slane %v4420_v16, 1  ;;  %v4410_v26 = vadd.f32 %v4409_v29, %v4408_v20 }
 0x666   :  { %v4422_v9 = vadd.f32 %v4421_v4, %v4420_v16  ;;  %v4424_v53 = vsel %vm4423_vm6, %v2804_v61, %v4410_v26 }
 0x668   :  { %v4425_v33 = vsel %vm4423_vm6, %v2816_v30, %v4422_v9 }
 0x669   :  { %4529 = vmatprep.mubr.f32.mxu1 %v4425_v33 }
 0x66a   :  { %4530 = vmatmul.mubr.f32.vlgmr.msra.gmra.mxu1 %v4424_v53 }
 0x66b   :  { %6465 = vmatprep.mubr.msk.f32.mxu1 %vm6732_vm3, %v6731_v48  ;;  %6464 = vmatpush3.msra.mxu1 %v4535_v46 }
 0x66c   :  { %6468 = vmatprep.subr.mxu1 %v6731_v48 }
 0x72a   :  { %v5904_v27 = vpop.f32.mrf.mxu1 }
 0x72c   :  { %v5905_v50 = vpop.f32.mrf.mxu1 }
 0x72d   :  { %v5906_v39 = vadd.f32 %v5905_v50, %v5904_v27 }
 0x72f   :  { %v4532_v37 = vadd.f32 %v5906_v39, %v5628_v12 }
 0x731   :  { %6466 = vmatmul.mubr.msk.f32.vlgmr.msra.gmra.mxu1 %vm4543_vm7, %v4532_v37 }
 0x732   :  { %6470 = vmatprep.mubr.msk.f32.mxu1 %vm6732_vm3, %v6731_v48  ;;  %6469 = vmatpush3.msra.mxu1 %v4618_v6 }
 0x733   :  { %6473 = vmatprep.subr.mxu1 %v6731_v48 }
 0x7f1   :  { %v4613_v21 = vpop.f32.mrf.mxu1 }
 0x7f2   :  { %v4614_v24 = vadd.f32 %v5629_v2, %v4613_v21 }
 0x7f3   :  { %v6467_v51 = vpop.f32.mrf.mxu1 }
 0x7f4   :  { %6607 = vtanh.f32 %v4614_v24 }
 0x801   :  { %v6608_v59 = vpop.eup %6607 }
 0x802   :  { %6471 = vmatmul.mubr.msk.f32.vlgmr.msra.gmra.mxu1 %vm4543_vm7, %v6608_v59 }
 0x803   :  { %6475 = vmatprep.mubr.msk.f32.mxu1 %vm6732_vm3, %v6731_v48  ;;  %6474 = vmatpush3.msra.mxu1 %v5632_v15 }
 0x804   :  { %6478 = vmatprep.subr.mxu1 %v6731_v48 }
 0x8c2   :  { %v4688_v40 = vpop.f32.mrf.mxu1 }
 0x8c3   :  { %v4692_v44 = vmul.f32 0.5, %v4688_v40 }
 0x8c4   :  { %v6472_v62 = vpop.f32.mrf.mxu1 }
 0x8c5   :  { %v4693_v41 = vadd.f32 %v4692_v44, %v4532_v37 }
 0x8c7   :  { %6476 = vmatmul.mubr.msk.f32.vlgmr.msra.gmra.mxu1 %vm4543_vm7, %v4693_v41 }
 0x8c8   :  { %6480 = vmatprep.mubr.msk.f32.mxu1 %vm6732_vm3, %v6731_v48  ;;  %6479 = vmatpush3.msra.mxu1 %v5636_v36 }
 0x8c9   :  { %6483 = vmatprep.subr.mxu1 %v6731_v48 }
 0x987   :  { %v4773_v32 = vpop.f32.mrf.mxu1 }
 0x988   :  { %v4774_v25 = vadd.f32 %v5634_v14, %v4773_v32 }
 0x989   :  { %v6477_v42 = vpop.f32.mrf.mxu1 }
 0x98a   :  { %6609 = vtanh.f32 %v4774_v25 }
 0x997   :  { %v6610_v63 = vpop.eup %6609 }
 0x998   :  { %6481 = vmatmul.mubr.msk.f32.vlgmr.msra.gmra.mxu1 %vm4543_vm7, %v6610_v63 }
 0x999   :  { %6485 = vmatprep.mubr.msk.f32.mxu1 %vm6732_vm3, %v6731_v48  ;;  %6484 = vmatpush3.msra.mxu1 %v5638_v5 }
 0x99a   :  { %6493 = vmatprep.subr.mxu1 %v6731_v48 }
 0xa58   :  { %v4849_v45 = vpop.f32.mrf.mxu1 }
 0xa59   :  { %v4853_v11 = vmul.f32 0.5, %v4849_v45 }
 0xa5a   :  { %v6482_v43 = vpop.f32.mrf.mxu1 }
 0xa5b   :  { %v4854_v18 = vadd.f32 %v4853_v11, %v4693_v41 }
 0xa5d   :  { %6486 = vmatmul.mubr.msk.f32.vlgmr.msra.gmra.mxu1 %vm4543_vm7, %v4854_v18 }
 0xa5e   :  { %6495 = vmatprep.mubr.msk.f32.mxu1 %vm6732_vm3, %v6731_v48  ;;  %6494 = vmatpush3.msra.mxu1 %v5644_v28 }
 0xa5f   :  { %6503 = vmatprep.subr.mxu1 %v6731_v48 }
 0xb1d   :  { %v4934_v1 = vpop.f32.mrf.mxu1 }
 0xb1e   :  { %v4935_v47 = vadd.f32 %v5640_v22, %v4934_v1 }
 0xb1f   :  { %v6487_v17 = vpop.f32.mrf.mxu1 }
 0xb20   :  { %6611 = vtanh.f32 %v4935_v47 }
 0xb2d   :  { %v6612_v19 = vpop.eup %6611 }
 0xb2e   :  { %6491 = vmatmul.mubr.msk.f32.vlgmr.msra.gmra.mxu0 %vm4543_vm7, %v6612_v19 }
 0xb2f   :  { %6500 = vmatprep.mubr.msk.f32.mxu0 %vm6732_vm3, %v6731_v48  ;;  %6499 = vmatpush3.msra.mxu0 %v5648_v60 }
 0xbee   :  { %v5010_v31 = vpop.f32.mrf.mxu0 }
 0xbef   :  { %v5014_v52 = vmul.f32 0.5, %v5010_v31 }
 0xbf0   :  { %v6492_v57 = vpop.f32.mrf.mxu0 }
 0xbf1   :  { %v5015_v58 = vadd.f32 %v5014_v52, %v4854_v18 }
 0xbf3   :  { %6496 = vmatmul.mubr.msk.f32.vlgmr.msra.gmra.mxu1 %vm4543_vm7, %v5015_v58 }
 0xbf4   :  { %6505 = vmatprep.mubr.msk.f32.mxu1 %vm6732_vm3, %v6731_v48  ;;  %v5177_v48 = vld [vmem:[%s8663_s12] sm:$0xff]  ;;  %s6733_s12 = smov [#allocation2]  }
 0xbf5   :  { %6504 = vmatpush3.msra.mxu1 %v5177_v48  ;;  %s5278_s13 = sshll.u32 %s6733_s12, 4  ;;  %s5279_s13 = int_to_ptr.vmem [resolvable:$true] %s5278_s13 }
 0xbf6   :  { %s6708_s4 = scalar_lea.vmem %s5279_s13, 32  ;;  %p6713_p1 = scmp.lt.s32.totalorder %s5279_s13, %s5279_s13 }
 0xbf7   :  { %p6709_p0 = scmp.ne.s32.totalorder %s5279_s13, %s6708_s4  ;;  %p6714_p2 = scmp.lt.s32.totalorder %s6708_s4, %s6708_s4 }
 0xbf9   :  { %p6715_p3 = por %p6714_p2, %p6713_p1 }
 0xbfb   :  { %p6716_p4 = pnand %p6715_p3, %p6709_p0 }
 0xcb3   :  { %v5095_v55 = vpop.f32.mrf.mxu1 }
 0xcb4   :  { %v5096_v0 = vadd.f32 %v5646_v8, %v5095_v55 }
 0xcb5   :  { %v6497_v49 = vpop.f32.mrf.mxu1 }
 0xcb6   :  { %6613 = vtanh.f32 %v5096_v0 }
 0xcc3   :  { %v6614_v23 = vpop.eup %6613 }
 0xcc4   :  { %6501 = vmatmul.mubr.msk.f32.vlgmr.msra.gmra.mxu0 %vm4543_vm7, %v6614_v23 }
 0xd84   :  { %v5171_v13 = vpop.f32.mrf.mxu0 }
 0xd85   :  { %v5175_v7 = vmul.f32 0.5, %v5171_v13 }
 0xd86   :  { %v6502_v35 = vpop.f32.mrf.mxu0 }
 0xd87   :  { %v5176_v3 = vadd.f32 %v5175_v7, %v5015_v58 }
 0xd89   :  { %6506 = vmatmul.mubr.msk.f32.vlgmr.msra.gmra.mxu1 %vm4543_vm7, %v5176_v3 }
 0xe49   :  { %v5254_v20 = vpop.f32.mrf.mxu1 }
 0xe4a   :  { %v5255_v54 = vadd.f32 %v5650_v38, %v5254_v20 }
 0xe4b   :  { %v6507_v29 = vpop.f32.mrf.mxu1 }
 0xe4c   :  { %v5259_v16 = vsel %vm5258_vm8, %v5255_v54, -inf }
 0xe4d   :  { %5260 = vmax.xlane.f32.xlu0 %v5259_v16 }
 0xed6   :  { %v5261_v56 = vpop.xlane.xlu0 %5260 }
 0xed7   :  { %v5262_v10 = vsub.f32 %v5255_v54, %v5261_v56 }
 0xed9   :  { %v5263_v4 = vmul.f32 1.442695, %v5262_v10 }
 0xedb   :  { %6615 = vpow2.f32 %v5263_v4 }
 0xee8   :  { %v6616_v26 = vpop.eup %6615 }
 0xee9   :  { %v5265_v30 = vsel %vm5258_vm8, %v6616_v26, 0.0 }
 0xeea   :  { %5266 = vadd.xlane.f32.xlu0 %v5265_v30 }
 0xf73   :  { %v5267_v9 = vpop.xlane.xlu0 %5266 }
 0xf74   :  { %6617 = vlog2.f32 %v5267_v9 }
 0xf81   :  { %v6618_v61 = vpop.eup %6617 }
 0xf82   :  { %v5269_v33 = vmul.f32 0.6931472, %v6618_v61 }
 0xf84   :  { %v5270_v53 = vsub.f32 %v5262_v10, %v5269_v33 }
 0xf86   :  { %5271 = vst.msk [vmem:[#allocation2] sm:$0x3] %vm5258_vm8, %v5270_v53 }
 0xf87   :  { %6719 = shalt.err (!%p6716_p4)
}
 0xf88   :  { %5281 = dma.vmem_to_hbm [thread:$0]  %s5279_s13, 32, %s8665_s14, [#allocation3]  }
 0xf89   :  { %6728 = dma.done.wait [#allocation3], 32  }
 0xf8a   :  { %6729 = vsyncadd [#allocation3], 4294967264 }
 0xf8b   :  { %5285 = vsyncpa [#allocation3], 1 }

</bundles_post_ra>
